<compile_context>
chip_gen: v7x
topology: tpu7x:2x2x1
jax: 0.10.0
libtpu: 0.0.40
codegen_flags: <defaults>
</compile_context>

<pallas_src>
import functools

import numpy as np
import jax
import jax.numpy as jnp
from jax import lax
from jax.experimental import pallas as pl
from jax.experimental.pallas import tpu as pltpu


def _round_up(a, m):
    return ((a + m - 1) // m) * m


# --------------------------------------------------------------------------------------
# Fused kernel (one grid step per batch element):
#   pass 1: conv (kh*kw tap matmuls) + BN0 + ReLU -> VMEM scratch, masked GAP accumulate
#   mid   : GAP -> fc1(+BN1) -> ReLU -> fc2 -> rSoftMax  (all in-kernel, tiny)
#   pass 2: attention-weighted radix sum, written per output row in NCHW layout
# --------------------------------------------------------------------------------------
def _split_attn_kernel(x_ref, m_ref, wt_ref, t0_ref, w1_ref, t1_ref, w2_ref, b2_ref,
                       o_ref, y_ref, *, taps, cin, radix, oc, oc_pad, wp, wo, ho_n,
                       nw, tile):
    cpad = radix * oc_pad
    n_tiles = -(-nw // tile)
    t0 = t0_ref[...]                                            # (cpad, 1) f32

    # ---- pass 1: conv + BN0 + ReLU into VMEM; masked GAP numerator -------------------
    gap_c = jnp.zeros((cpad, 1), jnp.float32)
    for t in range(n_tiles):
        base = t * tile
        tlen = min(tile, nw - base)
        acc = jnp.zeros((cpad, tlen), jnp.float32)
        for k, off in enumerate(taps):                          # static unroll, kh*kw taps
            xs = x_ref[0, :, base + off: base + off + tlen]     # (cin, tlen) bf16
            wk = wt_ref[:, k * cin:(k + 1) * cin]               # (cpad, cin) bf16
            acc = acc + jnp.dot(wk, xs, preferred_element_type=jnp.float32)
        acc = jnp.maximum(acc + t0, 0.0)                        # conv + BN0 + ReLU (fused)
        y_ref[:, base:base + tlen] = acc.astype(y_ref.dtype)
        # mask (already scaled by 1/HW) zeroes the seam columns of the wide grid
        gap_c = gap_c + jnp.sum(acc * m_ref[:, base:base + tlen], axis=1, keepdims=True)

    # ---- radix-summed GAP (per-channel mean) ------------------------------------------
    gap = gap_c[0:oc_pad, :]
    for r in range(1, radix):
        gap = gap + gap_c[r * oc_pad:(r + 1) * oc_pad, :]       # (oc_pad, 1)

    # ---- attention: fc1(+BN1) -> ReLU -> fc2 -> rSoftMax ------------------------------
    h = jnp.dot(w1_ref[...], gap, preferred_element_type=jnp.float32) + t1_ref[...]
    h = jnp.maximum(h, 0.0)                                     # (inter_pad, 1)
    logits = jnp.dot(w2_ref[...], h, preferred_element_type=jnp.float32) + b2_ref[...]
    if radix > 1:
        mx = logits[0:oc_pad, :]
        for r in range(1, radix):
            mx = jnp.maximum(mx, logits[r * oc_pad:(r + 1) * oc_pad, :])
        exps = [jnp.exp(logits[r * oc_pad:(r + 1) * oc_pad, :] - mx) for r in range(radix)]
        den = exps[0]
        for e in exps[1:]:
            den = den + e
        attn = [e / den for e in exps]                          # radix x (oc_pad, 1)
    else:
        attn = [jax.nn.sigmoid(logits)]

    # ---- pass 2: attention-weighted radix sum, direct NCHW output ---------------------
    for hrow in range(ho_n):                                    # static unroll over rows
        rbase = hrow * wp
        row = attn[0] * y_ref[0:oc_pad, rbase:rbase + wo]
        for r in range(1, radix):
            row = row + attn[r] * y_ref[r * oc_pad:(r + 1) * oc_pad, rbase:rbase + wo]
        o_ref[0, :, hrow, :] = row[0:oc, :].astype(o_ref.dtype)


# --------------------------------------------------------------------------------------
# Wrapper
# --------------------------------------------------------------------------------------
def split_attention_forward(x, params, *, kernel_size, stride, padding, dilation,
                            groups, radix, out_channels):
    assert groups == 1, "TODO(synk): groups>1 (cardinality) not implemented"
    assert stride == 1, "TODO(synk): stride>1 not supported by the fused wide-grid conv"
    B, Cin, H, W = x.shape
    kh = kw = kernel_size
    d = dilation
    Hp, Wp = H + 2 * padding, W + 2 * padding
    Ho, Wo = Hp - d * (kh - 1), Wp - d * (kw - 1)
    HW = Ho * Wo
    Nw = Ho * Wp                                   # "wide" output grid (seam cols masked)
    G = groups * radix
    cin_pg = Cin // G
    oc = out_channels
    cout = oc * radix
    oc_pad = _round_up(oc, 128)                    # lane-align each radix chunk
    C_pad = radix * oc_pad
    KK = kh * kw
    eps = 1e-5
    f32 = jnp.float32

    # ---- input: NCHW, zero-pad spatial, flatten spatial onto the lane axis, bf16 ------
    xp = jnp.pad(x, ((0, 0), (0, 0), (padding, padding), (padding, padding)))
    x_flat = xp.reshape(B, Cin, Hp * Wp)
    Nx = _round_up(Hp * Wp + (kw - 1) * d, 128)    # tail pad so every tap slice is in-bounds
    x_flat = jnp.pad(x_flat, ((0, 0), (0, 0), (0, Nx - Hp * Wp))).astype(jnp.bfloat16)

    # ---- GAP mask over the wide grid (zero on seam columns), pre-scaled by 1/HW -------
    pcol = np.arange(Nw) % Wp
    mask = jnp.asarray(((pcol < Wo).astype(np.float32) / float(HW)).reshape(1, Nw))

    # ---- per-tap conv weights (channel-major, block-diag over groups, BN0+bias folded)
    scale0 = params['bn0_gamma'] / jnp.sqrt(params['bn0_var'] + eps)
    t0_vec = (params['conv_b'] - params['bn0_mean']) * scale0 + params['bn0_beta']
    wconv = params['conv_w']                                   # (cout, cin_pg, kh, kw)
    wt = jnp.zeros((C_pad, KK * Cin), f32)
    t0 = jnp.zeros((C_pad, 1), f32)
    taps = []
    for i in range(kh):
        for j in range(kw):
            k = i * kw + j
            taps.append(i * d * Wp + j * d)
            for g in range(G):
                blk = (wconv[g * oc:(g + 1) * oc, :, i, j]
                       * scale0[g * oc:(g + 1) * oc, None])    # (oc, cin_pg)
                wt = wt.at[g * oc_pad:g * oc_pad + oc,
                           k * Cin + g * cin_pg:k * Cin + (g + 1) * cin_pg].set(blk)
    for g in range(G):
        t0 = t0.at[g * oc_pad:g * oc_pad + oc, 0].set(t0_vec[g * oc:(g + 1) * oc])
    wt = wt.astype(jnp.bfloat16)

    # ---- attention params (fc1 bias + BN1 folded), column layout -----------------------
    inter = params['fc1_w'].shape[0]
    inter_pad = _round_up(inter, 128)
    scale1 = params['bn1_gamma'] / jnp.sqrt(params['bn1_var'] + eps)
    w1t = jnp.zeros((inter_pad, oc_pad), f32)
    w1t = w1t.at[:inter, :oc].set(params['fc1_w'].reshape(inter, oc) * scale1[:, None])
    t1 = jnp.zeros((inter_pad, 1), f32)
    t1 = t1.at[:inter, 0].set((params['fc1_b'] - params['bn1_mean']) * scale1
                              + params['bn1_beta'])
    fc2w = params['fc2_w'].reshape(cout, inter)
    w2t = jnp.zeros((C_pad, inter_pad), f32)
    b2 = jnp.zeros((C_pad, 1), f32)
    for g in range(radix):
        w2t = w2t.at[g * oc_pad:g * oc_pad + oc, :inter].set(fc2w[g * oc:(g + 1) * oc, :])
        b2 = b2.at[g * oc_pad:g * oc_pad + oc, 0].set(params['fc2_b'][g * oc:(g + 1) * oc])

    # ---- fused pallas_call: grid (B,), everything else stays in VMEM -------------------
    tile = min(4096, _round_up(Nw, 128))
    kernel = functools.partial(
        _split_attn_kernel, taps=tuple(taps), cin=Cin, radix=radix, oc=oc,
        oc_pad=oc_pad, wp=Wp, wo=Wo, ho_n=Ho, nw=Nw, tile=tile)

    out = pl.pallas_call(
        kernel,
        out_shape=jax.ShapeDtypeStruct((B, oc, Ho, Wo), jnp.float32),
        grid_spec=pltpu.PrefetchScalarGridSpec(
            num_scalar_prefetch=0,
            grid=(B,),
            in_specs=[
                pl.BlockSpec((1, Cin, Nx), lambda b: (b, 0, 0)),         # padded image
                pl.BlockSpec((1, Nw), lambda b: (0, 0)),                 # GAP mask (1/HW)
                pl.BlockSpec((C_pad, KK * Cin), lambda b: (0, 0)),       # tap weights
                pl.BlockSpec((C_pad, 1), lambda b: (0, 0)),              # conv+BN0 shift
                pl.BlockSpec((inter_pad, oc_pad), lambda b: (0, 0)),     # fc1 (folded)
                pl.BlockSpec((inter_pad, 1), lambda b: (0, 0)),          # fc1+BN1 shift
                pl.BlockSpec((C_pad, inter_pad), lambda b: (0, 0)),      # fc2
                pl.BlockSpec((C_pad, 1), lambda b: (0, 0)),              # fc2 bias
            ],
            out_specs=pl.BlockSpec((1, oc, Ho, Wo), lambda b: (b, 0, 0, 0)),
            # per-batch resident conv activation (channel-major, radix chunks 128-padded)
            scratch_shapes=[pltpu.VMEM((C_pad, _round_up(Nw, 128)), jnp.bfloat16)],
        ),
        # demo shapes use ~2 MiB VMEM; for large stages also set vmem_limit_bytes here.
        compiler_params=pltpu.CompilerParams(dimension_semantics=("parallel",)),
    )(x_flat, mask, wt, t0, w1t, t1, w2t, b2)
    return out                                                  # already NCHW


# --------------------------------------------------------------------------------------
# Pure-JAX reference (same inference-mode BN semantics) for correctness check
# --------------------------------------------------------------------------------------
def reference_forward(x, params, *, kernel_size, stride, padding, dilation,
                      groups, radix, out_channels):
    eps = 1e-5
    G = groups * radix
    y = lax.conv_general_dilated(
        x, params['conv_w'], window_strides=(stride, stride),
        padding=[(padding, padding), (padding, padding)],
        rhs_dilation=(dilation, dilation), feature_group_count=G,
        dimension_numbers=('NCHW', 'OIHW', 'NCHW'))
    y = y + params['conv_b'][None, :, None, None]
    scale0 = params['bn0_gamma'] / jnp.sqrt(params['bn0_var'] + eps)
    shift0 = params['bn0_beta'] - params['bn0_mean'] * scale0
    y = jnp.maximum(y * scale0[None, :, None, None] + shift0[None, :, None, None], 0.0)

    B = x.shape[0]
    C = y.shape[1]
    if radix > 1:
        splited = [y[:, r * out_channels:(r + 1) * out_channels] for r in range(radix)]
        gap = sum(splited)
    else:
        splited = [y]
        gap = y
    gap = jnp.mean(gap, axis=(2, 3))                                   # (B, out_channels)

    inter = params['fc1_w'].shape[0]
    h = gap @ params['fc1_w'].reshape(inter, out_channels).T + params['fc1_b']
    scale1 = params['bn1_gamma'] / jnp.sqrt(params['bn1_var'] + eps)
    shift1 = params['bn1_beta'] - params['bn1_mean'] * scale1
    h = jnp.maximum(h * scale1 + shift1, 0.0)
    logits = h @ params['fc2_w'].reshape(C, inter).T + params['fc2_b']  # (B, C)

    if radix > 1:
        t = logits.reshape(B, groups, radix, -1)
        t = jnp.swapaxes(t, 1, 2)
        t = jax.nn.softmax(t, axis=1)
        atten = t.reshape(B, -1)
        attens = [atten[:, r * out_channels:(r + 1) * out_channels] for r in range(radix)]
        out = sum(a[:, :, None, None] * s for a, s in zip(attens, splited))
    else:
        atten = jax.nn.sigmoid(logits)
        out = atten[:, :, None, None] * y
    return out


# --------------------------------------------------------------------------------------
if __name__ == "__main__":
    key = jax.random.PRNGKey(0)

    # module config (nn.Module __init__ args)
    in_channels, out_channels = 4, 8
    kernel_size, stride, padding, dilation = 3, 1, 1, 1
    groups, radix, reduction_factor = 1, 2, 4
    inter = max(in_channels * radix // reduction_factor, 32)   # = 32
    G = groups * radix

    B, H, W = 2, 16, 16

    keys = jax.random.split(key, 16)

    def nrm(k, shape, s=0.1):
        return jax.random.normal(k, shape, jnp.float32) * s

    params = {
        'conv_w': nrm(keys[0], (out_channels * radix, in_channels // G,
                                kernel_size, kernel_size), 0.2),
        'conv_b': nrm(keys[1], (out_channels * radix,), 0.1),
        'bn0_gamma': 1.0 + nrm(keys[2], (out_channels * radix,), 0.1),
        'bn0_beta': nrm(keys[3], (out_channels * radix,), 0.1),
        'bn0_mean': nrm(keys[4], (out_channels * radix,), 0.1),
        'bn0_var': 0.5 + jax.random.uniform(keys[5], (out_channels * radix,), jnp.float32),
        'fc1_w': nrm(keys[6], (inter, out_channels, 1, 1), 0.2),
        'fc1_b': nrm(keys[7], (inter,), 0.1),
        'bn1_gamma': 1.0 + nrm(keys[8], (inter,), 0.1),
        'bn1_beta': nrm(keys[9], (inter,), 0.1),
        'bn1_mean': nrm(keys[10], (inter,), 0.1),
        'bn1_var': 0.5 + jax.random.uniform(keys[11], (inter,), jnp.float32),
        'fc2_w': nrm(keys[12], (out_channels * radix, inter, 1, 1), 0.2),
        'fc2_b': nrm(keys[13], (out_channels * radix,), 0.1),
    }
    x = jax.random.normal(keys[14], (B, in_channels, H, W), jnp.float32)

    cfg = dict(kernel_size=kernel_size, stride=stride, padding=padding, dilation=dilation,
               groups=groups, radix=radix, out_channels=out_channels)

    out = split_attention_forward(x, params, **cfg)
    out = jax.block_until_ready(out)

    ref = reference_forward(x, params, **cfg)
    # bf16 MXU inputs + bf16 activation storage -> compare with bf16-level tolerance
    np.testing.assert_allclose(np.asarray(out), np.asarray(ref), rtol=2e-2, atol=2e-2)

    print("KERNEL_OK")
</pallas_src>

<mosaic_0001>
module attributes {stable_mosaic.version = 11 : i64} {
  func.func @_split_attn_kernel(%arg0: i32, %arg1: memref<1x4x384xbf16, #tpu.memory_space<vmem>>, %arg2: memref<1x288xf32, #tpu.memory_space<vmem>>, %arg3: memref<256x36xbf16, #tpu.memory_space<vmem>>, %arg4: memref<256x1xf32, #tpu.memory_space<vmem>>, %arg5: memref<128x128xf32, #tpu.memory_space<vmem>>, %arg6: memref<128x1xf32, #tpu.memory_space<vmem>>, %arg7: memref<256x128xf32, #tpu.memory_space<vmem>>, %arg8: memref<256x1xf32, #tpu.memory_space<vmem>>, %arg9: memref<1x8x16x16xf32, #tpu.memory_space<vmem>>, %arg10: memref<256x384xbf16, #tpu.memory_space<vmem>>) attributes {dimension_semantics = [#tpu.dimension_semantics<parallel>], iteration_bounds = array<i64: 2>, scalar_prefetch = 0 : i64, scratch_operands = 1 : i64, tpu.core_type = #tpu.core_type<tc>, window_params = [{transform_indices = @transform_0, window_bounds = array<i64: 1, 4, 384>}, {pipeline_mode = #tpu.pipeline_mode<synchronous>, transform_indices = @transform_1, window_bounds = array<i64: 1, 288>}, {pipeline_mode = #tpu.pipeline_mode<synchronous>, transform_indices = @transform_2, window_bounds = array<i64: 256, 36>}, {pipeline_mode = #tpu.pipeline_mode<synchronous>, transform_indices = @transform_3, window_bounds = array<i64: 256, 1>}, {pipeline_mode = #tpu.pipeline_mode<synchronous>, transform_indices = @transform_4, window_bounds = array<i64: 128, 128>}, {pipeline_mode = #tpu.pipeline_mode<synchronous>, transform_indices = @transform_5, window_bounds = array<i64: 128, 1>}, {pipeline_mode = #tpu.pipeline_mode<synchronous>, transform_indices = @transform_6, window_bounds = array<i64: 256, 128>}, {pipeline_mode = #tpu.pipeline_mode<synchronous>, transform_indices = @transform_7, window_bounds = array<i64: 256, 1>}, {transform_indices = @transform_8, window_bounds = array<i64: 1, 8, 16, 16>}]} {
    %c0 = arith.constant 0 : index
    %c0_0 = arith.constant 0 : index
    %0 = vector.load %arg4[%c0, %c0_0] : memref<256x1xf32, #tpu.memory_space<vmem>>, vector<256x1xf32>
    %cst = arith.constant 0.000000e+00 : f32
    %1 = vector.broadcast %cst : f32 to vector<256x1xf32>
    %cst_1 = arith.constant 0.000000e+00 : f32
    %2 = vector.broadcast %cst_1 : f32 to vector<256x288xf32>
    %c0_2 = arith.constant 0 : index
    %c0_3 = arith.constant 0 : index
    %c0_4 = arith.constant 0 : index
    %3 = vector.load %arg1[%c0_2, %c0_3, %c0_4] : memref<1x4x384xbf16, #tpu.memory_space<vmem>>, vector<1x4x288xbf16>
    %4 = vector.shape_cast %3 : vector<1x4x288xbf16> to vector<4x288xbf16>
    %c0_5 = arith.constant 0 : index
    %c0_6 = arith.constant 0 : index
    %5 = vector.load %arg3[%c0_5, %c0_6] : memref<256x36xbf16, #tpu.memory_space<vmem>>, vector<256x4xbf16>
    %cst_7 = arith.constant dense<0.000000e+00> : vector<256x288xf32>
    %6 = tpu.matmul %5, %4, %cst_7 {dimension_numbers = #tpu.dot_dimension_numbers<[1], [0], [0], [1], [0, 0, 1, 1], [], []>} : vector<256x4xbf16>, vector<4x288xbf16>, vector<256x288xf32> -> vector<256x288xf32>
    %7 = arith.addf %2, %6 : vector<256x288xf32>
    %c0_8 = arith.constant 0 : index
    %c0_9 = arith.constant 0 : index
    %c1 = arith.constant 1 : index
    %8 = vector.load %arg1[%c0_8, %c0_9, %c1] : memref<1x4x384xbf16, #tpu.memory_space<vmem>>, vector<1x4x288xbf16>
    %9 = vector.shape_cast %8 : vector<1x4x288xbf16> to vector<4x288xbf16>
    %c0_10 = arith.constant 0 : index
    %c4 = arith.constant 4 : index
    %10 = vector.load %arg3[%c0_10, %c4] : memref<256x36xbf16, #tpu.memory_space<vmem>>, vector<256x4xbf16>
    %cst_11 = arith.constant dense<0.000000e+00> : vector<256x288xf32>
    %11 = tpu.matmul %10, %9, %cst_11 {dimension_numbers = #tpu.dot_dimension_numbers<[1], [0], [0], [1], [0, 0, 1, 1], [], []>} : vector<256x4xbf16>, vector<4x288xbf16>, vector<256x288xf32> -> vector<256x288xf32>
    %12 = arith.addf %7, %11 : vector<256x288xf32>
    %c0_12 = arith.constant 0 : index
    %c0_13 = arith.constant 0 : index
    %c2 = arith.constant 2 : index
    %13 = vector.load %arg1[%c0_12, %c0_13, %c2] : memref<1x4x384xbf16, #tpu.memory_space<vmem>>, vector<1x4x288xbf16>
    %14 = vector.shape_cast %13 : vector<1x4x288xbf16> to vector<4x288xbf16>
    %c0_14 = arith.constant 0 : index
    %c8 = arith.constant 8 : index
    %15 = vector.load %arg3[%c0_14, %c8] : memref<256x36xbf16, #tpu.memory_space<vmem>>, vector<256x4xbf16>
    %cst_15 = arith.constant dense<0.000000e+00> : vector<256x288xf32>
    %16 = tpu.matmul %15, %14, %cst_15 {dimension_numbers = #tpu.dot_dimension_numbers<[1], [0], [0], [1], [0, 0, 1, 1], [], []>} : vector<256x4xbf16>, vector<4x288xbf16>, vector<256x288xf32> -> vector<256x288xf32>
    %17 = arith.addf %12, %16 : vector<256x288xf32>
    %c0_16 = arith.constant 0 : index
    %c0_17 = arith.constant 0 : index
    %c18 = arith.constant 18 : index
    %18 = vector.load %arg1[%c0_16, %c0_17, %c18] : memref<1x4x384xbf16, #tpu.memory_space<vmem>>, vector<1x4x288xbf16>
    %19 = vector.shape_cast %18 : vector<1x4x288xbf16> to vector<4x288xbf16>
    %c0_18 = arith.constant 0 : index
    %c12 = arith.constant 12 : index
    %20 = vector.load %arg3[%c0_18, %c12] : memref<256x36xbf16, #tpu.memory_space<vmem>>, vector<256x4xbf16>
    %cst_19 = arith.constant dense<0.000000e+00> : vector<256x288xf32>
    %21 = tpu.matmul %20, %19, %cst_19 {dimension_numbers = #tpu.dot_dimension_numbers<[1], [0], [0], [1], [0, 0, 1, 1], [], []>} : vector<256x4xbf16>, vector<4x288xbf16>, vector<256x288xf32> -> vector<256x288xf32>
    %22 = arith.addf %17, %21 : vector<256x288xf32>
    %c0_20 = arith.constant 0 : index
    %c0_21 = arith.constant 0 : index
    %c19 = arith.constant 19 : index
    %23 = vector.load %arg1[%c0_20, %c0_21, %c19] : memref<1x4x384xbf16, #tpu.memory_space<vmem>>, vector<1x4x288xbf16>
    %24 = vector.shape_cast %23 : vector<1x4x288xbf16> to vector<4x288xbf16>
    %c0_22 = arith.constant 0 : index
    %c16 = arith.constant 16 : index
    %25 = vector.load %arg3[%c0_22, %c16] : memref<256x36xbf16, #tpu.memory_space<vmem>>, vector<256x4xbf16>
    %cst_23 = arith.constant dense<0.000000e+00> : vector<256x288xf32>
    %26 = tpu.matmul %25, %24, %cst_23 {dimension_numbers = #tpu.dot_dimension_numbers<[1], [0], [0], [1], [0, 0, 1, 1], [], []>} : vector<256x4xbf16>, vector<4x288xbf16>, vector<256x288xf32> -> vector<256x288xf32>
    %27 = arith.addf %22, %26 : vector<256x288xf32>
    %c0_24 = arith.constant 0 : index
    %c0_25 = arith.constant 0 : index
    %c20 = arith.constant 20 : index
    %28 = vector.load %arg1[%c0_24, %c0_25, %c20] : memref<1x4x384xbf16, #tpu.memory_space<vmem>>, vector<1x4x288xbf16>
    %29 = vector.shape_cast %28 : vector<1x4x288xbf16> to vector<4x288xbf16>
    %c0_26 = arith.constant 0 : index
    %c20_27 = arith.constant 20 : index
    %30 = vector.load %arg3[%c0_26, %c20_27] : memref<256x36xbf16, #tpu.memory_space<vmem>>, vector<256x4xbf16>
    %cst_28 = arith.constant dense<0.000000e+00> : vector<256x288xf32>
    %31 = tpu.matmul %30, %29, %cst_28 {dimension_numbers = #tpu.dot_dimension_numbers<[1], [0], [0], [1], [0, 0, 1, 1], [], []>} : vector<256x4xbf16>, vector<4x288xbf16>, vector<256x288xf32> -> vector<256x288xf32>
    %32 = arith.addf %27, %31 : vector<256x288xf32>
    %c0_29 = arith.constant 0 : index
    %c0_30 = arith.constant 0 : index
    %c36 = arith.constant 36 : index
    %33 = vector.load %arg1[%c0_29, %c0_30, %c36] : memref<1x4x384xbf16, #tpu.memory_space<vmem>>, vector<1x4x288xbf16>
    %34 = vector.shape_cast %33 : vector<1x4x288xbf16> to vector<4x288xbf16>
    %c0_31 = arith.constant 0 : index
    %c24 = arith.constant 24 : index
    %35 = vector.load %arg3[%c0_31, %c24] : memref<256x36xbf16, #tpu.memory_space<vmem>>, vector<256x4xbf16>
    %cst_32 = arith.constant dense<0.000000e+00> : vector<256x288xf32>
    %36 = tpu.matmul %35, %34, %cst_32 {dimension_numbers = #tpu.dot_dimension_numbers<[1], [0], [0], [1], [0, 0, 1, 1], [], []>} : vector<256x4xbf16>, vector<4x288xbf16>, vector<256x288xf32> -> vector<256x288xf32>
    %37 = arith.addf %32, %36 : vector<256x288xf32>
    %c0_33 = arith.constant 0 : index
    %c0_34 = arith.constant 0 : index
    %c37 = arith.constant 37 : index
    %38 = vector.load %arg1[%c0_33, %c0_34, %c37] : memref<1x4x384xbf16, #tpu.memory_space<vmem>>, vector<1x4x288xbf16>
    %39 = vector.shape_cast %38 : vector<1x4x288xbf16> to vector<4x288xbf16>
    %c0_35 = arith.constant 0 : index
    %c28 = arith.constant 28 : index
    %40 = vector.load %arg3[%c0_35, %c28] : memref<256x36xbf16, #tpu.memory_space<vmem>>, vector<256x4xbf16>
    %cst_36 = arith.constant dense<0.000000e+00> : vector<256x288xf32>
    %41 = tpu.matmul %40, %39, %cst_36 {dimension_numbers = #tpu.dot_dimension_numbers<[1], [0], [0], [1], [0, 0, 1, 1], [], []>} : vector<256x4xbf16>, vector<4x288xbf16>, vector<256x288xf32> -> vector<256x288xf32>
    %42 = arith.addf %37, %41 : vector<256x288xf32>
    %c0_37 = arith.constant 0 : index
    %c0_38 = arith.constant 0 : index
    %c38 = arith.constant 38 : index
    %43 = vector.load %arg1[%c0_37, %c0_38, %c38] : memref<1x4x384xbf16, #tpu.memory_space<vmem>>, vector<1x4x288xbf16>
    %44 = vector.shape_cast %43 : vector<1x4x288xbf16> to vector<4x288xbf16>
    %c0_39 = arith.constant 0 : index
    %c32 = arith.constant 32 : index
    %45 = vector.load %arg3[%c0_39, %c32] : memref<256x36xbf16, #tpu.memory_space<vmem>>, vector<256x4xbf16>
    %cst_40 = arith.constant dense<0.000000e+00> : vector<256x288xf32>
    %46 = tpu.matmul %45, %44, %cst_40 {dimension_numbers = #tpu.dot_dimension_numbers<[1], [0], [0], [1], [0, 0, 1, 1], [], []>} : vector<256x4xbf16>, vector<4x288xbf16>, vector<256x288xf32> -> vector<256x288xf32>
    %47 = arith.addf %42, %46 : vector<256x288xf32>
    %48 = vector.broadcast %0 : vector<256x1xf32> to vector<256x288xf32>
    %49 = arith.addf %47, %48 : vector<256x288xf32>
    %cst_41 = arith.constant 0.000000e+00 : f32
    %50 = vector.broadcast %cst_41 : f32 to vector<256x288xf32>
    %51 = arith.maximumf %49, %50 : vector<256x288xf32>
    %52 = arith.truncf %51 : vector<256x288xf32> to vector<256x288xbf16>
    %c0_42 = arith.constant 0 : index
    %c0_43 = arith.constant 0 : index
    %53 = vector.load %arg10[%c0_42, %c0_43] : memref<256x384xbf16, #tpu.memory_space<vmem>>, vector<256x288xbf16>
    tpu.vector_store %arg10[%c0_42, %c0_43], %52 {strides = array<i32>} : memref<256x384xbf16, #tpu.memory_space<vmem>>, vector<256x288xbf16>,
    %c0_44 = arith.constant 0 : index
    %c0_45 = arith.constant 0 : index
    %54 = vector.load %arg2[%c0_44, %c0_45] : memref<1x288xf32, #tpu.memory_space<vmem>>, vector<1x288xf32>
    %55 = vector.broadcast %54 : vector<1x288xf32> to vector<256x288xf32>
    %56 = arith.mulf %51, %55 : vector<256x288xf32>
    %cst_46 = arith.constant dense<0.000000e+00> : vector<256xf32>
    %57 = vector.multi_reduction <add>, %56, %cst_46 [1] : vector<256x288xf32> to vector<256xf32>
    %58 = vector.shape_cast %57 : vector<256xf32> to vector<256x1xf32>
    %59 = arith.addf %1, %58 : vector<256x1xf32>
    %60 = vector.extract_strided_slice %59 {offsets = [0, 0], sizes = [128, 1], strides = [1, 1]} : vector<256x1xf32> to vector<128x1xf32>
    %61 = vector.extract_strided_slice %59 {offsets = [128, 0], sizes = [128, 1], strides = [1, 1]} : vector<256x1xf32> to vector<128x1xf32>
    %62 = arith.addf %60, %61 : vector<128x1xf32>
    %c0_47 = arith.constant 0 : index
    %c0_48 = arith.constant 0 : index
    %63 = vector.load %arg5[%c0_47, %c0_48] : memref<128x128xf32, #tpu.memory_space<vmem>>, vector<128x128xf32>
    %cst_49 = arith.constant dense<0.000000e+00> : vector<128x1xf32>
    %64 = tpu.matmul %63, %62, %cst_49 {dimension_numbers = #tpu.dot_dimension_numbers<[1], [0], [0], [1], [0, 0, 1, 1], [], []>} : vector<128x128xf32>, vector<128x1xf32>, vector<128x1xf32> -> vector<128x1xf32>
    %c0_50 = arith.constant 0 : index
    %c0_51 = arith.constant 0 : index
    %65 = vector.load %arg6[%c0_50, %c0_51] : memref<128x1xf32, #tpu.memory_space<vmem>>, vector<128x1xf32>
    %66 = arith.addf %64, %65 : vector<128x1xf32>
    %cst_52 = arith.constant 0.000000e+00 : f32
    %67 = vector.broadcast %cst_52 : f32 to vector<128x1xf32>
    %68 = arith.maximumf %66, %67 : vector<128x1xf32>
    %c0_53 = arith.constant 0 : index
    %c0_54 = arith.constant 0 : index
    %69 = vector.load %arg7[%c0_53, %c0_54] : memref<256x128xf32, #tpu.memory_space<vmem>>, vector<256x128xf32>
    %cst_55 = arith.constant dense<0.000000e+00> : vector<256x1xf32>
    %70 = tpu.matmul %69, %68, %cst_55 {dimension_numbers = #tpu.dot_dimension_numbers<[1], [0], [0], [1], [0, 0, 1, 1], [], []>} : vector<256x128xf32>, vector<128x1xf32>, vector<256x1xf32> -> vector<256x1xf32>
    %c0_56 = arith.constant 0 : index
    %c0_57 = arith.constant 0 : index
    %71 = vector.load %arg8[%c0_56, %c0_57] : memref<256x1xf32, #tpu.memory_space<vmem>>, vector<256x1xf32>
    %72 = arith.addf %70, %71 : vector<256x1xf32>
    %73 = vector.extract_strided_slice %72 {offsets = [0, 0], sizes = [128, 1], strides = [1, 1]} : vector<256x1xf32> to vector<128x1xf32>
    %74 = vector.extract_strided_slice %72 {offsets = [128, 0], sizes = [128, 1], strides = [1, 1]} : vector<256x1xf32> to vector<128x1xf32>
    %75 = arith.maximumf %73, %74 : vector<128x1xf32>
    %76 = vector.extract_strided_slice %72 {offsets = [0, 0], sizes = [128, 1], strides = [1, 1]} : vector<256x1xf32> to vector<128x1xf32>
    %77 = arith.subf %76, %75 : vector<128x1xf32>
    %78 = math.exp %77 : vector<128x1xf32>
    %79 = vector.extract_strided_slice %72 {offsets = [128, 0], sizes = [128, 1], strides = [1, 1]} : vector<256x1xf32> to vector<128x1xf32>
    %80 = arith.subf %79, %75 : vector<128x1xf32>
    %81 = math.exp %80 : vector<128x1xf32>
    %82 = arith.addf %78, %81 : vector<128x1xf32>
    %83 = arith.divf %78, %82 : vector<128x1xf32>
    %84 = arith.divf %81, %82 : vector<128x1xf32>
    %c0_58 = arith.constant 0 : index
    %c0_59 = arith.constant 0 : index
    %85 = vector.load %arg10[%c0_58, %c0_59] : memref<256x384xbf16, #tpu.memory_space<vmem>>, vector<128x16xbf16>
    %86 = arith.extf %85 : vector<128x16xbf16> to vector<128x16xf32>
    %87 = vector.broadcast %83 : vector<128x1xf32> to vector<128x16xf32>
    %88 = arith.mulf %87, %86 : vector<128x16xf32>
    %c128 = arith.constant 128 : index
    %c0_60 = arith.constant 0 : index
    %89 = vector.load %arg10[%c128, %c0_60] : memref<256x384xbf16, #tpu.memory_space<vmem>>, vector<128x16xbf16>
    %90 = arith.extf %89 : vector<128x16xbf16> to vector<128x16xf32>
    %91 = vector.broadcast %84 : vector<128x1xf32> to vector<128x16xf32>
    %92 = arith.mulf %91, %90 : vector<128x16xf32>
    %93 = arith.addf %88, %92 : vector<128x16xf32>
    %94 = vector.extract_strided_slice %93 {offsets = [0, 0], sizes = [8, 16], strides = [1, 1]} : vector<128x16xf32> to vector<8x16xf32>
    %c0_61 = arith.constant 0 : index
    %c0_62 = arith.constant 0 : index
    %c0_63 = arith.constant 0 : index
    %c0_64 = arith.constant 0 : index
    %95 = vector.load %arg9[%c0_61, %c0_62, %c0_63, %c0_64] : memref<1x8x16x16xf32, #tpu.memory_space<vmem>>, vector<1x8x1x16xf32>
    %96 = vector.shape_cast %95 : vector<1x8x1x16xf32> to vector<8x16xf32>
    %97 = vector.shape_cast %94 : vector<8x16xf32> to vector<1x8x1x16xf32>
    tpu.vector_store %arg9[%c0_61, %c0_62, %c0_63, %c0_64], %97 {strides = array<i32>} : memref<1x8x16x16xf32, #tpu.memory_space<vmem>>, vector<1x8x1x16xf32>,
    %c0_65 = arith.constant 0 : index
    %c18_66 = arith.constant 18 : index
    %98 = vector.load %arg10[%c0_65, %c18_66] : memref<256x384xbf16, #tpu.memory_space<vmem>>, vector<128x16xbf16>
    %99 = arith.extf %98 : vector<128x16xbf16> to vector<128x16xf32>
    %100 = vector.broadcast %83 : vector<128x1xf32> to vector<128x16xf32>
    %101 = arith.mulf %100, %99 : vector<128x16xf32>
    %c128_67 = arith.constant 128 : index
    %c18_68 = arith.constant 18 : index
    %102 = vector.load %arg10[%c128_67, %c18_68] : memref<256x384xbf16, #tpu.memory_space<vmem>>, vector<128x16xbf16>
    %103 = arith.extf %102 : vector<128x16xbf16> to vector<128x16xf32>
    %104 = vector.broadcast %84 : vector<128x1xf32> to vector<128x16xf32>
    %105 = arith.mulf %104, %103 : vector<128x16xf32>
    %106 = arith.addf %101, %105 : vector<128x16xf32>
    %107 = vector.extract_strided_slice %106 {offsets = [0, 0], sizes = [8, 16], strides = [1, 1]} : vector<128x16xf32> to vector<8x16xf32>
    %c0_69 = arith.constant 0 : index
    %c0_70 = arith.constant 0 : index
    %c1_71 = arith.constant 1 : index
    %c0_72 = arith.constant 0 : index
    %108 = vector.load %arg9[%c0_69, %c0_70, %c1_71, %c0_72] : memref<1x8x16x16xf32, #tpu.memory_space<vmem>>, vector<1x8x1x16xf32>
    %109 = vector.shape_cast %108 : vector<1x8x1x16xf32> to vector<8x16xf32>
    %110 = vector.shape_cast %107 : vector<8x16xf32> to vector<1x8x1x16xf32>
    tpu.vector_store %arg9[%c0_69, %c0_70, %c1_71, %c0_72], %110 {strides = array<i32>} : memref<1x8x16x16xf32, #tpu.memory_space<vmem>>, vector<1x8x1x16xf32>,
    %c0_73 = arith.constant 0 : index
    %c36_74 = arith.constant 36 : index
    %111 = vector.load %arg10[%c0_73, %c36_74] : memref<256x384xbf16, #tpu.memory_space<vmem>>, vector<128x16xbf16>
    %112 = arith.extf %111 : vector<128x16xbf16> to vector<128x16xf32>
    %113 = vector.broadcast %83 : vector<128x1xf32> to vector<128x16xf32>
    %114 = arith.mulf %113, %112 : vector<128x16xf32>
    %c128_75 = arith.constant 128 : index
    %c36_76 = arith.constant 36 : index
    %115 = vector.load %arg10[%c128_75, %c36_76] : memref<256x384xbf16, #tpu.memory_space<vmem>>, vector<128x16xbf16>
    %116 = arith.extf %115 : vector<128x16xbf16> to vector<128x16xf32>
    %117 = vector.broadcast %84 : vector<128x1xf32> to vector<128x16xf32>
    %118 = arith.mulf %117, %116 : vector<128x16xf32>
    %119 = arith.addf %114, %118 : vector<128x16xf32>
    %120 = vector.extract_strided_slice %119 {offsets = [0, 0], sizes = [8, 16], strides = [1, 1]} : vector<128x16xf32> to vector<8x16xf32>
    %c0_77 = arith.constant 0 : index
    %c0_78 = arith.constant 0 : index
    %c2_79 = arith.constant 2 : index
    %c0_80 = arith.constant 0 : index
    %121 = vector.load %arg9[%c0_77, %c0_78, %c2_79, %c0_80] : memref<1x8x16x16xf32, #tpu.memory_space<vmem>>, vector<1x8x1x16xf32>
    %122 = vector.shape_cast %121 : vector<1x8x1x16xf32> to vector<8x16xf32>
    %123 = vector.shape_cast %120 : vector<8x16xf32> to vector<1x8x1x16xf32>
    tpu.vector_store %arg9[%c0_77, %c0_78, %c2_79, %c0_80], %123 {strides = array<i32>} : memref<1x8x16x16xf32, #tpu.memory_space<vmem>>, vector<1x8x1x16xf32>,
    %c0_81 = arith.constant 0 : index
    %c54 = arith.constant 54 : index
    %124 = vector.load %arg10[%c0_81, %c54] : memref<256x384xbf16, #tpu.memory_space<vmem>>, vector<128x16xbf16>
    %125 = arith.extf %124 : vector<128x16xbf16> to vector<128x16xf32>
    %126 = vector.broadcast %83 : vector<128x1xf32> to vector<128x16xf32>
    %127 = arith.mulf %126, %125 : vector<128x16xf32>
    %c128_82 = arith.constant 128 : index
    %c54_83 = arith.constant 54 : index
    %128 = vector.load %arg10[%c128_82, %c54_83] : memref<256x384xbf16, #tpu.memory_space<vmem>>, vector<128x16xbf16>
    %129 = arith.extf %128 : vector<128x16xbf16> to vector<128x16xf32>
    %130 = vector.broadcast %84 : vector<128x1xf32> to vector<128x16xf32>
    %131 = arith.mulf %130, %129 : vector<128x16xf32>
    %132 = arith.addf %127, %131 : vector<128x16xf32>
    %133 = vector.extract_strided_slice %132 {offsets = [0, 0], sizes = [8, 16], strides = [1, 1]} : vector<128x16xf32> to vector<8x16xf32>
    %c0_84 = arith.constant 0 : index
    %c0_85 = arith.constant 0 : index
    %c3 = arith.constant 3 : index
    %c0_86 = arith.constant 0 : index
    %134 = vector.load %arg9[%c0_84, %c0_85, %c3, %c0_86] : memref<1x8x16x16xf32, #tpu.memory_space<vmem>>, vector<1x8x1x16xf32>
    %135 = vector.shape_cast %134 : vector<1x8x1x16xf32> to vector<8x16xf32>
    %136 = vector.shape_cast %133 : vector<8x16xf32> to vector<1x8x1x16xf32>
    tpu.vector_store %arg9[%c0_84, %c0_85, %c3, %c0_86], %136 {strides = array<i32>} : memref<1x8x16x16xf32, #tpu.memory_space<vmem>>, vector<1x8x1x16xf32>,
    %c0_87 = arith.constant 0 : index
    %c72 = arith.constant 72 : index
    %137 = vector.load %arg10[%c0_87, %c72] : memref<256x384xbf16, #tpu.memory_space<vmem>>, vector<128x16xbf16>
    %138 = arith.extf %137 : vector<128x16xbf16> to vector<128x16xf32>
    %139 = vector.broadcast %83 : vector<128x1xf32> to vector<128x16xf32>
    %140 = arith.mulf %139, %138 : vector<128x16xf32>
    %c128_88 = arith.constant 128 : index
    %c72_89 = arith.constant 72 : index
    %141 = vector.load %arg10[%c128_88, %c72_89] : memref<256x384xbf16, #tpu.memory_space<vmem>>, vector<128x16xbf16>
    %142 = arith.extf %141 : vector<128x16xbf16> to vector<128x16xf32>
    %143 = vector.broadcast %84 : vector<128x1xf32> to vector<128x16xf32>
    %144 = arith.mulf %143, %142 : vector<128x16xf32>
    %145 = arith.addf %140, %144 : vector<128x16xf32>
    %146 = vector.extract_strided_slice %145 {offsets = [0, 0], sizes = [8, 16], strides = [1, 1]} : vector<128x16xf32> to vector<8x16xf32>
    %c0_90 = arith.constant 0 : index
    %c0_91 = arith.constant 0 : index
    %c4_92 = arith.constant 4 : index
    %c0_93 = arith.constant 0 : index
    %147 = vector.load %arg9[%c0_90, %c0_91, %c4_92, %c0_93] : memref<1x8x16x16xf32, #tpu.memory_space<vmem>>, vector<1x8x1x16xf32>
    %148 = vector.shape_cast %147 : vector<1x8x1x16xf32> to vector<8x16xf32>
    %149 = vector.shape_cast %146 : vector<8x16xf32> to vector<1x8x1x16xf32>
    tpu.vector_store %arg9[%c0_90, %c0_91, %c4_92, %c0_93], %149 {strides = array<i32>} : memref<1x8x16x16xf32, #tpu.memory_space<vmem>>, vector<1x8x1x16xf32>,
    %c0_94 = arith.constant 0 : index
    %c90 = arith.constant 90 : index
    %150 = vector.load %arg10[%c0_94, %c90] : memref<256x384xbf16, #tpu.memory_space<vmem>>, vector<128x16xbf16>
    %151 = arith.extf %150 : vector<128x16xbf16> to vector<128x16xf32>
    %152 = vector.broadcast %83 : vector<128x1xf32> to vector<128x16xf32>
    %153 = arith.mulf %152, %151 : vector<128x16xf32>
    %c128_95 = arith.constant 128 : index
    %c90_96 = arith.constant 90 : index
    %154 = vector.load %arg10[%c128_95, %c90_96] : memref<256x384xbf16, #tpu.memory_space<vmem>>, vector<128x16xbf16>
    %155 = arith.extf %154 : vector<128x16xbf16> to vector<128x16xf32>
    %156 = vector.broadcast %84 : vector<128x1xf32> to vector<128x16xf32>
    %157 = arith.mulf %156, %155 : vector<128x16xf32>
    %158 = arith.addf %153, %157 : vector<128x16xf32>
    %159 = vector.extract_strided_slice %158 {offsets = [0, 0], sizes = [8, 16], strides = [1, 1]} : vector<128x16xf32> to vector<8x16xf32>
    %c0_97 = arith.constant 0 : index
    %c0_98 = arith.constant 0 : index
    %c5 = arith.constant 5 : index
    %c0_99 = arith.constant 0 : index
    %160 = vector.load %arg9[%c0_97, %c0_98, %c5, %c0_99] : memref<1x8x16x16xf32, #tpu.memory_space<vmem>>, vector<1x8x1x16xf32>
    %161 = vector.shape_cast %160 : vector<1x8x1x16xf32> to vector<8x16xf32>
    %162 = vector.shape_cast %159 : vector<8x16xf32> to vector<1x8x1x16xf32>
    tpu.vector_store %arg9[%c0_97, %c0_98, %c5, %c0_99], %162 {strides = array<i32>} : memref<1x8x16x16xf32, #tpu.memory_space<vmem>>, vector<1x8x1x16xf32>,
    %c0_100 = arith.constant 0 : index
    %c108 = arith.constant 108 : index
    %163 = vector.load %arg10[%c0_100, %c108] : memref<256x384xbf16, #tpu.memory_space<vmem>>, vector<128x16xbf16>
    %164 = arith.extf %163 : vector<128x16xbf16> to vector<128x16xf32>
    %165 = vector.broadcast %83 : vector<128x1xf32> to vector<128x16xf32>
    %166 = arith.mulf %165, %164 : vector<128x16xf32>
    %c128_101 = arith.constant 128 : index
    %c108_102 = arith.constant 108 : index
    %167 = vector.load %arg10[%c128_101, %c108_102] : memref<256x384xbf16, #tpu.memory_space<vmem>>, vector<128x16xbf16>
    %168 = arith.extf %167 : vector<128x16xbf16> to vector<128x16xf32>
    %169 = vector.broadcast %84 : vector<128x1xf32> to vector<128x16xf32>
    %170 = arith.mulf %169, %168 : vector<128x16xf32>
    %171 = arith.addf %166, %170 : vector<128x16xf32>
    %172 = vector.extract_strided_slice %171 {offsets = [0, 0], sizes = [8, 16], strides = [1, 1]} : vector<128x16xf32> to vector<8x16xf32>
    %c0_103 = arith.constant 0 : index
    %c0_104 = arith.constant 0 : index
    %c6 = arith.constant 6 : index
    %c0_105 = arith.constant 0 : index
    %173 = vector.load %arg9[%c0_103, %c0_104, %c6, %c0_105] : memref<1x8x16x16xf32, #tpu.memory_space<vmem>>, vector<1x8x1x16xf32>
    %174 = vector.shape_cast %173 : vector<1x8x1x16xf32> to vector<8x16xf32>
    %175 = vector.shape_cast %172 : vector<8x16xf32> to vector<1x8x1x16xf32>
    tpu.vector_store %arg9[%c0_103, %c0_104, %c6, %c0_105], %175 {strides = array<i32>} : memref<1x8x16x16xf32, #tpu.memory_space<vmem>>, vector<1x8x1x16xf32>,
    %c0_106 = arith.constant 0 : index
    %c126 = arith.constant 126 : index
    %176 = vector.load %arg10[%c0_106, %c126] : memref<256x384xbf16, #tpu.memory_space<vmem>>, vector<128x16xbf16>
    %177 = arith.extf %176 : vector<128x16xbf16> to vector<128x16xf32>
    %178 = vector.broadcast %83 : vector<128x1xf32> to vector<128x16xf32>
    %179 = arith.mulf %178, %177 : vector<128x16xf32>
    %c128_107 = arith.constant 128 : index
    %c126_108 = arith.constant 126 : index
    %180 = vector.load %arg10[%c128_107, %c126_108] : memref<256x384xbf16, #tpu.memory_space<vmem>>, vector<128x16xbf16>
    %181 = arith.extf %180 : vector<128x16xbf16> to vector<128x16xf32>
    %182 = vector.broadcast %84 : vector<128x1xf32> to vector<128x16xf32>
    %183 = arith.mulf %182, %181 : vector<128x16xf32>
    %184 = arith.addf %179, %183 : vector<128x16xf32>
    %185 = vector.extract_strided_slice %184 {offsets = [0, 0], sizes = [8, 16], strides = [1, 1]} : vector<128x16xf32> to vector<8x16xf32>
    %c0_109 = arith.constant 0 : index
    %c0_110 = arith.constant 0 : index
    %c7 = arith.constant 7 : index
    %c0_111 = arith.constant 0 : index
    %186 = vector.load %arg9[%c0_109, %c0_110, %c7, %c0_111] : memref<1x8x16x16xf32, #tpu.memory_space<vmem>>, vector<1x8x1x16xf32>
    %187 = vector.shape_cast %186 : vector<1x8x1x16xf32> to vector<8x16xf32>
    %188 = vector.shape_cast %185 : vector<8x16xf32> to vector<1x8x1x16xf32>
    tpu.vector_store %arg9[%c0_109, %c0_110, %c7, %c0_111], %188 {strides = array<i32>} : memref<1x8x16x16xf32, #tpu.memory_space<vmem>>, vector<1x8x1x16xf32>,
    %c0_112 = arith.constant 0 : index
    %c144 = arith.constant 144 : index
    %189 = vector.load %arg10[%c0_112, %c144] : memref<256x384xbf16, #tpu.memory_space<vmem>>, vector<128x16xbf16>
    %190 = arith.extf %189 : vector<128x16xbf16> to vector<128x16xf32>
    %191 = vector.broadcast %83 : vector<128x1xf32> to vector<128x16xf32>
    %192 = arith.mulf %191, %190 : vector<128x16xf32>
    %c128_113 = arith.constant 128 : index
    %c144_114 = arith.constant 144 : index
    %193 = vector.load %arg10[%c128_113, %c144_114] : memref<256x384xbf16, #tpu.memory_space<vmem>>, vector<128x16xbf16>
    %194 = arith.extf %193 : vector<128x16xbf16> to vector<128x16xf32>
    %195 = vector.broadcast %84 : vector<128x1xf32> to vector<128x16xf32>
    %196 = arith.mulf %195, %194 : vector<128x16xf32>
    %197 = arith.addf %192, %196 : vector<128x16xf32>
    %198 = vector.extract_strided_slice %197 {offsets = [0, 0], sizes = [8, 16], strides = [1, 1]} : vector<128x16xf32> to vector<8x16xf32>
    %c0_115 = arith.constant 0 : index
    %c0_116 = arith.constant 0 : index
    %c8_117 = arith.constant 8 : index
    %c0_118 = arith.constant 0 : index
    %199 = vector.load %arg9[%c0_115, %c0_116, %c8_117, %c0_118] : memref<1x8x16x16xf32, #tpu.memory_space<vmem>>, vector<1x8x1x16xf32>
    %200 = vector.shape_cast %199 : vector<1x8x1x16xf32> to vector<8x16xf32>
    %201 = vector.shape_cast %198 : vector<8x16xf32> to vector<1x8x1x16xf32>
    tpu.vector_store %arg9[%c0_115, %c0_116, %c8_117, %c0_118], %201 {strides = array<i32>} : memref<1x8x16x16xf32, #tpu.memory_space<vmem>>, vector<1x8x1x16xf32>,
    %c0_119 = arith.constant 0 : index
    %c162 = arith.constant 162 : index
    %202 = vector.load %arg10[%c0_119, %c162] : memref<256x384xbf16, #tpu.memory_space<vmem>>, vector<128x16xbf16>
    %203 = arith.extf %202 : vector<128x16xbf16> to vector<128x16xf32>
    %204 = vector.broadcast %83 : vector<128x1xf32> to vector<128x16xf32>
    %205 = arith.mulf %204, %203 : vector<128x16xf32>
    %c128_120 = arith.constant 128 : index
    %c162_121 = arith.constant 162 : index
    %206 = vector.load %arg10[%c128_120, %c162_121] : memref<256x384xbf16, #tpu.memory_space<vmem>>, vector<128x16xbf16>
    %207 = arith.extf %206 : vector<128x16xbf16> to vector<128x16xf32>
    %208 = vector.broadcast %84 : vector<128x1xf32> to vector<128x16xf32>
    %209 = arith.mulf %208, %207 : vector<128x16xf32>
    %210 = arith.addf %205, %209 : vector<128x16xf32>
    %211 = vector.extract_strided_slice %210 {offsets = [0, 0], sizes = [8, 16], strides = [1, 1]} : vector<128x16xf32> to vector<8x16xf32>
    %c0_122 = arith.constant 0 : index
    %c0_123 = arith.constant 0 : index
    %c9 = arith.constant 9 : index
    %c0_124 = arith.constant 0 : index
    %212 = vector.load %arg9[%c0_122, %c0_123, %c9, %c0_124] : memref<1x8x16x16xf32, #tpu.memory_space<vmem>>, vector<1x8x1x16xf32>
    %213 = vector.shape_cast %212 : vector<1x8x1x16xf32> to vector<8x16xf32>
    %214 = vector.shape_cast %211 : vector<8x16xf32> to vector<1x8x1x16xf32>
    tpu.vector_store %arg9[%c0_122, %c0_123, %c9, %c0_124], %214 {strides = array<i32>} : memref<1x8x16x16xf32, #tpu.memory_space<vmem>>, vector<1x8x1x16xf32>,
    %c0_125 = arith.constant 0 : index
    %c180 = arith.constant 180 : index
    %215 = vector.load %arg10[%c0_125, %c180] : memref<256x384xbf16, #tpu.memory_space<vmem>>, vector<128x16xbf16>
    %216 = arith.extf %215 : vector<128x16xbf16> to vector<128x16xf32>
    %217 = vector.broadcast %83 : vector<128x1xf32> to vector<128x16xf32>
    %218 = arith.mulf %217, %216 : vector<128x16xf32>
    %c128_126 = arith.constant 128 : index
    %c180_127 = arith.constant 180 : index
    %219 = vector.load %arg10[%c128_126, %c180_127] : memref<256x384xbf16, #tpu.memory_space<vmem>>, vector<128x16xbf16>
    %220 = arith.extf %219 : vector<128x16xbf16> to vector<128x16xf32>
    %221 = vector.broadcast %84 : vector<128x1xf32> to vector<128x16xf32>
    %222 = arith.mulf %221, %220 : vector<128x16xf32>
    %223 = arith.addf %218, %222 : vector<128x16xf32>
    %224 = vector.extract_strided_slice %223 {offsets = [0, 0], sizes = [8, 16], strides = [1, 1]} : vector<128x16xf32> to vector<8x16xf32>
    %c0_128 = arith.constant 0 : index
    %c0_129 = arith.constant 0 : index
    %c10 = arith.constant 10 : index
    %c0_130 = arith.constant 0 : index
    %225 = vector.load %arg9[%c0_128, %c0_129, %c10, %c0_130] : memref<1x8x16x16xf32, #tpu.memory_space<vmem>>, vector<1x8x1x16xf32>
    %226 = vector.shape_cast %225 : vector<1x8x1x16xf32> to vector<8x16xf32>
    %227 = vector.shape_cast %224 : vector<8x16xf32> to vector<1x8x1x16xf32>
    tpu.vector_store %arg9[%c0_128, %c0_129, %c10, %c0_130], %227 {strides = array<i32>} : memref<1x8x16x16xf32, #tpu.memory_space<vmem>>, vector<1x8x1x16xf32>,
    %c0_131 = arith.constant 0 : index
    %c198 = arith.constant 198 : index
    %228 = vector.load %arg10[%c0_131, %c198] : memref<256x384xbf16, #tpu.memory_space<vmem>>, vector<128x16xbf16>
    %229 = arith.extf %228 : vector<128x16xbf16> to vector<128x16xf32>
    %230 = vector.broadcast %83 : vector<128x1xf32> to vector<128x16xf32>
    %231 = arith.mulf %230, %229 : vector<128x16xf32>
    %c128_132 = arith.constant 128 : index
    %c198_133 = arith.constant 198 : index
    %232 = vector.load %arg10[%c128_132, %c198_133] : memref<256x384xbf16, #tpu.memory_space<vmem>>, vector<128x16xbf16>
    %233 = arith.extf %232 : vector<128x16xbf16> to vector<128x16xf32>
    %234 = vector.broadcast %84 : vector<128x1xf32> to vector<128x16xf32>
    %235 = arith.mulf %234, %233 : vector<128x16xf32>
    %236 = arith.addf %231, %235 : vector<128x16xf32>
    %237 = vector.extract_strided_slice %236 {offsets = [0, 0], sizes = [8, 16], strides = [1, 1]} : vector<128x16xf32> to vector<8x16xf32>
    %c0_134 = arith.constant 0 : index
    %c0_135 = arith.constant 0 : index
    %c11 = arith.constant 11 : index
    %c0_136 = arith.constant 0 : index
    %238 = vector.load %arg9[%c0_134, %c0_135, %c11, %c0_136] : memref<1x8x16x16xf32, #tpu.memory_space<vmem>>, vector<1x8x1x16xf32>
    %239 = vector.shape_cast %238 : vector<1x8x1x16xf32> to vector<8x16xf32>
    %240 = vector.shape_cast %237 : vector<8x16xf32> to vector<1x8x1x16xf32>
    tpu.vector_store %arg9[%c0_134, %c0_135, %c11, %c0_136], %240 {strides = array<i32>} : memref<1x8x16x16xf32, #tpu.memory_space<vmem>>, vector<1x8x1x16xf32>,
    %c0_137 = arith.constant 0 : index
    %c216 = arith.constant 216 : index
    %241 = vector.load %arg10[%c0_137, %c216] : memref<256x384xbf16, #tpu.memory_space<vmem>>, vector<128x16xbf16>
    %242 = arith.extf %241 : vector<128x16xbf16> to vector<128x16xf32>
    %243 = vector.broadcast %83 : vector<128x1xf32> to vector<128x16xf32>
    %244 = arith.mulf %243, %242 : vector<128x16xf32>
    %c128_138 = arith.constant 128 : index
    %c216_139 = arith.constant 216 : index
    %245 = vector.load %arg10[%c128_138, %c216_139] : memref<256x384xbf16, #tpu.memory_space<vmem>>, vector<128x16xbf16>
    %246 = arith.extf %245 : vector<128x16xbf16> to vector<128x16xf32>
    %247 = vector.broadcast %84 : vector<128x1xf32> to vector<128x16xf32>
    %248 = arith.mulf %247, %246 : vector<128x16xf32>
    %249 = arith.addf %244, %248 : vector<128x16xf32>
    %250 = vector.extract_strided_slice %249 {offsets = [0, 0], sizes = [8, 16], strides = [1, 1]} : vector<128x16xf32> to vector<8x16xf32>
    %c0_140 = arith.constant 0 : index
    %c0_141 = arith.constant 0 : index
    %c12_142 = arith.constant 12 : index
    %c0_143 = arith.constant 0 : index
    %251 = vector.load %arg9[%c0_140, %c0_141, %c12_142, %c0_143] : memref<1x8x16x16xf32, #tpu.memory_space<vmem>>, vector<1x8x1x16xf32>
    %252 = vector.shape_cast %251 : vector<1x8x1x16xf32> to vector<8x16xf32>
    %253 = vector.shape_cast %250 : vector<8x16xf32> to vector<1x8x1x16xf32>
    tpu.vector_store %arg9[%c0_140, %c0_141, %c12_142, %c0_143], %253 {strides = array<i32>} : memref<1x8x16x16xf32, #tpu.memory_space<vmem>>, vector<1x8x1x16xf32>,
    %c0_144 = arith.constant 0 : index
    %c234 = arith.constant 234 : index
    %254 = vector.load %arg10[%c0_144, %c234] : memref<256x384xbf16, #tpu.memory_space<vmem>>, vector<128x16xbf16>
    %255 = arith.extf %254 : vector<128x16xbf16> to vector<128x16xf32>
    %256 = vector.broadcast %83 : vector<128x1xf32> to vector<128x16xf32>
    %257 = arith.mulf %256, %255 : vector<128x16xf32>
    %c128_145 = arith.constant 128 : index
    %c234_146 = arith.constant 234 : index
    %258 = vector.load %arg10[%c128_145, %c234_146] : memref<256x384xbf16, #tpu.memory_space<vmem>>, vector<128x16xbf16>
    %259 = arith.extf %258 : vector<128x16xbf16> to vector<128x16xf32>
    %260 = vector.broadcast %84 : vector<128x1xf32> to vector<128x16xf32>
    %261 = arith.mulf %260, %259 : vector<128x16xf32>
    %262 = arith.addf %257, %261 : vector<128x16xf32>
    %263 = vector.extract_strided_slice %262 {offsets = [0, 0], sizes = [8, 16], strides = [1, 1]} : vector<128x16xf32> to vector<8x16xf32>
    %c0_147 = arith.constant 0 : index
    %c0_148 = arith.constant 0 : index
    %c13 = arith.constant 13 : index
    %c0_149 = arith.constant 0 : index
    %264 = vector.load %arg9[%c0_147, %c0_148, %c13, %c0_149] : memref<1x8x16x16xf32, #tpu.memory_space<vmem>>, vector<1x8x1x16xf32>
    %265 = vector.shape_cast %264 : vector<1x8x1x16xf32> to vector<8x16xf32>
    %266 = vector.shape_cast %263 : vector<8x16xf32> to vector<1x8x1x16xf32>
    tpu.vector_store %arg9[%c0_147, %c0_148, %c13, %c0_149], %266 {strides = array<i32>} : memref<1x8x16x16xf32, #tpu.memory_space<vmem>>, vector<1x8x1x16xf32>,
    %c0_150 = arith.constant 0 : index
    %c252 = arith.constant 252 : index
    %267 = vector.load %arg10[%c0_150, %c252] : memref<256x384xbf16, #tpu.memory_space<vmem>>, vector<128x16xbf16>
    %268 = arith.extf %267 : vector<128x16xbf16> to vector<128x16xf32>
    %269 = vector.broadcast %83 : vector<128x1xf32> to vector<128x16xf32>
    %270 = arith.mulf %269, %268 : vector<128x16xf32>
    %c128_151 = arith.constant 128 : index
    %c252_152 = arith.constant 252 : index
    %271 = vector.load %arg10[%c128_151, %c252_152] : memref<256x384xbf16, #tpu.memory_space<vmem>>, vector<128x16xbf16>
    %272 = arith.extf %271 : vector<128x16xbf16> to vector<128x16xf32>
    %273 = vector.broadcast %84 : vector<128x1xf32> to vector<128x16xf32>
    %274 = arith.mulf %273, %272 : vector<128x16xf32>
    %275 = arith.addf %270, %274 : vector<128x16xf32>
    %276 = vector.extract_strided_slice %275 {offsets = [0, 0], sizes = [8, 16], strides = [1, 1]} : vector<128x16xf32> to vector<8x16xf32>
    %c0_153 = arith.constant 0 : index
    %c0_154 = arith.constant 0 : index
    %c14 = arith.constant 14 : index
    %c0_155 = arith.constant 0 : index
    %277 = vector.load %arg9[%c0_153, %c0_154, %c14, %c0_155] : memref<1x8x16x16xf32, #tpu.memory_space<vmem>>, vector<1x8x1x16xf32>
    %278 = vector.shape_cast %277 : vector<1x8x1x16xf32> to vector<8x16xf32>
    %279 = vector.shape_cast %276 : vector<8x16xf32> to vector<1x8x1x16xf32>
    tpu.vector_store %arg9[%c0_153, %c0_154, %c14, %c0_155], %279 {strides = array<i32>} : memref<1x8x16x16xf32, #tpu.memory_space<vmem>>, vector<1x8x1x16xf32>,
    %c0_156 = arith.constant 0 : index
    %c270 = arith.constant 270 : index
    %280 = vector.load %arg10[%c0_156, %c270] : memref<256x384xbf16, #tpu.memory_space<vmem>>, vector<128x16xbf16>
    %281 = arith.extf %280 : vector<128x16xbf16> to vector<128x16xf32>
    %282 = vector.broadcast %83 : vector<128x1xf32> to vector<128x16xf32>
    %283 = arith.mulf %282, %281 : vector<128x16xf32>
    %c128_157 = arith.constant 128 : index
    %c270_158 = arith.constant 270 : index
    %284 = vector.load %arg10[%c128_157, %c270_158] : memref<256x384xbf16, #tpu.memory_space<vmem>>, vector<128x16xbf16>
    %285 = arith.extf %284 : vector<128x16xbf16> to vector<128x16xf32>
    %286 = vector.broadcast %84 : vector<128x1xf32> to vector<128x16xf32>
    %287 = arith.mulf %286, %285 : vector<128x16xf32>
    %288 = arith.addf %283, %287 : vector<128x16xf32>
    %289 = vector.extract_strided_slice %288 {offsets = [0, 0], sizes = [8, 16], strides = [1, 1]} : vector<128x16xf32> to vector<8x16xf32>
    %c0_159 = arith.constant 0 : index
    %c0_160 = arith.constant 0 : index
    %c15 = arith.constant 15 : index
    %c0_161 = arith.constant 0 : index
    %290 = vector.load %arg9[%c0_159, %c0_160, %c15, %c0_161] : memref<1x8x16x16xf32, #tpu.memory_space<vmem>>, vector<1x8x1x16xf32>
    %291 = vector.shape_cast %290 : vector<1x8x1x16xf32> to vector<8x16xf32>
    %292 = vector.shape_cast %289 : vector<8x16xf32> to vector<1x8x1x16xf32>
    tpu.vector_store %arg9[%c0_159, %c0_160, %c15, %c0_161], %292 {strides = array<i32>} : memref<1x8x16x16xf32, #tpu.memory_space<vmem>>, vector<1x8x1x16xf32>,
    return
  }
  func.func @transform_0(%arg0: i32) -> (i32, i32, i32) {
    %c0_i32 = arith.constant 0 : i32
    %c0_i32_0 = arith.constant 0 : i32
    %c0_i32_1 = arith.constant 0 : i32
    return %arg0, %c0_i32, %c0_i32_0 : i32, i32, i32
  }
  func.func @transform_1(%arg0: i32) -> (i32, i32) {
    %c0_i32 = arith.constant 0 : i32
    %c0_i32_0 = arith.constant 0 : i32
    %c0_i32_1 = arith.constant 0 : i32
    return %c0_i32, %c0_i32_0 : i32, i32
  }
  func.func @transform_2(%arg0: i32) -> (i32, i32) {
    %c0_i32 = arith.constant 0 : i32
    %c0_i32_0 = arith.constant 0 : i32
    %c0_i32_1 = arith.constant 0 : i32
    return %c0_i32, %c0_i32_0 : i32, i32
  }
  func.func @transform_3(%arg0: i32) -> (i32, i32) {
    %c0_i32 = arith.constant 0 : i32
    %c0_i32_0 = arith.constant 0 : i32
    %c0_i32_1 = arith.constant 0 : i32
    return %c0_i32, %c0_i32_0 : i32, i32
  }
  func.func @transform_4(%arg0: i32) -> (i32, i32) {
    %c0_i32 = arith.constant 0 : i32
    %c0_i32_0 = arith.constant 0 : i32
    %c0_i32_1 = arith.constant 0 : i32
    return %c0_i32, %c0_i32_0 : i32, i32
  }
  func.func @transform_5(%arg0: i32) -> (i32, i32) {
    %c0_i32 = arith.constant 0 : i32
    %c0_i32_0 = arith.constant 0 : i32
    %c0_i32_1 = arith.constant 0 : i32
    return %c0_i32, %c0_i32_0 : i32, i32
  }
  func.func @transform_6(%arg0: i32) -> (i32, i32) {
    %c0_i32 = arith.constant 0 : i32
    %c0_i32_0 = arith.constant 0 : i32
    %c0_i32_1 = arith.constant 0 : i32
    return %c0_i32, %c0_i32_0 : i32, i32
  }
  func.func @transform_7(%arg0: i32) -> (i32, i32) {
    %c0_i32 = arith.constant 0 : i32
    %c0_i32_0 = arith.constant 0 : i32
    %c0_i32_1 = arith.constant 0 : i32
    return %c0_i32, %c0_i32_0 : i32, i32
  }
  func.func @transform_8(%arg0: i32) -> (i32, i32, i32, i32) {
    %c0_i32 = arith.constant 0 : i32
    %c0_i32_0 = arith.constant 0 : i32
    %c0_i32_1 = arith.constant 0 : i32
    %c0_i32_2 = arith.constant 0 : i32
    return %arg0, %c0_i32, %c0_i32_0, %c0_i32_1 : i32, i32, i32, i32
  }
}

</mosaic_0001>

<bundles_post_ra>
// kernel: tpu_custom_call.1
= control target key start
LH: loop header
LB: loop body
LE: loop exit
PB: predicated region body
PF: predicated region fallthrough
CT: control target
= control target key end

     0   :  { %s15095_s0 = inlined_call_operand.vmem [shape: bf16[2,4,384], index: 0, kind: input, shape index: {}]   ;;  %s15096_s1 = inlined_call_operand.vmem [shape: f32[1,288], index: 1, kind: input, shape index: {}]   ;;  %s15097_s2 = inlined_call_operand.vmem [shape: bf16[256,36], index: 2, kind: input, shape index: {}]   ;;  %s15098_s3 = inlined_call_operand.vmem [shape: f32[256,1], index: 3, kind: input, shape index: {}]   ;;  %s15099_s4 = inlined_call_operand.vmem [shape: f32[128,128], index: 4, kind: input, shape index: {}]   ;;  %s15100_s5 = inlined_call_operand.vmem [shape: f32[128,1], index: 5, kind: input, shape index: {}]   ;;  %s15101_s6 = inlined_call_operand.vmem [shape: f32[256,128], index: 6, kind: input, shape index: {}]   ;;  %s15102_s7 = inlined_call_operand.vmem [shape: f32[256,1], index: 7, kind: input, shape index: {}]   ;;  %s15103_s8 = inlined_call_operand.hbm [shape: f32[2,8,16,16], index: 8, kind: output, shape index: {}]  }
   0x1   :  { %15174 = sst [smem:[#allocation74_spill]] %s15095_s0 }
   0x2   :  { %15175 = sst [smem:[#allocation75_spill]] %s15096_s1 }
   0x3   :  { %15176 = sst [smem:[#allocation76_spill]] %s15097_s2 }
   0x4   :  { %13 = vsyncpa [#allocation4], 0 }
   0x5   :  { %15 = vsyncpa [#allocation4 + $0x1], 0  ;;  %s11717_s27 = smov 0   ;;  %s11719_s28 = smov 0  }
   0x6   :  { %s11721_s29 = smov 0   ;;  %s11723_s30 = smov 0  }
   0x7 LB: > { %s11738_s9 = sadd.s32 4294967295, %s11637_s30   ;;  %s9387_s10 = sadd.s32 4294967294, %s11637_s30   ;;  %s11637_s30 = sphi %s11723_s30, %s15392_s30   ;;  %s11633_s29 = sphi %s11721_s29, %s15391_s29   ;;  %s11629_s28 = sphi %s11719_s28, %s15390_s28   ;;  %s11625_s27 = sphi %s11717_s27, %s15389_s27  }
   0x8   : > { %s11742_s11 = sadd.s32 1, %s11637_s30   ;;  %s201_s12 = sadd.s32 1, %s11633_s29 }
   0x9   : > { %s198_s13 = ssub.s32 %s11637_s30, %s11742_s11  ;;  %p211_p0 = scmp.ne.s32.totalorder %s11633_s29, %s11629_s28 }
   0xa   : > { %p199_p1 = scmp.eq.s32.totalorder %s198_s13, 0  ;;  %p212_p2 = scmp.eq.s32.totalorder %s11738_s9, 1 }
   0xb   : > { %p217_p3 = scmp.ne.s32.totalorder %s11629_s28, %s11625_s27  ;;  %p218_p4 = scmp.eq.s32.totalorder %s9387_s10, 1 }
   0xc   : > { %s11753_s14 = scalar_select %p199_p1, %s11633_s29, %s201_s12  }
   0xd   : > { %p11755_p5 = por %p212_p2, %p211_p0  ;;  %p11759_p6 = por %p218_p4, %p217_p3 }
   0xe   : > { %p9390_p7 = scmp.ge.s32.totalorder %s11637_s30, 1  ;;  %p265_p8 = scmp.lt.s32.totalorder %s11637_s30, 3 }
  0x10   : > { %p266_p9 = pnand %p9390_p7, %p265_p8 }
  0x12   : > { %269 = sbr.rel (%p266_p9) target bundleno = 2494 (0x9be), region = 52 }
  0x19   : > { %p299_p10 = scmp.lt.s32.totalorder %s11738_s9, 1  ;;  %v487_v0 = vlaneseq  ;;  %v11639_v1 = vmov 1983009808   ;;  %s15180_s0 = sld [smem:[#allocation74_spill]]  ;;  %v15114_v11 = vmov 0   ;;  %vm557_vm0 = vcmask 1041408  }
  0x1a   : > { %v485_v2 = vunpack.c.l.s4 %v11639_v1  ;;  %s11640_s22 = smov 126   ;;  %1010 = vmatprep.mubr.bf16.mxu0 %v15114_v11  ;;  %599 = vmatprep.mubr.bf16.mxu1 %v15114_v11  ;;  %s15181_s2 = sld [smem:[#allocation76_spill]]  ;;  %vm508_vm1 = vcmask 31744   ;;  %vm1500_vm2 = vcmask 1031168   ;;  %vm505_vm3 = vcmask 1039360  }
  0x1b   : > { %s300_s17 = scalar_select %p299_p10, %s11738_s9, 1  ;;  %v11767_v3 = vshrl.u32 %v487_v0, 7  ;;  %11414 = vset.pattern.permute.xlu0 %v15114_v11  ;;  %11415 = vset.pattern.permute.xlu1 %v15114_v11  ;;  %vm2178_vm4 = vcmask 900096   ;;  %vm2856_vm5 = vcmask 891904   ;;  %vm3534_vm6 = vcmask 883712  }
  0x1c   : > { %v486_v4 = vunpack.c.0.s8 %v485_v2  ;;  %s11642_s10 = smov 120   ;;  %s11643_s25 = smov 127   ;;  %vm4212_vm7 = vcmask 752640   ;;  %vm4890_vm8 = vcmask 744448   ;;  %vm5568_vm9 = vcmask 736256  }
  0x1d   : > { %15179 = vst [vmem:[#allocation6_spill] sm:$0xff] %v11767_v3  ;;  %s11342_s18 = smul.u32 6, %s300_s17  ;;  %s11644_s13 = smov 124   ;;  %vm6480_vm10 = vcmask 261120   ;;  %vm7356_vm11 = vcmask 122880   ;;  %vm8253_vm12 = vcmask 15360  }
  0x1e   : > { %v11770_v5 = vsub.s32 %v486_v4, %v11767_v3  ;;  %s15168_s26 = smov 110   ;;  %s11646_s12 = smov 116  }
  0x1f   : > { %s11775_s21 = scalar_lea.vmem %s15180_s0, %s11342_s18  ;;  %s15160_s24 = smov 112  }
  0x20   : > { %v1332_v6 = vld [vmem:[%s11775_s21] sm:$0x3f]  ;;  %v11418_v15 = vld [vmem:[%s15181_s2 + $0x8] sm:$0xff]   ;;  %v11419_v18 = vld [vmem:[%s15181_s2 + $0x10] sm:$0xff]   ;;  %s15166_s20 = smov 92   ;;  %s11653_s18 = smov 100  }
  0x21   : > { %v1485_v7 = vrot.slane %v1332_v6, %v11770_v5  ;;  %v1478_v8 = vcombine.high %v1332_v6, %v1332_v6  ;;  %v11417_v12 = vld [vmem:[%s15181_s2] sm:$0xff]   ;;  %v11420_v19 = vld [vmem:[%s15181_s2 + $0x18] sm:$0xff]   ;;  %v11422_v22 = vld [vmem:[%s15181_s2 + $0x28] sm:$0xff]   ;;  %s15299_s1 = sld [smem:[#allocation75_spill]]  ;;  %s15164_s23 = smov 74  }
  0x22   : > { %v337_v13 = vld [vmem:[%s11775_s21] sm:$0x3f]  ;;  %v11423_v23 = vld [vmem:[%s15181_s2 + $0x30] sm:$0xff]   ;;  %v11424_v24 = vld [vmem:[%s15181_s2 + $0x38] sm:$0xff]   ;;  %s15162_s17 = smov 20   ;;  %s15144_s19 = smov 2  }
  0x23   : > { %1494 = vrot.lane.b32.xlu0 %v1485_v7, %s11640_s22  ;;  %v1493_v9 = vcombine.high %v1485_v7, %v1485_v7  ;;  %v1492_v10 = vrot.slane %v1478_v8, %v11770_v5  ;;  %v490_v14 = vrot.slane %v337_v13, %v11770_v5  ;;  %v11428_v20 = vld [vmem:[%s15181_s2] sm:$0xff]   ;;  %v11430_v25 = vld [vmem:[%s15181_s2 + $0x8] sm:$0xff]   ;;  %v483_v28 = vcombine.high %v337_v13, %v337_v13  ;;  %v11429_v30 = vld [vmem:[%s15181_s2 + $0x50] sm:$0xff]   ;;  %s15385_s0 = smov 92  }
  0x24   : > { %v11421_v21 = vld [vmem:[%s15181_s2 + $0x20] sm:$0xff]   ;;  %v11426_v27 = vld [vmem:[%s15181_s2 + $0x48] sm:$0xff]   ;;  %v11431_v31 = vld [vmem:[%s15181_s2 + $0x58] sm:$0xff]  }
  0x25   : > { %1498 = vrot.lane.b32.xlu1 %v1492_v10, %s11640_s22  ;;  %v11792_v16 = vcombine.high %v490_v14, %v490_v14  ;;  %v11795_v17 = vsel %vm557_vm0, %v490_v14, 0  ;;  %v11425_v26 = vld [vmem:[%s15181_s2 + $0x40] sm:$0xff]   ;;  %v11845_v29 = vrot.slane %v483_v28, %v11770_v5  ;;  %v11432_v32 = vld [vmem:[%s15181_s2 + $0x10] sm:$0xff]   ;;  %v11434_v34 = vld [vmem:[%s15181_s2 + $0x18] sm:$0xff]  }
  0x26   : > { %v11433_v33 = vld [vmem:[%s15181_s2 + $0x60] sm:$0xff]   ;;  %v11435_v35 = vld [vmem:[%s15181_s2 + $0x68] sm:$0xff]   ;;  %v11437_v37 = vld [vmem:[%s15181_s2 + $0x70] sm:$0xff]  }
  0x27   : > { %1496 = vrot.lane.b32.xlu0 %v1493_v9, %s11640_s22  ;;  %9442 = vmatprep.subr.msk.bf16.mxu0 %vm557_vm0, %v11792_v16  ;;  %v11436_v36 = vld [vmem:[%s15181_s2 + $0x20] sm:$0xff]   ;;  %v11438_v38 = vld [vmem:[%s15181_s2 + $0x28] sm:$0xff]   ;;  %v11439_v40 = vld [vmem:[%s15181_s2 + $0x78] sm:$0xff]   ;;  %s11647_s22 = smov 109  }
  0x28   : > { %979 = vmatpush1.bf16.msra.mxu0 %v11795_v17  ;;  %v2010_v39 = vld [vmem:[%s11775_s21] sm:$0x3f]  ;;  %v11898_v45 = vld [vmem:[%s15181_s2 + $0x30] sm:$0xff]   ;;  %v11908_v47 = vld [vmem:[%s15181_s2 + $0x38] sm:$0xff]  }
  0x29   : > { %1445 = vrot.lane.b32.xlu1 %v11417_v12, %s11642_s10  ;;  %v2163_v41 = vrot.slane %v2010_v39, %v11770_v5  ;;  %v2156_v42 = vcombine.high %v2010_v39, %v2010_v39  ;;  %v11448_v46 = vld [vmem:[%s15181_s2] sm:$0xff]   ;;  %v11449_v48 = vld [vmem:[%s15181_s2 + $0x8] sm:$0xff]   ;;  %v11451_v50 = vld [vmem:[%s15181_s2 + $0x10] sm:$0xff]  }
  0x2a   : > { %v11918_v49 = vld [vmem:[%s15181_s2 + $0x40] sm:$0xff]   ;;  %v11929_v51 = vld [vmem:[%s15181_s2 + $0x48] sm:$0xff]   ;;  %v11452_v52 = vld [vmem:[%s15181_s2 + $0x18] sm:$0xff]  }
  0x2b   : > { %1447 = vrot.lane.b32.xlu0 %v11418_v15, %s11642_s10  ;;  %9443 = vmatmul.mubr.msk.bf16.vlgmr.msra.gmra.mrb[0].mxu0 %vm508_vm1, %v11428_v20  ;;  %v2171_v43 = vcombine.high %v2163_v41, %v2163_v41  ;;  %v2170_v44 = vrot.slane %v2156_v42, %v11770_v5  ;;  %v11940_v53 = vld [vmem:[%s15181_s2 + $0x50] sm:$0xff]   ;;  %v11454_v54 = vld [vmem:[%s15181_s2 + $0x20] sm:$0xff]   ;;  %v11951_v55 = vld [vmem:[%s15181_s2 + $0x58] sm:$0xff]  }
  0x2c   : > { %1020 = vmatprep.mubr.bf16.mxu0 %v15114_v11  ;;  %v11455_v56 = vld [vmem:[%s15181_s2 + $0x28] sm:$0xff]   ;;  %v11962_v57 = vld [vmem:[%s15181_s2 + $0x60] sm:$0xff]   ;;  %v11457_v58 = vld [vmem:[%s15181_s2 + $0x30] sm:$0xff]  }
  0x2d   : > { %1449 = vrot.lane.b32.xlu1 %v11419_v18, %s11642_s10  ;;  %v11973_v59 = vld [vmem:[%s15181_s2 + $0x68] sm:$0xff]   ;;  %v11458_v60 = vld [vmem:[%s15181_s2 + $0x38] sm:$0xff]   ;;  %v11984_v61 = vld [vmem:[%s15181_s2 + $0x70] sm:$0xff]  }
  0x2e   : > { %v11459_v62 = vld [vmem:[%s15181_s2 + $0x40] sm:$0xff]   ;;  %v11995_v63 = vld [vmem:[%s15181_s2 + $0x78] sm:$0xff]   ;;  %v11460_v0 = vld [vmem:[%s15181_s2 + $0x48] sm:$0xff]  }
  0x2f   : > { %1451 = vrot.lane.b32.xlu0 %v11420_v19, %s11642_s10  ;;  %v11461_v1 = vld [vmem:[%s15181_s2 + $0x50] sm:$0xff]   ;;  %v11462_v2 = vld [vmem:[%s15181_s2 + $0x58] sm:$0xff]   ;;  %v11463_v4 = vld [vmem:[%s15181_s2 + $0x60] sm:$0xff]  }
  0x30   : > { %v11464_v6 = vld [vmem:[%s15181_s2 + $0x68] sm:$0xff]   ;;  %v11465_v7 = vld [vmem:[%s15181_s2 + $0x70] sm:$0xff]   ;;  %v2688_v8 = vld [vmem:[%s11775_s21] sm:$0x3f] }
  0x31   : > { %1453 = vrot.lane.b32.xlu1 %v11421_v21, %s11642_s10  ;;  %v11466_v9 = vld [vmem:[%s15181_s2 + $0x78] sm:$0xff]   ;;  %v2841_v10 = vrot.slane %v2688_v8, %v11770_v5  ;;  %v2834_v12 = vcombine.high %v2688_v8, %v2688_v8  ;;  %v11477_v8 = vld [vmem:[%s15181_s2 + $0x50] sm:$0xff]  }
  0x33   : > { %1455 = vrot.lane.b32.xlu0 %v11422_v22, %s11642_s10  ;;  %9444 = vmatmul.mubr.msk.bf16.gmra.mrb[4].mxu0 %vm508_vm1, %v11430_v25  ;;  %v2849_v13 = vcombine.high %v2841_v10, %v2841_v10  ;;  %v2848_v15 = vrot.slane %v2834_v12, %v11770_v5  ;;  %v11479_v12 = vld [vmem:[%s15181_s2 + $0x60] sm:$0xff]  }
  0x34   : > { %1592 = vmatprep.mubr.bf16.mxu0 %v15114_v11 }
  0x35   : > { %1457 = vrot.lane.b32.xlu1 %v11423_v23, %s11642_s10 }
  0x37   : > { %1459 = vrot.lane.b32.xlu0 %v11424_v24, %s11642_s10 }
  0x39   : > { %1461 = vrot.lane.b32.xlu1 %v11425_v26, %s11642_s10 }
  0x3b   : > { %1463 = vrot.lane.b32.xlu0 %v11426_v27, %s11642_s10 }
  0x3d   : > { %499 = vrot.lane.b32.xlu1 %v490_v14, %s11643_s25 }
  0x3f   : > { %501 = vrot.lane.b32.xlu0 %v11792_v16, %s11643_s25 }
  0x41   : > { %503 = vrot.lane.b32.xlu1 %v11845_v29, %s11643_s25  ;;  %s11649_s25 = smov 108  }
  0x43   : > { %450 = vrot.lane.b32.xlu0 %v11428_v20, %s11644_s13 }
  0x45   : > { %1465 = vrot.lane.b32.xlu1 %v11429_v30, %s11642_s10 }
  0x47   : > { %452 = vrot.lane.b32.xlu0 %v11430_v25, %s11644_s13 }
  0x49   : > { %1467 = vrot.lane.b32.xlu1 %v11431_v31, %s11642_s10 }
  0x4b   : > { %454 = vrot.lane.b32.xlu0 %v11432_v32, %s11644_s13  ;;  %v11468_v32 = vld [vmem:[%s15181_s2] sm:$0xff]  }
  0x4d   : > { %1469 = vrot.lane.b32.xlu1 %v11433_v33, %s11642_s10 }
  0x4f   : > { %456 = vrot.lane.b32.xlu0 %v11434_v34, %s11644_s13 }
  0x51   : > { %1471 = vrot.lane.b32.xlu1 %v11435_v35, %s11642_s10 }
  0x53   : > { %458 = vrot.lane.b32.xlu0 %v11436_v36, %s11644_s13 }
  0x55   : > { %1473 = vrot.lane.b32.xlu1 %v11437_v37, %s11642_s10 }
  0x57   : > { %460 = vrot.lane.b32.xlu0 %v11438_v38, %s11644_s13  ;;  %v11469_v38 = vld [vmem:[%s15181_s2 + $0x8] sm:$0xff]  }
  0x59   : > { %1475 = vrot.lane.b32.xlu1 %v11439_v40, %s11642_s10  ;;  %s11652_s10 = smov 91  }
  0x5b   : > { %2172 = vrot.lane.b32.xlu0 %v2163_v41, %s15168_s26 }
  0x5d   : > { %2174 = vrot.lane.b32.xlu1 %v2171_v43, %s15168_s26 }
  0x5f   : > { %2176 = vrot.lane.b32.xlu0 %v2170_v44, %s15168_s26 }
  0x61   : > { %462 = vrot.lane.b32.xlu1 %v11898_v45, %s11644_s13 }
  0x63   : > { %2123 = vrot.lane.b32.xlu0 %v11448_v46, %s11646_s12 }
  0x65   : > { %464 = vrot.lane.b32.xlu1 %v11908_v47, %s11644_s13 }
  0x67   : > { %2125 = vrot.lane.b32.xlu0 %v11449_v48, %s11646_s12  ;;  %v11470_v48 = vld [vmem:[%s15181_s2 + $0x10] sm:$0xff]  }
  0x69   : > { %466 = vrot.lane.b32.xlu1 %v11918_v49, %s11644_s13 }
  0x6b   : > { %2127 = vrot.lane.b32.xlu0 %v11451_v50, %s11646_s12  ;;  %v11472_v50 = vld [vmem:[%s15181_s2 + $0x18] sm:$0xff]  }
  0x6d   : > { %468 = vrot.lane.b32.xlu1 %v11929_v51, %s11644_s13 }
  0x6f   : > { %2129 = vrot.lane.b32.xlu0 %v11452_v52, %s11646_s12 }
  0x71   : > { %470 = vrot.lane.b32.xlu1 %v11940_v53, %s11644_s13 }
  0x73   : > { %2131 = vrot.lane.b32.xlu0 %v11454_v54, %s11646_s12  ;;  %v11471_v54 = vld [vmem:[%s15181_s2 + $0x20] sm:$0xff]  }
  0x75   : > { %472 = vrot.lane.b32.xlu1 %v11951_v55, %s11644_s13 }
  0x77   : > { %2133 = vrot.lane.b32.xlu0 %v11455_v56, %s11646_s12 }
  0x79   : > { %474 = vrot.lane.b32.xlu1 %v11962_v57, %s11644_s13 }
  0x7b   : > { %2135 = vrot.lane.b32.xlu0 %v11457_v58, %s11646_s12 }
  0x7d   : > { %476 = vrot.lane.b32.xlu1 %v11973_v59, %s11644_s13 }
  0x7f   : > { %2137 = vrot.lane.b32.xlu0 %v11458_v60, %s11646_s12  ;;  %v11473_v60 = vld [vmem:[%s15181_s2 + $0x30] sm:$0xff]  }
  0x81   : > { %478 = vrot.lane.b32.xlu1 %v11984_v61, %s11644_s13 }
  0x83   : > { %2139 = vrot.lane.b32.xlu0 %v11459_v62, %s11646_s12  ;;  %v11474_v62 = vld [vmem:[%s15181_s2 + $0x28] sm:$0xff]  }
  0x85   : > { %480 = vrot.lane.b32.xlu1 %v11995_v63, %s11644_s13  ;;  %s11655_s13 = smov 96  }
  0x87   : > { %2141 = vrot.lane.b32.xlu0 %v11460_v0, %s11646_s12 }
  0x89   : > { %2143 = vrot.lane.b32.xlu1 %v11461_v1, %s11646_s12  ;;  %v11475_v1 = vld [vmem:[%s15181_s2 + $0x40] sm:$0xff]  }
  0x8b   : > { %2145 = vrot.lane.b32.xlu0 %v11462_v2, %s11646_s12 }
  0x8d   : > { %2147 = vrot.lane.b32.xlu1 %v11463_v4, %s11646_s12  ;;  %v11476_v4 = vld [vmem:[%s15181_s2 + $0x38] sm:$0xff]  }
  0x8f   : > { %2149 = vrot.lane.b32.xlu0 %v11464_v6, %s11646_s12 }
  0x91   : > { %2151 = vrot.lane.b32.xlu1 %v11465_v7, %s11646_s12 }
  0x93   : > { %2153 = vrot.lane.b32.xlu0 %v11466_v9, %s11646_s12  ;;  %v11478_v9 = vld [vmem:[%s15181_s2 + $0x48] sm:$0xff]  }
  0x95   : > { %v1495_v14 = vpop.permute.xlu0 %1494  ;;  %2850 = vrot.lane.b32.xlu1 %v2841_v10, %s11647_s22 }
  0x97   : > { %v12034_v18 = vpop.permute.xlu1 %1498  ;;  %2852 = vrot.lane.b32.xlu0 %v2849_v13, %s11647_s22 }
  0x99   : > { %v1497_v19 = vpop.permute.xlu0 %1496  ;;  %2854 = vrot.lane.b32.xlu1 %v2848_v15, %s11647_s22  ;;  %s11651_s22 = smov 104  }
  0x9a   : > { %v1501_v20 = vsel %vm1500_vm2, %v1495_v14, %v1497_v19  ;;  %v1502_v21 = vsel %vm1500_vm2, %v1497_v19, %v12034_v18  ;;  %v11480_v14 = vld [vmem:[%s15181_s2 + $0x58] sm:$0xff]  }
  0x9b   : > { %v12037_v22 = vpop.permute.xlu1 %1445  ;;  %9491 = vmatprep.subr.msk.bf16.mxu0 %vm557_vm0, %v1502_v21  ;;  %v1552_v23 = vsel %vm557_vm0, %v1501_v20, 0  ;;  %2801 = vrot.lane.b32.xlu0 %v11468_v32, %s15160_s24  ;;  %v11481_v32 = vld [vmem:[%s15181_s2 + $0x70] sm:$0xff]  }
  0x9c   : > { %1561 = vmatpush1.bf16.msra.mxu0 %v1552_v23 }
  0x9d   : > { %v12041_v24 = vpop.permute.xlu0 %1447  ;;  %2803 = vrot.lane.b32.xlu1 %v11469_v38, %s15160_s24 }
  0x9f   : > { %v12043_v25 = vpop.permute.xlu1 %1449  ;;  %9492 = vmatmul.mubr.msk.bf16.vlgmr.msra.gmra.mrb[0].mxu0 %vm508_vm1, %v12037_v22  ;;  %2805 = vrot.lane.b32.xlu0 %v11470_v48, %s15160_s24 }
  0xa0   : > { %1602 = vmatprep.mubr.bf16.mxu0 %v15114_v11 }
  0xa1   : > { %v12048_v26 = vpop.permute.xlu0 %1451  ;;  %2807 = vrot.lane.b32.xlu1 %v11472_v50, %s15160_s24 }
  0xa3   : > { %v12050_v27 = vpop.permute.xlu1 %1453  ;;  %2809 = vrot.lane.b32.xlu0 %v11471_v54, %s15160_s24 }
  0xa5   : > { %v12052_v28 = vpop.permute.xlu0 %1455  ;;  %2811 = vrot.lane.b32.xlu1 %v11474_v62, %s15160_s24 }
  0xa7   : > { %v12054_v30 = vpop.permute.xlu1 %1457  ;;  %9493 = vmatmul.mubr.msk.bf16.gmra.mrb[4].mxu0 %vm508_vm1, %v12041_v24  ;;  %2813 = vrot.lane.b32.xlu0 %v11473_v60, %s15160_s24 }
  0xa8   : > { %1612 = vmatprep.mubr.bf16.mxu0 %v15114_v11 }
  0xa9   : > { %v12059_v31 = vpop.permute.xlu0 %1459  ;;  %2815 = vrot.lane.b32.xlu1 %v11476_v4, %s15160_s24 }
  0xaa   : > { %15182 = vst [vmem:[#allocation7_spill] sm:$0xff] %v12059_v31 }
  0xab   : > { %v12064_v33 = vpop.permute.xlu1 %1461  ;;  %2817 = vrot.lane.b32.xlu0 %v11475_v1, %s15160_s24 }
  0xac   : > { %15183 = vst [vmem:[#allocation8_spill] sm:$0xff] %v12064_v33 }
  0xad   : > { %v12067_v34 = vpop.permute.xlu0 %1463  ;;  %2819 = vrot.lane.b32.xlu1 %v11478_v9, %s15160_s24 }
  0xae   : > { %15184 = vst [vmem:[#allocation9_spill] sm:$0xff] %v12067_v34 }
  0xaf   : > { %v500_v35 = vpop.permute.xlu1 %499  ;;  %9494 = vmatmul.mubr.msk.bf16.gmra.mrb[8].mxu0 %vm508_vm1, %v12043_v25  ;;  %2821 = vrot.lane.b32.xlu0 %v11477_v8, %s15160_s24 }
  0xb0   : > { %1622 = vmatprep.mubr.bf16.mxu0 %v15114_v11 }
  0xb1   : > { %v502_v36 = vpop.permute.xlu0 %501  ;;  %2823 = vrot.lane.b32.xlu1 %v11480_v14, %s15160_s24 }
  0xb2   : > { %v506_v37 = vsel %vm505_vm3, %v500_v35, %v502_v36  ;;  %v11482_v35 = vld [vmem:[%s15181_s2 + $0x68] sm:$0xff]  }
  0xb3   : > { %v504_v39 = vpop.permute.xlu1 %503  ;;  %v559_v40 = vsel %vm557_vm0, %v506_v37, 0  ;;  %2825 = vrot.lane.b32.xlu0 %v11479_v12, %s15160_s24 }
  0xb4   : > { %v507_v41 = vsel %vm505_vm3, %v502_v36, %v504_v39  ;;  %v565_v44 = vsel %vm557_vm0, %v504_v39, 0  ;;  %v3366_v36 = vld [vmem:[%s11775_s21] sm:$0x3f] }
  0xb5   : > { %v12077_v42 = vpop.permute.xlu0 %450  ;;  %9409 = vmatprep.subr.msk.bf16.mxu1 %vm557_vm0, %v507_v41  ;;  %v3519_v38 = vrot.slane %v3366_v36, %v11770_v5  ;;  %2827 = vrot.lane.b32.xlu1 %v11482_v35, %s15160_s24  ;;  %v3512_v48 = vcombine.high %v3366_v36, %v3366_v36 }
  0xb6   : > { %568 = vmatpush1.bf16.msra.mxu1 %v559_v40  ;;  %v11483_v40 = vld [vmem:[%s15181_s2 + $0x78] sm:$0xff]  }
  0xb7   : > { %11333 = vmatprep.subr.msk.bf16.mxu1 %vm557_vm0, %v504_v39  ;;  %9495 = vmatmul.mubr.msk.bf16.gmra.mrb[12].mxu0 %vm508_vm1, %v12048_v26  ;;  %v12083_v43 = vpop.permute.xlu1 %1465  ;;  %v3527_v50 = vcombine.high %v3519_v38, %v3519_v38  ;;  %v3526_v60 = vrot.slane %v3512_v48, %v11770_v5 }
  0xb8   : > { %15185 = vst [vmem:[#allocation10_spill] sm:$0xff] %v12083_v43  ;;  %1632 = vmatprep.mubr.bf16.mxu0 %v15114_v11  ;;  %2829 = vrot.lane.b32.xlu0 %v11481_v32, %s15160_s24 }
  0xb9   : > { %v12087_v46 = vpop.permute.xlu0 %452  ;;  %9410 = vmatmul.mubr.msk.bf16.vlgmr.msra.gmra.mrb[0].mxu1 %vm508_vm1, %v12077_v42  ;;  %2831 = vrot.lane.b32.xlu1 %v11483_v40, %s15160_s24 }
  0xba   : > { %10058 = vmatpush3.bf16.msra.mxu1 %v565_v44  ;;  %609 = vmatprep.mubr.bf16.mxu1 %v15114_v11 }
  0xbb   : > { %v12098_v52 = vpop.permute.xlu1 %1467  ;;  %10563 = vmatprep.subr.msk.bf16.mxu1 %vm557_vm0, %v11792_v16 }
  0xbc   : > { %15186 = vst [vmem:[#allocation11_spill] sm:$0xff] %v12098_v52  ;;  %3528 = vrot.lane.b32.xlu0 %v3519_v38, %s11649_s25 }
  0xbd   : > { %v12107_v56 = vpop.permute.xlu0 %454  ;;  %3530 = vrot.lane.b32.xlu1 %v3527_v50, %s11649_s25 }
  0xbf   : > { %9496 = vmatmul.mubr.msk.bf16.gmra.mrb[16].mxu0 %vm508_vm1, %v12050_v27  ;;  %v12111_v58 = vpop.permute.xlu1 %1469 }
  0xc0   : > { %15187 = vst [vmem:[#allocation12_spill] sm:$0xff] %v12111_v58  ;;  %1642 = vmatprep.mubr.bf16.mxu0 %v15114_v11  ;;  %3532 = vrot.lane.b32.xlu0 %v3526_v60, %s11649_s25 }
  0xc1   : > { %v12115_v16 = vpop.permute.xlu0 %456  ;;  %9411 = vmatmul.mubr.msk.bf16.gmra.mrb[4].mxu1 %vm508_vm1, %v12087_v46 }
  0xc2   : > { %619 = vmatprep.mubr.bf16.mxu1 %v15114_v11 }
  0xc3   : > { %v12126_v0 = vpop.permute.xlu1 %1471 }
  0xc4   : > { %15188 = vst [vmem:[#allocation13_spill] sm:$0xff] %v12126_v0 }
  0xc5   : > { %v12133_v2 = vpop.permute.xlu0 %458 }
  0xc7   : > { %9497 = vmatmul.mubr.msk.bf16.gmra.mrb[20].mxu0 %vm508_vm1, %v12052_v28  ;;  %v12140_v6 = vpop.permute.xlu1 %1473 }
  0xc8   : > { %15189 = vst [vmem:[#allocation14_spill] sm:$0xff] %v12140_v6  ;;  %1652 = vmatprep.mubr.bf16.mxu0 %v15114_v11 }
  0xc9   : > { %v12144_v7 = vpop.permute.xlu0 %460  ;;  %9412 = vmatmul.mubr.msk.bf16.gmra.mrb[8].mxu1 %vm508_vm1, %v12107_v56 }
  0xca   : > { %629 = vmatprep.mubr.bf16.mxu1 %v15114_v11 }
  0xcb   : > { %v12156_v10 = vpop.permute.xlu1 %1475 }
  0xcc   : > { %15190 = vst [vmem:[#allocation15_spill] sm:$0xff] %v12156_v10 }
  0xcd   : > { %v2173_v13 = vpop.permute.xlu0 %2172 }
  0xcf   : > { %9498 = vmatmul.mubr.msk.bf16.gmra.mrb[24].mxu0 %vm508_vm1, %v12054_v30  ;;  %v2175_v15 = vpop.permute.xlu1 %2174 }
  0xd0   : > { %v2179_v19 = vsel %vm2178_vm4, %v2173_v13, %v2175_v15  ;;  %1662 = vmatprep.mubr.bf16.mxu0 %v15114_v11 }
  0xd1   : > { %v12170_v20 = vpop.permute.xlu0 %2176  ;;  %9413 = vmatmul.mubr.msk.bf16.gmra.mrb[12].mxu1 %vm508_vm1, %v12115_v16  ;;  %v2230_v21 = vsel %vm557_vm0, %v2179_v19, 0 }
  0xd2   : > { %v2180_v23 = vsel %vm2178_vm4, %v2175_v15, %v12170_v20  ;;  %639 = vmatprep.mubr.bf16.mxu1 %v15114_v11 }
  0xd3   : > { %9540 = vmatprep.subr.msk.bf16.mxu0 %vm557_vm0, %v2180_v23  ;;  %v12186_v37 = vpop.permute.xlu1 %462 }
  0xd4   : > { %2239 = vmatpush1.bf16.msra.mxu0 %v2230_v21 }
  0xd5   : > { %v12190_v39 = vpop.permute.xlu0 %2123 }
  0xd6   : > { %15191 = vst [vmem:[#allocation16_spill] sm:$0xff] %v12190_v39 }
  0xd7   : > { %9499 = vmatmul.mubr.msk.bf16.gmra.mrb[28].mxu0 %vm508_vm1, %v12059_v31  ;;  %v12198_v41 = vpop.permute.xlu1 %464 }
  0xd8   : > { %1672 = vmatprep.mubr.bf16.mxu0 %v15114_v11 }
  0xd9   : > { %9414 = vmatmul.mubr.msk.bf16.gmra.mrb[16].mxu1 %vm508_vm1, %v12133_v2  ;;  %v12204_v44 = vpop.permute.xlu0 %2125 }
  0xda   : > { %15192 = vst [vmem:[#allocation17_spill] sm:$0xff] %v12204_v44  ;;  %649 = vmatprep.mubr.bf16.mxu1 %v15114_v11 }
  0xdb   : > { %v12208_v54 = vpop.permute.xlu1 %466 }
  0xdd   : > { %v12211_v62 = vpop.permute.xlu0 %2127 }
  0xde   : > { %15193 = vst [vmem:[#allocation18_spill] sm:$0xff] %v12211_v62 }
  0xdf   : > { %9500 = vmatmul.mubr.msk.bf16.gmra.mrb[32].mxu0 %vm508_vm1, %v12064_v33  ;;  %v12217_v1 = vpop.permute.xlu1 %468 }
  0xe0   : > { %1682 = vmatprep.mubr.bf16.mxu0 %v15114_v11 }
  0xe1   : > { %9415 = vmatmul.mubr.msk.bf16.gmra.mrb[20].mxu1 %vm508_vm1, %v12144_v7  ;;  %v12222_v4 = vpop.permute.xlu0 %2129 }
  0xe2   : > { %15194 = vst [vmem:[#allocation19_spill] sm:$0xff] %v12222_v4  ;;  %659 = vmatprep.mubr.bf16.mxu1 %v15114_v11 }
  0xe3   : > { %v12225_v8 = vpop.permute.xlu1 %470 }
  0xe5   : > { %v12227_v9 = vpop.permute.xlu0 %2131 }
  0xe6   : > { %15195 = vst [vmem:[#allocation20_spill] sm:$0xff] %v12227_v9 }
  0xe7   : > { %9501 = vmatmul.mubr.msk.bf16.gmra.mrb[36].mxu0 %vm508_vm1, %v12067_v34  ;;  %v12231_v12 = vpop.permute.xlu1 %472 }
  0xe8   : > { %1692 = vmatprep.mubr.bf16.mxu0 %v15114_v11 }
  0xe9   : > { %9416 = vmatmul.mubr.msk.bf16.gmra.mrb[24].mxu1 %vm508_vm1, %v12186_v37  ;;  %v12236_v13 = vpop.permute.xlu0 %2133 }
  0xea   : > { %15196 = vst [vmem:[#allocation21_spill] sm:$0xff] %v12236_v13  ;;  %669 = vmatprep.mubr.bf16.mxu1 %v15114_v11 }
  0xeb   : > { %v12239_v14 = vpop.permute.xlu1 %474 }
  0xed   : > { %v12241_v15 = vpop.permute.xlu0 %2135 }
  0xee   : > { %15197 = vst [vmem:[#allocation22_spill] sm:$0xff] %v12241_v15 }
  0xef   : > { %9502 = vmatmul.mubr.msk.bf16.gmra.mrb[40].mxu0 %vm508_vm1, %v12083_v43  ;;  %v12245_v19 = vpop.permute.xlu1 %476 }
  0xf0   : > { %1702 = vmatprep.mubr.bf16.mxu0 %v15114_v11 }
  0xf1   : > { %9417 = vmatmul.mubr.msk.bf16.gmra.mrb[28].mxu1 %vm508_vm1, %v12198_v41  ;;  %v12250_v21 = vpop.permute.xlu0 %2137 }
  0xf2   : > { %679 = vmatprep.mubr.bf16.mxu1 %v15114_v11 }
  0xf3   : > { %v12253_v23 = vpop.permute.xlu1 %478 }
  0xf5   : > { %v12255_v32 = vpop.permute.xlu0 %2139 }
  0xf7   : > { %9503 = vmatmul.mubr.msk.bf16.gmra.mrb[44].mxu0 %vm508_vm1, %v12098_v52  ;;  %v12259_v35 = vpop.permute.xlu1 %480 }
  0xf8   : > { %1712 = vmatprep.mubr.bf16.mxu0 %v15114_v11 }
  0xf9   : > { %9418 = vmatmul.mubr.msk.bf16.gmra.mrb[32].mxu1 %vm508_vm1, %v12208_v54  ;;  %v12264_v36 = vpop.permute.xlu0 %2141 }
  0xfa   : > { %689 = vmatprep.mubr.bf16.mxu1 %v15114_v11 }
  0xfb   : > { %v12267_v38 = vpop.permute.xlu1 %2143 }
  0xfd   : > { %v12269_v40 = vpop.permute.xlu0 %2145 }
  0xff   : > { %9504 = vmatmul.mubr.msk.bf16.gmra.mrb[48].mxu0 %vm508_vm1, %v12111_v58  ;;  %v12273_v48 = vpop.permute.xlu1 %2147 }
 0x100   : > { %1722 = vmatprep.mubr.bf16.mxu0 %v15114_v11 }
 0x101   : > { %9419 = vmatmul.mubr.msk.bf16.gmra.mrb[36].mxu1 %vm508_vm1, %v12217_v1  ;;  %v12278_v50 = vpop.permute.xlu0 %2149 }
 0x102   : > { %699 = vmatprep.mubr.bf16.mxu1 %v15114_v11 }
 0x103   : > { %v12281_v60 = vpop.permute.xlu1 %2151 }
 0x105   : > { %v12283_v3 = vpop.permute.xlu0 %2153 }
 0x107   : > { %9505 = vmatmul.mubr.msk.bf16.gmra.mrb[52].mxu0 %vm508_vm1, %v12126_v0  ;;  %v2851_v52 = vpop.permute.xlu1 %2850 }
 0x108   : > { %1732 = vmatprep.mubr.bf16.mxu0 %v15114_v11 }
 0x109   : > { %9420 = vmatmul.mubr.msk.bf16.gmra.mrb[40].mxu1 %vm508_vm1, %v12225_v8  ;;  %v2853_v58 = vpop.permute.xlu0 %2852 }
 0x10a   : > { %709 = vmatprep.mubr.bf16.mxu1 %v15114_v11 }
 0x10b   : > { %v12291_v43 = vpop.permute.xlu1 %2854 }
 0x10c   : > { %v2858_v34 = vsel %vm2856_vm5, %v2853_v58, %v12291_v43 }
 0x10d   : > { %9589 = vmatprep.subr.msk.bf16.mxu0 %vm557_vm0, %v2858_v34  ;;  %v2857_v34 = vsel %vm2856_vm5, %v2851_v52, %v2853_v58  ;;  %v11485_v52 = vld [vmem:[%s15181_s2] sm:$0xff]   ;;  %v12323_v58 = vpop.permute.xlu0 %2801 }
 0x10e   : > { %3479 = vrot.lane.b32.xlu1 %v11485_v52, %s11649_s25 }
 0x10f   : > { %9506 = vmatmul.mubr.msk.bf16.gmra.mrb[56].mxu0 %vm508_vm1, %v12140_v6  ;;  %v2908_v6 = vsel %vm557_vm0, %v2857_v34, 0  ;;  %v12330_v34 = vpop.permute.xlu1 %2803 }
 0x110   : > { %1742 = vmatprep.mubr.bf16.mxu0 %v15114_v11 }
 0x111   : > { %9421 = vmatmul.mubr.msk.bf16.gmra.mrb[44].mxu1 %vm508_vm1, %v12231_v12 }
 0x112   : > { %719 = vmatprep.mubr.bf16.mxu1 %v15114_v11 }
 0x117   : > { %9507 = vmatmul.mubr.msk.bf16.gmra.mrb[60].mxu0 %vm508_vm1, %v12156_v10  ;;  %v15202_v10 = vmov 0  }
 0x118   : > { %2270 = vmatprep.mubr.bf16.mxu0 %v15114_v11 }
 0x119   : > { %9422 = vmatmul.mubr.msk.bf16.gmra.mrb[48].mxu1 %vm508_vm1, %v12239_v14 }
 0x11a   : > { %729 = vmatprep.mubr.bf16.mxu1 %v15114_v11 }
 0x11f   : > { %9541 = vmatmul.mubr.msk.bf16.vlgmr.msra.gmra.mrb[0].mxu0 %vm508_vm1, %v12190_v39  ;;  %v12342_v39 = vpop.permute.xlu1 %2807 }
 0x120   : > { %2280 = vmatprep.mubr.bf16.mxu0 %v15114_v11  ;;  %2917 = vmatpush1.bf16.msra.mxu0 %v2908_v6  ;;  %v12326_v6 = vpop.permute.xlu0 %2805  ;;  %15199 = vst [vmem:[#allocation24_spill] sm:$0xff] %v12342_v39 }
 0x121   : > { %9423 = vmatmul.mubr.msk.bf16.gmra.mrb[52].mxu1 %vm508_vm1, %v12245_v19 }
 0x122   : > { %739 = vmatprep.mubr.bf16.mxu1 %v15114_v11 }
 0x124   : > { %v12340_v52 = vpop.permute.xlu0 %2809 }
 0x125   : > { %15198 = vst [vmem:[#allocation23_spill] sm:$0xff] %v12340_v52 }
 0x127   : > { %9542 = vmatmul.mubr.msk.bf16.gmra.mrb[4].mxu0 %vm508_vm1, %v12204_v44  ;;  %v11486_v44 = vld [vmem:[%s15181_s2 + $0x8] sm:$0xff]  }
 0x128   : > { %2290 = vmatprep.mubr.bf16.mxu0 %v15114_v11  ;;  %3481 = vrot.lane.b32.xlu0 %v11486_v44, %s11649_s25  ;;  %v11488_v44 = vld [vmem:[%s15181_s2 + $0x18] sm:$0xff]  }
 0x129   : > { %9424 = vmatmul.mubr.msk.bf16.gmra.mrb[56].mxu1 %vm508_vm1, %v12253_v23 }
 0x12a   : > { %749 = vmatprep.mubr.bf16.mxu1 %v15114_v11 }
 0x12c   : > { %3485 = vrot.lane.b32.xlu0 %v11488_v44, %s11649_s25 }
 0x12f   : > { %9543 = vmatmul.mubr.msk.bf16.gmra.mrb[8].mxu0 %vm508_vm1, %v12211_v62  ;;  %v12345_v62 = vpop.permute.xlu0 %2813 }
 0x130   : > { %2300 = vmatprep.mubr.bf16.mxu0 %v15114_v11  ;;  %15200 = vst [vmem:[#allocation25_spill] sm:$0xff] %v12345_v62  ;;  %v12349_v11 = vpop.permute.xlu1 %2811 }
 0x131   : > { %9425 = vmatmul.mubr.msk.bf16.gmra.mrb[60].mxu1 %vm508_vm1, %v12259_v35  ;;  %15201 = vst [vmem:[#allocation26_spill] sm:$0xff] %v12349_v11 }
 0x132   : > { %10059 = vmatprep.mubr.msk.bf16.mxu1 %vm508_vm1, %v12077_v42  ;;  %v11487_v42 = vld [vmem:[%s15181_s2 + $0x10] sm:$0xff]  }
 0x133   : > { %3483 = vrot.lane.b32.xlu1 %v11487_v42, %s11649_s25  ;;  %v11491_v42 = vld [vmem:[%s15181_s2 + $0x30] sm:$0xff]  }
 0x134   : > { %v12367_v0 = vpop.permute.xlu1 %2815 }
 0x137   : > { %9544 = vmatmul.mubr.msk.bf16.gmra.mrb[12].mxu0 %vm508_vm1, %v12222_v4  ;;  %v12363_v4 = vpop.permute.xlu0 %2817 }
 0x138   : > { %2310 = vmatprep.mubr.bf16.mxu0 %v15202_v10 }
 0x139   : > { %10060 = vmatmul.mubr.msk.bf16.vlgmr.msra.gmra.mrb[64].mxu1 %vm508_vm1, %v12087_v46  ;;  %v11489_v46 = vld [vmem:[%s15181_s2 + $0x20] sm:$0xff]  }
 0x13a   : > { %10063 = vmatprep.mubr.msk.bf16.mxu1 %vm508_vm1, %v12107_v56  ;;  %10564 = vmatpush1.bf16.msra.mxu1 %v11795_v17  ;;  %v12378_v17 = vpop.permute.xlu1 %2819  ;;  %v11490_v56 = vld [vmem:[%s15181_s2 + $0x28] sm:$0xff]  }
 0x13b   : > { %11334 = vmatprep.subr.msk.bf16.mxu1 %vm557_vm0, %v11845_v29  ;;  %v12374_v33 = vpop.permute.xlu0 %2821  ;;  %3487 = vrot.lane.b32.xlu1 %v11489_v46, %s11649_s25  ;;  %v11493_v46 = vld [vmem:[%s15181_s2 + $0x40] sm:$0xff]  }
 0x13c   : > { %3489 = vrot.lane.b32.xlu0 %v11490_v56, %s11649_s25  ;;  %v11494_v56 = vld [vmem:[%s15181_s2 + $0x48] sm:$0xff]  }
 0x13f   : > { %9545 = vmatmul.mubr.msk.bf16.gmra.mrb[16].mxu0 %vm508_vm1, %v12227_v9  ;;  %v12392_v44 = vpop.permute.xlu0 %2825  ;;  %v12394_v9 = vpop.permute.xlu1 %2823  ;;  %3491 = vrot.lane.b32.xlu1 %v11491_v42, %s11649_s25  ;;  %v11495_v42 = vld [vmem:[%s15181_s2 + $0x50] sm:$0xff]  }
 0x140   : > { %2320 = vmatprep.mubr.bf16.mxu0 %v15202_v10 }
 0x141   : > { %10064 = vmatmul.mubr.msk.bf16.gmra.mrb[68].mxu1 %vm508_vm1, %v12115_v16  ;;  %v11492_v16 = vld [vmem:[%s15181_s2 + $0x38] sm:$0xff]  }
 0x142   : > { %10067 = vmatprep.mubr.msk.bf16.mxu1 %vm508_vm1, %v12133_v2  ;;  %3493 = vrot.lane.b32.xlu0 %v11492_v16, %s11649_s25 }
 0x143   : > { %v12404_v31 = vpop.permute.xlu0 %2829  ;;  %v12408_v2 = vpop.permute.xlu1 %2827  ;;  %3495 = vrot.lane.b32.xlu1 %v11493_v46, %s11649_s25  ;;  %v11497_v46 = vld [vmem:[%s15181_s2 + $0x60] sm:$0xff]  }
 0x146   : > { %3497 = vrot.lane.b32.xlu0 %v11494_v56, %s11649_s25 }
 0x147   : > { %9546 = vmatmul.mubr.msk.bf16.gmra.mrb[20].mxu0 %vm508_vm1, %v12236_v13  ;;  %v12423_v13 = vpop.permute.xlu0 %3528  ;;  %v12425_v16 = vpop.permute.xlu1 %2831  ;;  %3499 = vrot.lane.b32.xlu1 %v11495_v42, %s11649_s25 }
 0x148   : > { %2330 = vmatprep.mubr.bf16.mxu0 %v15202_v10 }
 0x149   : > { %10068 = vmatmul.mubr.msk.bf16.gmra.mrb[72].mxu1 %vm508_vm1, %v12144_v7  ;;  %v11496_v7 = vld [vmem:[%s15181_s2 + $0x58] sm:$0xff]  }
 0x14a   : > { %10071 = vmatprep.mubr.msk.bf16.mxu1 %vm508_vm1, %v12186_v37  ;;  %3501 = vrot.lane.b32.xlu0 %v11496_v7, %s11649_s25  ;;  %v11499_v7 = vld [vmem:[%s15181_s2 + $0x70] sm:$0xff]  }
 0x14b   : > { %v12437_v37 = vpop.permute.xlu1 %3530  ;;  %v12441_v56 = vpop.permute.xlu0 %3532  ;;  %3503 = vrot.lane.b32.xlu1 %v11497_v46, %s11649_s25  ;;  %v4044_v46 = vld [vmem:[%s11775_s21] sm:$0x3f] }
 0x14c   : > { %15203 = vst [vmem:[#allocation27_spill] sm:$0xff] %v12441_v56  ;;  %v3536_v42 = vsel %vm3534_vm6, %v12437_v37, %v12441_v56  ;;  %v4197_v56 = vrot.slane %v4044_v46, %v11770_v5 }
 0x14d   : > { %9638 = vmatprep.subr.msk.bf16.mxu0 %vm557_vm0, %v3536_v42 }
 0x14f   : > { %9547 = vmatmul.mubr.msk.bf16.gmra.mrb[24].mxu0 %vm508_vm1, %v12241_v15  ;;  %v11498_v15 = vld [vmem:[%s15181_s2 + $0x68] sm:$0xff]   ;;  %3507 = vrot.lane.b32.xlu1 %v11499_v7, %s11649_s25 }
 0x150   : > { %2340 = vmatprep.mubr.bf16.mxu0 %v15202_v10  ;;  %3505 = vrot.lane.b32.xlu0 %v11498_v15, %s11649_s25  ;;  %v4190_v15 = vcombine.high %v4044_v46, %v4044_v46 }
 0x151   : > { %10072 = vmatmul.mubr.msk.bf16.gmra.mrb[76].mxu1 %vm508_vm1, %v12198_v41  ;;  %v11500_v41 = vld [vmem:[%s15181_s2 + $0x78] sm:$0xff]  }
 0x152   : > { %10075 = vmatprep.mubr.msk.bf16.mxu1 %vm508_vm1, %v12208_v54  ;;  %v4205_v54 = vcombine.high %v4197_v56, %v4197_v56  ;;  %v4204_v42 = vrot.slane %v4190_v15, %v11770_v5  ;;  %v3535_v15 = vsel %vm3534_vm6, %v12423_v13, %v12437_v37  ;;  %v11502_v13 = vld [vmem:[%s15181_s2] sm:$0xff]  }
 0x153   : > { %4206 = vrot.lane.b32.xlu1 %v4197_v56, %s15166_s20  ;;  %v12548_v56 = vld [vmem:[%s15181_s2 + $0x28] sm:$0xff]  }
 0x154   : > { %3509 = vrot.lane.b32.xlu0 %v11500_v41, %s11649_s25  ;;  %s15156_s25 = smov 76  }
 0x157   : > { %9548 = vmatmul.mubr.msk.bf16.gmra.mrb[28].mxu0 %vm508_vm1, %v12250_v21  ;;  %4210 = vrot.lane.b32.xlu1 %v4204_v42, %s15166_s20  ;;  %v3586_v42 = vsel %vm557_vm0, %v3535_v15, 0  ;;  %v11503_v15 = vld [vmem:[%s15181_s2 + $0x8] sm:$0xff]  }
 0x158   : > { %2350 = vmatprep.mubr.bf16.mxu0 %v15202_v10  ;;  %4208 = vrot.lane.b32.xlu0 %v4205_v54, %s15166_s20 }
 0x159   : > { %10076 = vmatmul.mubr.msk.bf16.gmra.mrb[80].mxu1 %vm508_vm1, %v12217_v1  ;;  %v976_v1 = vsel %vm557_vm0, %v11845_v29, 0  ;;  %v12518_v29 = vld [vmem:[%s15181_s2 + $0x18] sm:$0xff]  }
 0x15a   : > { %10079 = vmatprep.mubr.msk.bf16.mxu1 %vm508_vm1, %v12225_v8  ;;  %v12505_v8 = vld [vmem:[%s15181_s2 + $0x10] sm:$0xff]  }
 0x15b   : > { %4159 = vrot.lane.b32.xlu1 %v11503_v15, %s11651_s22  ;;  %v11504_v15 = vld [vmem:[%s15181_s2 + $0x10] sm:$0xff]  }
 0x15c   : > { %4157 = vrot.lane.b32.xlu0 %v11502_v13, %s11651_s22 }
 0x15f   : > { %9549 = vmatmul.mubr.msk.bf16.gmra.mrb[32].mxu0 %vm508_vm1, %v12255_v32 }
 0x160   : > { %2360 = vmatprep.mubr.bf16.mxu0 %v15202_v10  ;;  %4161 = vrot.lane.b32.xlu0 %v11504_v15, %s11651_s22 }
 0x161   : > { %10080 = vmatmul.mubr.msk.bf16.gmra.mrb[84].mxu1 %vm508_vm1, %v12231_v12  ;;  %v12529_v12 = vld [vmem:[%s15181_s2 + $0x20] sm:$0xff]  }
 0x162   : > { %10083 = vmatprep.mubr.msk.bf16.mxu1 %vm508_vm1, %v12239_v14 }
 0x167   : > { %9550 = vmatmul.mubr.msk.bf16.gmra.mrb[36].mxu0 %vm508_vm1, %v12264_v36 }
 0x168   : > { %2370 = vmatprep.mubr.bf16.mxu0 %v15202_v10 }
 0x169   : > { %10084 = vmatmul.mubr.msk.bf16.gmra.mrb[88].mxu1 %vm508_vm1, %v12245_v19 }
 0x16a   : > { %10087 = vmatprep.mubr.msk.bf16.mxu1 %vm508_vm1, %v12253_v23 }
 0x16f   : > { %9551 = vmatmul.mubr.msk.bf16.gmra.mrb[40].mxu0 %vm508_vm1, %v12267_v38 }
 0x170   : > { %2380 = vmatprep.mubr.bf16.mxu0 %v15202_v10 }
 0x171   : > { %10088 = vmatmul.mubr.msk.bf16.gmra.mrb[92].mxu1 %vm508_vm1, %v12259_v35 }
 0x172   : > { %1030 = vmatprep.mubr.bf16.mxu1 %v15202_v10 }
 0x177   : > { %9552 = vmatmul.mubr.msk.bf16.gmra.mrb[44].mxu0 %vm508_vm1, %v12269_v40 }
 0x178   : > { %2390 = vmatprep.mubr.bf16.mxu0 %v15202_v10 }
 0x179   : > { %9445 = vmatmul.mubr.msk.bf16.vlgmr.msra.gmra.mrb[8].mxu1 %vm508_vm1, %v12505_v8 }
 0x17a   : > { %10092 = vmatpush3.bf16.msra.mxu1 %v976_v1  ;;  %1040 = vmatprep.mubr.bf16.mxu1 %v15202_v10 }
 0x17b   : > { %11335 = vmatprep.subr.msk.bf16.mxu1 %vm557_vm0, %v12034_v18 }
 0x17f   : > { %9553 = vmatmul.mubr.msk.bf16.gmra.mrb[48].mxu0 %vm508_vm1, %v12273_v48 }
 0x180   : > { %2400 = vmatprep.mubr.bf16.mxu0 %v15202_v10 }
 0x181   : > { %9446 = vmatmul.mubr.msk.bf16.gmra.mrb[12].mxu1 %vm508_vm1, %v12518_v29 }
 0x182   : > { %1050 = vmatprep.mubr.bf16.mxu1 %v15202_v10 }
 0x187   : > { %9554 = vmatmul.mubr.msk.bf16.gmra.mrb[52].mxu0 %vm508_vm1, %v12278_v50 }
 0x188   : > { %2410 = vmatprep.mubr.bf16.mxu0 %v15202_v10 }
 0x189   : > { %9447 = vmatmul.mubr.msk.bf16.gmra.mrb[16].mxu1 %vm508_vm1, %v12529_v12 }
 0x18a   : > { %1060 = vmatprep.mubr.bf16.mxu1 %v15202_v10 }
 0x18c   : > { %v12534_v14 = vpop.f32.mrb[0].mxu1 }
 0x18d   : > { %15204 = vst [vmem:[#allocation28_spill] sm:$0xff] %v12534_v14  ;;  %v12536_v19 = vpop.f32.mrb[1].mxu1 }
 0x18e   : > { %15205 = vst [vmem:[#allocation29_spill] sm:$0xff] %v12536_v19  ;;  %v12538_v23 = vpop.f32.mrb[2].mxu1  ;;  %v11510_v19 = vld [vmem:[%s15181_s2 + $0x38] sm:$0xff]  }
 0x18f   : > { %15206 = vst [vmem:[#allocation30_spill] sm:$0xff] %v12538_v23  ;;  %v12540_v35 = vpop.f32.mrb[3].mxu1  ;;  %9555 = vmatmul.mubr.msk.bf16.gmra.mrb[56].mxu0 %vm508_vm1, %v12281_v60  ;;  %v11508_v23 = vld [vmem:[%s15181_s2 + $0x28] sm:$0xff]  }
 0x190   : > { %15207 = vst [vmem:[#allocation31_spill] sm:$0xff] %v12540_v35  ;;  %2420 = vmatprep.mubr.bf16.mxu0 %v15202_v10 }
 0x191   : > { %9448 = vmatmul.mubr.msk.bf16.gmra.mrb[20].mxu1 %vm508_vm1, %v12548_v56 }
 0x192   : > { %1070 = vmatprep.mubr.bf16.mxu1 %v15202_v10 }
 0x194   : > { %v12553_v7 = vpop.f32.mrb[4].mxu1 }
 0x195   : > { %15208 = vst [vmem:[#allocation32_spill] sm:$0xff] %v12553_v7  ;;  %v12555_v46 = vpop.f32.mrb[5].mxu1 }
 0x196   : > { %15209 = vst [vmem:[#allocation33_spill] sm:$0xff] %v12555_v46  ;;  %v12557_v41 = vpop.f32.mrb[6].mxu1 }
 0x197   : > { %15210 = vst [vmem:[#allocation34_spill] sm:$0xff] %v12557_v41  ;;  %v12559_v54 = vpop.f32.mrb[7].mxu1  ;;  %9556 = vmatmul.mubr.msk.bf16.gmra.mrb[60].mxu0 %vm508_vm1, %v12283_v3  ;;  %v11506_v41 = vld [vmem:[%s15181_s2 + $0x18] sm:$0xff]  }
 0x198   : > { %15211 = vst [vmem:[#allocation35_spill] sm:$0xff] %v12559_v54  ;;  %2948 = vmatprep.mubr.bf16.mxu0 %v15202_v10  ;;  %4163 = vrot.lane.b32.xlu1 %v11506_v41, %s11651_s22  ;;  %v11507_v41 = vld [vmem:[%s15181_s2 + $0x30] sm:$0xff]  }
 0x199   : > { %9449 = vmatmul.mubr.msk.bf16.gmra.mrb[24].mxu1 %vm508_vm1, %v11898_v45  ;;  %v12583_v45 = vpop.permute.xlu1 %3479 }
 0x19a   : > { %1080 = vmatprep.mubr.bf16.mxu1 %v15202_v10  ;;  %v12588_v37 = vpop.permute.xlu0 %3481 }
 0x19c   : > { %4167 = vrot.lane.b32.xlu1 %v11508_v23, %s11651_s22 }
 0x19f   : > { %9590 = vmatmul.mubr.msk.bf16.vlgmr.msra.gmra.mrb[0].mxu0 %vm508_vm1, %v12323_v58 }
 0x1a0   : > { %2958 = vmatprep.mubr.bf16.mxu0 %v15202_v10  ;;  %3595 = vmatpush1.bf16.msra.mxu0 %v3586_v42 }
 0x1a1   : > { %9450 = vmatmul.mubr.msk.bf16.gmra.mrb[28].mxu1 %vm508_vm1, %v11908_v47  ;;  %4171 = vrot.lane.b32.xlu1 %v11510_v19, %s11651_s22  ;;  %v11513_v19 = vld [vmem:[%s15181_s2 + $0x60] sm:$0xff]  }
 0x1a2   : > { %1090 = vmatprep.mubr.bf16.mxu1 %v15202_v10 }
 0x1a5   : > { %v12591_v47 = vpop.permute.xlu1 %3483 }
 0x1a7   : > { %9591 = vmatmul.mubr.msk.bf16.gmra.mrb[4].mxu0 %vm508_vm1, %v12330_v34 }
 0x1a8   : > { %2968 = vmatprep.mubr.bf16.mxu0 %v15202_v10 }
 0x1a9   : > { %9451 = vmatmul.mubr.msk.bf16.gmra.mrb[32].mxu1 %vm508_vm1, %v11918_v49  ;;  %v12598_v49 = vpop.permute.xlu0 %3485 }
 0x1aa   : > { %1100 = vmatprep.mubr.bf16.mxu1 %v15202_v10 }
 0x1ad   : > { %v12601_v1 = vpop.permute.xlu1 %3487 }
 0x1ae   : > { %v12607_v42 = vpop.permute.xlu0 %3489 }
 0x1af   : > { %9592 = vmatmul.mubr.msk.bf16.gmra.mrb[8].mxu0 %vm508_vm1, %v12326_v6  ;;  %15212 = vst [vmem:[#allocation36_spill] sm:$0xff] %v12607_v42 }
 0x1b0   : > { %2978 = vmatprep.mubr.bf16.mxu0 %v15202_v10 }
 0x1b1   : > { %9452 = vmatmul.mubr.msk.bf16.gmra.mrb[36].mxu1 %vm508_vm1, %v11929_v51  ;;  %v12609_v13 = vpop.permute.xlu1 %3491 }
 0x1b2   : > { %1110 = vmatprep.mubr.bf16.mxu1 %v15202_v10  ;;  %15213 = vst [vmem:[#allocation37_spill] sm:$0xff] %v12609_v13 }
 0x1b4   : > { %v12616_v51 = vpop.permute.xlu0 %3493 }
 0x1b5   : > { %15214 = vst [vmem:[#allocation38_spill] sm:$0xff] %v12616_v51  ;;  %v12619_v54 = vpop.permute.xlu1 %3495 }
 0x1b7   : > { %9593 = vmatmul.mubr.msk.bf16.gmra.mrb[12].mxu0 %vm508_vm1, %v12342_v39 }
 0x1b8   : > { %2988 = vmatprep.mubr.bf16.mxu0 %v15202_v10  ;;  %v12632_v46 = vpop.permute.xlu0 %3497 }
 0x1b9   : > { %9453 = vmatmul.mubr.msk.bf16.gmra.mrb[40].mxu1 %vm508_vm1, %v11940_v53  ;;  %v11505_v53 = vld [vmem:[%s15181_s2 + $0x20] sm:$0xff]   ;;  %v12634_v7 = vpop.permute.xlu1 %3499 }
 0x1ba   : > { %1120 = vmatprep.mubr.bf16.mxu1 %v15202_v10  ;;  %4165 = vrot.lane.b32.xlu0 %v11505_v53, %s11651_s22 }
 0x1bc   : > { %v12642_v15 = vpop.permute.xlu0 %3501 }
 0x1bd   : > { %v12645_v35 = vpop.permute.xlu1 %3503 }
 0x1be   : > { %4169 = vrot.lane.b32.xlu0 %v11507_v41, %s11651_s22 }
 0x1bf   : > { %9594 = vmatmul.mubr.msk.bf16.gmra.mrb[16].mxu0 %vm508_vm1, %v12340_v52  ;;  %v11511_v52 = vld [vmem:[%s15181_s2 + $0x50] sm:$0xff]  }
 0x1c0   : > { %2998 = vmatprep.mubr.bf16.mxu0 %v15202_v10 }
 0x1c1   : > { %9454 = vmatmul.mubr.msk.bf16.gmra.mrb[44].mxu1 %vm508_vm1, %v11951_v55  ;;  %v11509_v55 = vld [vmem:[%s15181_s2 + $0x40] sm:$0xff]   ;;  %v12663_v14 = vpop.permute.xlu1 %3507 }
 0x1c2   : > { %1130 = vmatprep.mubr.bf16.mxu1 %v15202_v10  ;;  %v12658_v53 = vpop.permute.xlu0 %3505  ;;  %4173 = vrot.lane.b32.xlu0 %v11509_v55, %s11651_s22  ;;  %v11514_v55 = vld [vmem:[%s15181_s2 + $0x58] sm:$0xff]  }
 0x1c5   : > { %v12675_v41 = vpop.permute.xlu1 %4206 }
 0x1c6   : > { %v12672_v23 = vpop.permute.xlu0 %3509  ;;  %4177 = vrot.lane.b32.xlu0 %v11511_v52, %s11651_s22  ;;  %v11515_v52 = vld [vmem:[%s15181_s2 + $0x70] sm:$0xff]  }
 0x1c7   : > { %9595 = vmatmul.mubr.msk.bf16.gmra.mrb[20].mxu0 %vm508_vm1, %v12349_v11  ;;  %v11512_v11 = vld [vmem:[%s15181_s2 + $0x48] sm:$0xff]  }
 0x1c8   : > { %3008 = vmatprep.mubr.bf16.mxu0 %v15202_v10  ;;  %4175 = vrot.lane.b32.xlu1 %v11512_v11, %s11651_s22 }
 0x1c9   : > { %9455 = vmatmul.mubr.msk.bf16.gmra.mrb[48].mxu1 %vm508_vm1, %v11962_v57  ;;  %v12695_v39 = vpop.permute.xlu1 %4210 }
 0x1ca   : > { %1140 = vmatprep.mubr.bf16.mxu1 %v15202_v10  ;;  %v12685_v57 = vpop.permute.xlu0 %4208  ;;  %4181 = vrot.lane.b32.xlu0 %v11513_v19, %s11651_s22  ;;  %v11516_v19 = vld [vmem:[%s15181_s2 + $0x68] sm:$0xff]  }
 0x1cb   : > { %v4214_v11 = vsel %vm4212_vm7, %v12685_v57, %v12695_v39 }
 0x1cc   : > { %4179 = vrot.lane.b32.xlu1 %v11514_v55, %s11651_s22  ;;  %9687 = vmatprep.subr.msk.bf16.mxu0 %vm557_vm0, %v4214_v11 }
 0x1ce   : > { %4185 = vrot.lane.b32.xlu0 %v11515_v52, %s11651_s22 }
 0x1cf   : > { %9596 = vmatmul.mubr.msk.bf16.gmra.mrb[24].mxu0 %vm508_vm1, %v12345_v62  ;;  %v4722_v62 = vld [vmem:[%s11775_s21] sm:$0x3f] }
 0x1d0   : > { %3018 = vmatprep.mubr.bf16.mxu0 %v15202_v10  ;;  %4183 = vrot.lane.b32.xlu1 %v11516_v19, %s11651_s22  ;;  %v4875_v55 = vrot.slane %v4722_v62, %v11770_v5  ;;  %v4868_v11 = vcombine.high %v4722_v62, %v4722_v62  ;;  %v11563_v62 = vld [vmem:[%s15181_s2 + $0x8] sm:$0xff]  }
 0x1d1   : > { %9456 = vmatmul.mubr.msk.bf16.gmra.mrb[52].mxu1 %vm508_vm1, %v11973_v59  ;;  %v11517_v59 = vld [vmem:[%s15181_s2 + $0x78] sm:$0xff]  }
 0x1d2   : > { %1150 = vmatprep.mubr.bf16.mxu1 %v15202_v10  ;;  %4884 = vrot.lane.b32.xlu0 %v4875_v55, %s11652_s10  ;;  %v4883_v52 = vcombine.high %v4875_v55, %v4875_v55  ;;  %v4882_v19 = vrot.slane %v4868_v11, %v11770_v5  ;;  %v11569_v55 = vld [vmem:[%s15181_s2 + $0x58] sm:$0xff]   ;;  %v11570_v11 = vld [vmem:[%s15181_s2 + $0x60] sm:$0xff]  }
 0x1d4   : > { %4187 = vrot.lane.b32.xlu1 %v11517_v59, %s11651_s22  ;;  %v1558_v59 = vsel %vm557_vm0, %v12034_v18, 0  ;;  %v11564_v18 = vld [vmem:[%s15181_s2 + $0x30] sm:$0xff]  }
 0x1d6   : > { %4888 = vrot.lane.b32.xlu0 %v4882_v19, %s11652_s10  ;;  %v11572_v19 = vld [vmem:[%s15181_s2 + $0x70] sm:$0xff]  }
 0x1d7   : > { %9597 = vmatmul.mubr.msk.bf16.gmra.mrb[28].mxu0 %vm508_vm1, %v12367_v0 }
 0x1d8   : > { %3028 = vmatprep.mubr.bf16.mxu0 %v15202_v10  ;;  %4886 = vrot.lane.b32.xlu1 %v4883_v52, %s11652_s10  ;;  %v11571_v52 = vld [vmem:[%s15181_s2 + $0x68] sm:$0xff]   ;;  %s15146_s10 = smov 94  }
 0x1d9   : > { %9457 = vmatmul.mubr.msk.bf16.gmra.mrb[56].mxu1 %vm508_vm1, %v11984_v61  ;;  %v11562_v61 = vld [vmem:[%s15181_s2] sm:$0xff]  }
 0x1da   : > { %1160 = vmatprep.mubr.bf16.mxu1 %v15202_v10 }
 0x1df   : > { %9598 = vmatmul.mubr.msk.bf16.gmra.mrb[32].mxu0 %vm508_vm1, %v12363_v4 }
 0x1e0   : > { %3038 = vmatprep.mubr.bf16.mxu0 %v15202_v10 }
 0x1e1   : > { %9458 = vmatmul.mubr.msk.bf16.gmra.mrb[60].mxu1 %vm508_vm1, %v11995_v63 }
 0x1e2   : > { %10093 = vmatprep.mubr.msk.bf16.mxu1 %vm508_vm1, %v11562_v61  ;;  %v4213_v61 = vsel %vm4212_vm7, %v12675_v41, %v12685_v57  ;;  %v2236_v41 = vsel %vm557_vm0, %v12170_v20, 0  ;;  %v12830_v57 = vpop.permute.xlu0 %4157 }
 0x1e7   : > { %9599 = vmatmul.mubr.msk.bf16.gmra.mrb[36].mxu0 %vm508_vm1, %v12378_v17 }
 0x1e8   : > { %3048 = vmatprep.mubr.bf16.mxu0 %v15202_v10 }
 0x1e9   : > { %10094 = vmatmul.mubr.msk.bf16.vlgmr.msra.gmra.mrb[64].mxu1 %vm508_vm1, %v11563_v62  ;;  %v4264_v62 = vsel %vm557_vm0, %v4213_v61, 0  ;;  %v11525_v61 = vld [vmem:[%s15181_s2 + $0x30] sm:$0xff]  }
 0x1ea   : > { %10126 = vmatpush3.bf16.msra.mxu1 %v1558_v59  ;;  %10097 = vmatprep.mubr.msk.bf16.mxu1 %vm508_vm1, %v12505_v8  ;;  %v11565_v8 = vld [vmem:[%s15181_s2 + $0x38] sm:$0xff]  }
 0x1eb   : > { %11336 = vmatprep.subr.msk.bf16.mxu1 %vm557_vm0, %v12170_v20  ;;  %v11520_v20 = vld [vmem:[%s15181_s2 + $0x8] sm:$0xff]  }
 0x1ec   : > { %4837 = vrot.lane.b32.xlu0 %v11520_v20, %s11653_s18 }
 0x1ef   : > { %9600 = vmatmul.mubr.msk.bf16.gmra.mrb[40].mxu0 %vm508_vm1, %v12374_v33 }
 0x1f0   : > { %3058 = vmatprep.mubr.bf16.mxu0 %v15202_v10 }
 0x1f1   : > { %10098 = vmatmul.mubr.msk.bf16.gmra.mrb[68].mxu1 %vm508_vm1, %v12518_v29  ;;  %v11566_v29 = vld [vmem:[%s15181_s2 + $0x40] sm:$0xff]  }
 0x1f2   : > { %10101 = vmatprep.mubr.msk.bf16.mxu1 %vm508_vm1, %v12529_v12  ;;  %v11567_v12 = vld [vmem:[%s15181_s2 + $0x48] sm:$0xff]  }
 0x1f7   : > { %9601 = vmatmul.mubr.msk.bf16.gmra.mrb[44].mxu0 %vm508_vm1, %v12394_v9 }
 0x1f8   : > { %3068 = vmatprep.mubr.bf16.mxu0 %v15202_v10 }
 0x1f9   : > { %10102 = vmatmul.mubr.msk.bf16.gmra.mrb[72].mxu1 %vm508_vm1, %v12548_v56  ;;  %v11568_v56 = vld [vmem:[%s15181_s2 + $0x50] sm:$0xff]  }
 0x1fa   : > { %10105 = vmatprep.mubr.msk.bf16.mxu1 %vm508_vm1, %v11564_v18 }
 0x1ff   : > { %9602 = vmatmul.mubr.msk.bf16.gmra.mrb[48].mxu0 %vm508_vm1, %v12392_v44 }
 0x200   : > { %3078 = vmatprep.mubr.bf16.mxu0 %v15202_v10 }
 0x201   : > { %10106 = vmatmul.mubr.msk.bf16.gmra.mrb[76].mxu1 %vm508_vm1, %v11565_v8  ;;  %v11521_v8 = vld [vmem:[%s15181_s2 + $0x10] sm:$0xff]  }
 0x202   : > { %10109 = vmatprep.mubr.msk.bf16.mxu1 %vm508_vm1, %v11566_v29  ;;  %v11522_v29 = vld [vmem:[%s15181_s2 + $0x18] sm:$0xff]  }
 0x203   : > { %4841 = vrot.lane.b32.xlu0 %v11522_v29, %s11653_s18  ;;  %v15220_v29 = vld [vmem:[#allocation9_spill] sm:$0xff] }
 0x207   : > { %9603 = vmatmul.mubr.msk.bf16.gmra.mrb[52].mxu0 %vm508_vm1, %v12408_v2 }
 0x208   : > { %3088 = vmatprep.mubr.bf16.mxu0 %v15202_v10 }
 0x209   : > { %10110 = vmatmul.mubr.msk.bf16.gmra.mrb[80].mxu1 %vm508_vm1, %v11567_v12 }
 0x20a   : > { %10113 = vmatprep.mubr.msk.bf16.mxu1 %vm508_vm1, %v11568_v56 }
 0x20f   : > { %9604 = vmatmul.mubr.msk.bf16.gmra.mrb[56].mxu0 %vm508_vm1, %v12404_v31 }
 0x210   : > { %3098 = vmatprep.mubr.bf16.mxu0 %v15202_v10 }
 0x211   : > { %10114 = vmatmul.mubr.msk.bf16.gmra.mrb[84].mxu1 %vm508_vm1, %v11569_v55  ;;  %v15215_v55 = vld [vmem:[#allocation7_spill] sm:$0xff] }
 0x212   : > { %10117 = vmatprep.mubr.msk.bf16.mxu1 %vm508_vm1, %v11570_v11  ;;  %v15216_v11 = vld [vmem:[#allocation8_spill] sm:$0xff] }
 0x217   : > { %9605 = vmatmul.mubr.msk.bf16.gmra.mrb[60].mxu0 %vm508_vm1, %v12425_v16 }
 0x218   : > { %3626 = vmatprep.mubr.bf16.mxu0 %v15202_v10 }
 0x219   : > { %10118 = vmatmul.mubr.msk.bf16.gmra.mrb[88].mxu1 %vm508_vm1, %v11571_v52 }
 0x21a   : > { %10121 = vmatprep.mubr.msk.bf16.mxu1 %vm508_vm1, %v11572_v19  ;;  %v11524_v19 = vld [vmem:[%s15181_s2 + $0x28] sm:$0xff]  }
 0x21b   : > { %4845 = vrot.lane.b32.xlu0 %v11524_v19, %s11653_s18 }
 0x21f   : > { %9639 = vmatmul.mubr.msk.bf16.vlgmr.msra.gmra.mrb[0].mxu0 %vm508_vm1, %v12583_v45 }
 0x220   : > { %3636 = vmatprep.mubr.bf16.mxu0 %v15202_v10  ;;  %4273 = vmatpush1.bf16.msra.mxu0 %v4264_v62 }
 0x221   : > { %10122 = vmatmul.mubr.msk.bf16.gmra.mrb[92].mxu1 %vm508_vm1, %v11995_v63  ;;  %v11519_v63 = vld [vmem:[%s15181_s2] sm:$0xff]  }
 0x222   : > { %10127 = vmatprep.mubr.msk.bf16.mxu1 %vm508_vm1, %v12037_v22  ;;  %4835 = vrot.lane.b32.xlu1 %v11519_v63, %s11653_s18  ;;  %v12838_v22 = vpop.permute.xlu0 %4161  ;;  %v11527_v63 = vld [vmem:[%s15181_s2 + $0x40] sm:$0xff]  }
 0x226   : > { %4839 = vrot.lane.b32.xlu1 %v11521_v8, %s11653_s18 }
 0x227   : > { %9640 = vmatmul.mubr.msk.bf16.gmra.mrb[4].mxu0 %vm508_vm1, %v12588_v37 }
 0x228   : > { %3646 = vmatprep.mubr.bf16.mxu0 %v15202_v10 }
 0x229   : > { %10128 = vmatmul.mubr.msk.bf16.vlgmr.msra.gmra.mrb[64].mxu1 %vm508_vm1, %v12041_v24  ;;  %v12843_v24 = vpop.permute.xlu1 %4159 }
 0x22a   : > { %10160 = vmatpush3.bf16.msra.mxu1 %v2236_v41  ;;  %10131 = vmatprep.mubr.msk.bf16.mxu1 %vm508_vm1, %v12043_v25  ;;  %v11526_v41 = vld [vmem:[%s15181_s2 + $0x38] sm:$0xff]  }
 0x22b   : > { %11337 = vmatprep.subr.msk.bf16.mxu1 %vm557_vm0, %v12291_v43  ;;  %4849 = vrot.lane.b32.xlu0 %v11526_v41, %s11653_s18 }
 0x22c   : > { %v12849_v25 = vpop.permute.xlu0 %4165 }
 0x22d   : > { %v12854_v59 = vpop.permute.xlu1 %4163 }
 0x22f   : > { %9641 = vmatmul.mubr.msk.bf16.gmra.mrb[8].mxu0 %vm508_vm1, %v12591_v47 }
 0x230   : > { %3656 = vmatprep.mubr.bf16.mxu0 %v15202_v10  ;;  %v12857_v18 = vpop.permute.xlu0 %4169 }
 0x231   : > { %10132 = vmatmul.mubr.msk.bf16.gmra.mrb[68].mxu1 %vm508_vm1, %v12048_v26  ;;  %v12862_v26 = vpop.permute.xlu1 %4167 }
 0x232   : > { %10135 = vmatprep.mubr.msk.bf16.mxu1 %vm508_vm1, %v12050_v27 }
 0x234   : > { %v12868_v27 = vpop.permute.xlu0 %4173 }
 0x235   : > { %v12876_v12 = vpop.permute.xlu1 %4171 }
 0x237   : > { %9642 = vmatmul.mubr.msk.bf16.gmra.mrb[12].mxu0 %vm508_vm1, %v12598_v49 }
 0x238   : > { %3666 = vmatprep.mubr.bf16.mxu0 %v15202_v10 }
 0x239   : > { %10136 = vmatmul.mubr.msk.bf16.gmra.mrb[72].mxu1 %vm508_vm1, %v12052_v28  ;;  %v11523_v28 = vld [vmem:[%s15181_s2 + $0x20] sm:$0xff]  }
 0x23a   : > { %10139 = vmatprep.mubr.msk.bf16.mxu1 %vm508_vm1, %v12054_v30  ;;  %v12883_v30 = vpop.permute.xlu0 %4177  ;;  %v12888_v56 = vpop.permute.xlu1 %4175  ;;  %4843 = vrot.lane.b32.xlu1 %v11523_v28, %s11653_s18  ;;  %v15221_v28 = vld [vmem:[#allocation10_spill] sm:$0xff] }
 0x23e   : > { %v12895_v52 = vpop.permute.xlu0 %4181  ;;  %v12903_v62 = vpop.permute.xlu1 %4179  ;;  %4847 = vrot.lane.b32.xlu1 %v11525_v61, %s11653_s18 }
 0x23f   : > { %9643 = vmatmul.mubr.msk.bf16.gmra.mrb[16].mxu0 %vm508_vm1, %v12601_v1  ;;  %15217 = vst [vmem:[#allocation7_spill] sm:$0xff] %v12895_v52 }
 0x240   : > { %3676 = vmatprep.mubr.bf16.mxu0 %v15202_v10 }
 0x241   : > { %10140 = vmatmul.mubr.msk.bf16.gmra.mrb[76].mxu1 %vm508_vm1, %v15215_v55  ;;  %v11528_v55 = vld [vmem:[%s15181_s2 + $0x48] sm:$0xff]  }
 0x242   : > { %10143 = vmatprep.mubr.msk.bf16.mxu1 %vm508_vm1, %v15216_v11  ;;  %v12913_v20 = vpop.permute.xlu0 %4185  ;;  %v12918_v8 = vpop.permute.xlu1 %4183  ;;  %4851 = vrot.lane.b32.xlu1 %v11527_v63, %s11653_s18  ;;  %v11529_v11 = vld [vmem:[%s15181_s2 + $0x50] sm:$0xff]   ;;  %v11530_v63 = vld [vmem:[%s15181_s2 + $0x58] sm:$0xff]  }
 0x243   : > { %15218 = vst [vmem:[#allocation8_spill] sm:$0xff] %v12913_v20  ;;  %15219 = vst [vmem:[#allocation39_spill] sm:$0xff] %v12918_v8  ;;  %4853 = vrot.lane.b32.xlu0 %v11528_v55, %s11653_s18 }
 0x246   : > { %v12932_v19 = vpop.permute.xlu0 %4884  ;;  %v12936_v41 = vpop.permute.xlu1 %4187  ;;  %4855 = vrot.lane.b32.xlu1 %v11529_v11, %s11653_s18  ;;  %v15227_v11 = vld [vmem:[#allocation11_spill] sm:$0xff] }
 0x247   : > { %9644 = vmatmul.mubr.msk.bf16.gmra.mrb[20].mxu0 %vm508_vm1, %v12607_v42  ;;  %15223 = vst [vmem:[#allocation10_spill] sm:$0xff] %v12936_v41  ;;  %4857 = vrot.lane.b32.xlu0 %v11530_v63, %s11653_s18  ;;  %v11532_v41 = vld [vmem:[%s15181_s2 + $0x68] sm:$0xff]   ;;  %v11533_v63 = vld [vmem:[%s15181_s2 + $0x70] sm:$0xff]  }
 0x248   : > { %3686 = vmatprep.mubr.bf16.mxu0 %v15202_v10 }
 0x249   : > { %10144 = vmatmul.mubr.msk.bf16.gmra.mrb[80].mxu1 %vm508_vm1, %v15220_v29 }
 0x24a   : > { %10147 = vmatprep.mubr.msk.bf16.mxu1 %vm508_vm1, %v15221_v28  ;;  %v11531_v28 = vld [vmem:[%s15181_s2 + $0x60] sm:$0xff]   ;;  %v12955_v55 = vpop.permute.xlu0 %4888 }
 0x24b   : > { %4859 = vrot.lane.b32.xlu1 %v11531_v28, %s11653_s18  ;;  %4861 = vrot.lane.b32.xlu0 %v11532_v41, %s11653_s18  ;;  %v11534_v28 = vld [vmem:[%s15181_s2 + $0x78] sm:$0xff]  }
 0x24c   : > { %v12934_v61 = vpop.f32.mrb[8].mxu1  ;;  %v15233_v41 = vld [vmem:[#allocation13_spill] sm:$0xff] }
 0x24d   : > { %15222 = vst [vmem:[#allocation9_spill] sm:$0xff] %v12934_v61  ;;  %v12942_v29 = vpop.f32.mrb[9].mxu1 }
 0x24e   : > { %15224 = vst [vmem:[#allocation40_spill] sm:$0xff] %v12942_v29  ;;  %v12948_v20 = vpop.f32.mrb[10].mxu1  ;;  %v12957_v29 = vpop.permute.xlu1 %4886 }
 0x24f   : > { %15225 = vst [vmem:[#allocation41_spill] sm:$0xff] %v12948_v20  ;;  %v12950_v61 = vpop.f32.mrb[11].mxu1  ;;  %9645 = vmatmul.mubr.msk.bf16.gmra.mrb[24].mxu0 %vm508_vm1, %v12609_v13  ;;  %v15228_v20 = vld [vmem:[#allocation12_spill] sm:$0xff]  ;;  %4863 = vrot.lane.b32.xlu1 %v11533_v63, %s11653_s18 }
 0x250   : > { %15226 = vst [vmem:[#allocation42_spill] sm:$0xff] %v12950_v61  ;;  %3696 = vmatprep.mubr.bf16.mxu0 %v15202_v10  ;;  %v4892_v61 = vsel %vm4890_vm8, %v12957_v29, %v12955_v55  ;;  %4865 = vrot.lane.b32.xlu0 %v11534_v28, %s11653_s18  ;;  %s15170_s18 = smov 38  }
 0x251   : > { %10148 = vmatmul.mubr.msk.bf16.gmra.mrb[84].mxu1 %vm508_vm1, %v15227_v11  ;;  %9736 = vmatprep.subr.msk.bf16.mxu0 %vm557_vm0, %v4892_v61  ;;  %v5400_v11 = vld [vmem:[%s11775_s21] sm:$0x3f]  ;;  %s11654_s21 = smov 90  }
 0x252   : > { %10151 = vmatprep.mubr.msk.bf16.mxu1 %vm508_vm1, %v15228_v20  ;;  %v5553_v61 = vrot.slane %v5400_v11, %v11770_v5 }
 0x254   : > { %v12976_v8 = vpop.f32.mrb[12].mxu1  ;;  %5562 = vrot.lane.b32.xlu1 %v5553_v61, %s11654_s21  ;;  %v5561_v63 = vcombine.high %v5553_v61, %v5553_v61 }
 0x255   : > { %15229 = vst [vmem:[#allocation11_spill] sm:$0xff] %v12976_v8  ;;  %v12982_v20 = vpop.f32.mrb[13].mxu1  ;;  %v5546_v8 = vcombine.high %v5400_v11, %v5400_v11  ;;  %v15236_v11 = vld [vmem:[#allocation16_spill] sm:$0xff] }
 0x256   : > { %15230 = vst [vmem:[#allocation12_spill] sm:$0xff] %v12982_v20  ;;  %v12986_v52 = vpop.f32.mrb[14].mxu1  ;;  %v15234_v20 = vld [vmem:[#allocation14_spill] sm:$0xff]  ;;  %5564 = vrot.lane.b32.xlu0 %v5561_v63, %s11654_s21  ;;  %v2914_v63 = vsel %vm557_vm0, %v12291_v43, 0  ;;  %v15247_v43 = vld [vmem:[#allocation19_spill] sm:$0xff] }
 0x257   : > { %15231 = vst [vmem:[#allocation43_spill] sm:$0xff] %v12986_v52  ;;  %v12988_v13 = vpop.f32.mrb[15].mxu1  ;;  %9646 = vmatmul.mubr.msk.bf16.gmra.mrb[28].mxu0 %vm508_vm1, %v12616_v51 }
 0x258   : > { %15232 = vst [vmem:[#allocation44_spill] sm:$0xff] %v12988_v13  ;;  %3706 = vmatprep.mubr.bf16.mxu0 %v15202_v10  ;;  %v5560_v13 = vrot.slane %v5546_v8, %v11770_v5 }
 0x259   : > { %10152 = vmatmul.mubr.msk.bf16.gmra.mrb[88].mxu1 %vm508_vm1, %v15233_v41  ;;  %v15241_v41 = vld [vmem:[#allocation17_spill] sm:$0xff] }
 0x25a   : > { %10155 = vmatprep.mubr.msk.bf16.mxu1 %vm508_vm1, %v15234_v20  ;;  %5566 = vrot.lane.b32.xlu1 %v5560_v13, %s11654_s21  ;;  %v15235_v20 = vld [vmem:[#allocation15_spill] sm:$0xff]  ;;  %s15172_s21 = smov 56  }
 0x25c   : > { %v12998_v52 = vpop.f32.mrb[16].mxu1 }
 0x25d   : > { %v13001_v51 = vpop.f32.mrb[17].mxu1 }
 0x25e   : > { %v13003_v42 = vpop.f32.mrb[18].mxu1 }
 0x25f   : > { %v13005_v28 = vpop.f32.mrb[19].mxu1  ;;  %9647 = vmatmul.mubr.msk.bf16.gmra.mrb[32].mxu0 %vm508_vm1, %v12619_v54 }
 0x260   : > { %3716 = vmatprep.mubr.bf16.mxu0 %v15202_v10 }
 0x261   : > { %10156 = vmatmul.mubr.msk.bf16.gmra.mrb[92].mxu1 %vm508_vm1, %v15235_v20  ;;  %v15242_v20 = vld [vmem:[#allocation18_spill] sm:$0xff] }
 0x262   : > { %10161 = vmatprep.mubr.msk.bf16.mxu1 %vm508_vm1, %v15236_v11  ;;  %v15243_v11 = vld [vmem:[#allocation27_spill] sm:$0xff] }
 0x264   : > { %v13014_v61 = vpop.f32.mrb[20].mxu1 }
 0x265   : > { %15237 = vst [vmem:[#allocation13_spill] sm:$0xff] %v13014_v61  ;;  %v13016_v5 = vpop.f32.mrb[21].mxu1 }
 0x266   : > { %15238 = vst [vmem:[#allocation14_spill] sm:$0xff] %v13016_v5  ;;  %v13018_v8 = vpop.f32.mrb[22].mxu1 }
 0x267   : > { %15239 = vst [vmem:[#allocation15_spill] sm:$0xff] %v13018_v8  ;;  %v13020_v13 = vpop.f32.mrb[23].mxu1  ;;  %9648 = vmatmul.mubr.msk.bf16.gmra.mrb[36].mxu0 %vm508_vm1, %v12632_v46 }
 0x268   : > { %15240 = vst [vmem:[#allocation16_spill] sm:$0xff] %v13020_v13  ;;  %3726 = vmatprep.mubr.bf16.mxu0 %v15202_v10 }
 0x269   : > { %10162 = vmatmul.mubr.msk.bf16.vlgmr.msra.gmra.mrb[64].mxu1 %vm508_vm1, %v15241_v41  ;;  %v15248_v41 = vld [vmem:[#allocation20_spill] sm:$0xff] }
 0x26a   : > { %10194 = vmatpush3.bf16.msra.mxu1 %v2914_v63  ;;  %10165 = vmatprep.mubr.msk.bf16.mxu1 %vm508_vm1, %v15242_v20 }
 0x26b   : > { %11338 = vmatprep.subr.msk.bf16.mxu1 %vm557_vm0, %v15243_v11 }
 0x26c   : > { %v13033_v8 = vpop.f32.mrb[24].mxu1 }
 0x26d   : > { %v13035_v13 = vpop.f32.mrb[25].mxu1 }
 0x26e   : > { %15244 = vst [vmem:[#allocation17_spill] sm:$0xff] %v13035_v13  ;;  %v13037_v5 = vpop.f32.mrb[26].mxu1 }
 0x26f   : > { %15245 = vst [vmem:[#allocation18_spill] sm:$0xff] %v13037_v5  ;;  %v13039_v61 = vpop.f32.mrb[27].mxu1  ;;  %9649 = vmatmul.mubr.msk.bf16.gmra.mrb[40].mxu0 %vm508_vm1, %v12634_v7 }
 0x270   : > { %15246 = vst [vmem:[#allocation27_spill] sm:$0xff] %v13039_v61  ;;  %3736 = vmatprep.mubr.bf16.mxu0 %v15202_v10  ;;  %v15252_v61 = vld [vmem:[#allocation21_spill] sm:$0xff] }
 0x271   : > { %10166 = vmatmul.mubr.msk.bf16.gmra.mrb[68].mxu1 %vm508_vm1, %v15247_v43  ;;  %v15253_v43 = vld [vmem:[#allocation22_spill] sm:$0xff] }
 0x272   : > { %10169 = vmatprep.mubr.msk.bf16.mxu1 %vm508_vm1, %v15248_v41 }
 0x274   : > { %v13048_v63 = vpop.f32.mrb[28].mxu1 }
 0x275   : > { %15249 = vst [vmem:[#allocation19_spill] sm:$0xff] %v13048_v63  ;;  %v13050_v20 = vpop.f32.mrb[29].mxu1 }
 0x276   : > { %15250 = vst [vmem:[#allocation20_spill] sm:$0xff] %v13050_v20  ;;  %v13052_v13 = vpop.f32.mrb[30].mxu1 }
 0x277   : > { %15251 = vst [vmem:[#allocation45_spill] sm:$0xff] %v13052_v13  ;;  %v13054_v5 = vpop.f32.mrb[31].mxu1  ;;  %9650 = vmatmul.mubr.msk.bf16.gmra.mrb[44].mxu0 %vm508_vm1, %v12642_v15 }
 0x278   : > { %3746 = vmatprep.mubr.bf16.mxu0 %v15202_v10 }
 0x279   : > { %10170 = vmatmul.mubr.msk.bf16.gmra.mrb[72].mxu1 %vm508_vm1, %v15252_v61 }
 0x27a   : > { %10173 = vmatprep.mubr.msk.bf16.mxu1 %vm508_vm1, %v15253_v43 }
 0x27c   : > { %v13063_v41 = vpop.f32.mrb[32].mxu1 }
 0x27d   : > { %15254 = vst [vmem:[#allocation21_spill] sm:$0xff] %v13063_v41  ;;  %v13065_v63 = vpop.f32.mrb[33].mxu1 }
 0x27e   : > { %15255 = vst [vmem:[#allocation22_spill] sm:$0xff] %v13065_v63  ;;  %v13067_v20 = vpop.f32.mrb[34].mxu1 }
 0x27f   : > { %15256 = vst [vmem:[#allocation46_spill] sm:$0xff] %v13067_v20  ;;  %v13069_v13 = vpop.f32.mrb[35].mxu1  ;;  %9651 = vmatmul.mubr.msk.bf16.gmra.mrb[48].mxu0 %vm508_vm1, %v12645_v35 }
 0x280   : > { %15257 = vst [vmem:[#allocation47_spill] sm:$0xff] %v13069_v13  ;;  %3756 = vmatprep.mubr.bf16.mxu0 %v15202_v10 }
 0x281   : > { %10174 = vmatmul.mubr.msk.bf16.gmra.mrb[76].mxu1 %vm508_vm1, %v12250_v21 }
 0x282   : > { %10177 = vmatprep.mubr.msk.bf16.mxu1 %vm508_vm1, %v12255_v32 }
 0x284   : > { %v13078_v61 = vpop.f32.mrb[36].mxu1 }
 0x285   : > { %15258 = vst [vmem:[#allocation48_spill] sm:$0xff] %v13078_v61  ;;  %v13080_v43 = vpop.f32.mrb[37].mxu1  ;;  %v15315_v61 = vld [vmem:[#allocation43_spill] sm:$0xff] }
 0x286   : > { %15259 = vst [vmem:[#allocation49_spill] sm:$0xff] %v13080_v43  ;;  %v13082_v63 = vpop.f32.mrb[38].mxu1 }
 0x287   : > { %15260 = vst [vmem:[#allocation50_spill] sm:$0xff] %v13082_v63  ;;  %v13084_v20 = vpop.f32.mrb[39].mxu1  ;;  %9652 = vmatmul.mubr.msk.bf16.gmra.mrb[52].mxu0 %vm508_vm1, %v12658_v53 }
 0x288   : > { %15261 = vst [vmem:[#allocation51_spill] sm:$0xff] %v13084_v20  ;;  %3766 = vmatprep.mubr.bf16.mxu0 %v15202_v10 }
 0x289   : > { %10178 = vmatmul.mubr.msk.bf16.gmra.mrb[80].mxu1 %vm508_vm1, %v12264_v36 }
 0x28a   : > { %10181 = vmatprep.mubr.msk.bf16.mxu1 %vm508_vm1, %v12267_v38 }
 0x28c   : > { %v13093_v21 = vpop.f32.mrb[40].mxu1 }
 0x28d   : > { %15262 = vst [vmem:[#allocation52_spill] sm:$0xff] %v13093_v21  ;;  %v13095_v32 = vpop.f32.mrb[41].mxu1 }
 0x28e   : > { %15263 = vst [vmem:[#allocation53_spill] sm:$0xff] %v13095_v32  ;;  %v13097_v43 = vpop.f32.mrb[42].mxu1 }
 0x28f   : > { %15264 = vst [vmem:[#allocation54_spill] sm:$0xff] %v13097_v43  ;;  %v13099_v63 = vpop.f32.mrb[43].mxu1  ;;  %9653 = vmatmul.mubr.msk.bf16.gmra.mrb[56].mxu0 %vm508_vm1, %v12663_v14 }
 0x290   : > { %15265 = vst [vmem:[#allocation55_spill] sm:$0xff] %v13099_v63  ;;  %3776 = vmatprep.mubr.bf16.mxu0 %v15202_v10 }
 0x291   : > { %10182 = vmatmul.mubr.msk.bf16.gmra.mrb[84].mxu1 %vm508_vm1, %v12269_v40  ;;  %v4891_v40 = vsel %vm4890_vm8, %v12932_v19, %v12957_v29 }
 0x292   : > { %10185 = vmatprep.mubr.msk.bf16.mxu1 %vm508_vm1, %v12273_v48 }
 0x294   : > { %v13108_v36 = vpop.f32.mrb[44].mxu1 }
 0x295   : > { %15266 = vst [vmem:[#allocation56_spill] sm:$0xff] %v13108_v36  ;;  %v13110_v38 = vpop.f32.mrb[45].mxu1 }
 0x296   : > { %15267 = vst [vmem:[#allocation57_spill] sm:$0xff] %v13110_v38  ;;  %v13112_v32 = vpop.f32.mrb[46].mxu1 }
 0x297   : > { %15268 = vst [vmem:[#allocation58_spill] sm:$0xff] %v13112_v32  ;;  %v13114_v43 = vpop.f32.mrb[47].mxu1  ;;  %9654 = vmatmul.mubr.msk.bf16.gmra.mrb[60].mxu0 %vm508_vm1, %v12672_v23 }
 0x298   : > { %15269 = vst [vmem:[#allocation59_spill] sm:$0xff] %v13114_v43  ;;  %4304 = vmatprep.mubr.bf16.mxu0 %v15202_v10  ;;  %v4942_v43 = vsel %vm557_vm0, %v4891_v40, 0 }
 0x299   : > { %10186 = vmatmul.mubr.msk.bf16.gmra.mrb[88].mxu1 %vm508_vm1, %v12278_v50 }
 0x29a   : > { %10189 = vmatprep.mubr.msk.bf16.mxu1 %vm508_vm1, %v12281_v60 }
 0x29c   : > { %v13126_v48 = vpop.f32.mrb[48].mxu1 }
 0x29d   : > { %15270 = vst [vmem:[#allocation60_spill] sm:$0xff] %v13126_v48  ;;  %v13128_v32 = vpop.f32.mrb[49].mxu1 }
 0x29e   : > { %15271 = vst [vmem:[#allocation61_spill] sm:$0xff] %v13128_v32  ;;  %v13131_v38 = vpop.f32.mrb[50].mxu1 }
 0x29f   : > { %15272 = vst [vmem:[#allocation62_spill] sm:$0xff] %v13131_v38  ;;  %v13133_v36 = vpop.f32.mrb[51].mxu1  ;;  %9688 = vmatmul.mubr.msk.bf16.vlgmr.msra.gmra.mrb[0].mxu0 %vm508_vm1, %v12830_v57  ;;  %v15288_v38 = vld [vmem:[#allocation26_spill] sm:$0xff] }
 0x2a0   : > { %15273 = vst [vmem:[#allocation63_spill] sm:$0xff] %v13133_v36  ;;  %4314 = vmatprep.mubr.bf16.mxu0 %v15202_v10  ;;  %4951 = vmatpush1.bf16.msra.mxu0 %v4942_v43  ;;  %v13164_v43 = vpop.permute.xlu1 %4835 }
 0x2a1   : > { %10190 = vmatmul.mubr.msk.bf16.gmra.mrb[92].mxu1 %vm508_vm1, %v12283_v3  ;;  %v3592_v3 = vsel %vm557_vm0, %v15243_v11, 0 }
 0x2a2   : > { %10195 = vmatprep.mubr.msk.bf16.mxu1 %vm508_vm1, %v12323_v58  ;;  %v11536_v58 = vld [vmem:[%s15181_s2] sm:$0xff]  }
 0x2a3   : > { %5513 = vrot.lane.b32.xlu0 %v11536_v58, %s11655_s13 }
 0x2a4   : > { %v13142_v50 = vpop.f32.mrb[52].mxu1 }
 0x2a5   : > { %15274 = vst [vmem:[#allocation64_spill] sm:$0xff] %v13142_v50  ;;  %v13144_v60 = vpop.f32.mrb[53].mxu1 }
 0x2a6   : > { %15275 = vst [vmem:[#allocation65_spill] sm:$0xff] %v13144_v60  ;;  %v13146_v19 = vpop.f32.mrb[54].mxu1 }
 0x2a7   : > { %15276 = vst [vmem:[#allocation66_spill] sm:$0xff] %v13146_v19  ;;  %v13148_v29 = vpop.f32.mrb[55].mxu1  ;;  %9689 = vmatmul.mubr.msk.bf16.gmra.mrb[4].mxu0 %vm508_vm1, %v12843_v24  ;;  %v15282_v19 = vld [vmem:[#allocation24_spill] sm:$0xff] }
 0x2a8   : > { %15277 = vst [vmem:[#allocation67_spill] sm:$0xff] %v13148_v29  ;;  %4324 = vmatprep.mubr.bf16.mxu0 %v15202_v10  ;;  %v13179_v29 = vpop.permute.xlu1 %4839 }
 0x2a9   : > { %10196 = vmatmul.mubr.msk.bf16.vlgmr.msra.gmra.mrb[64].mxu1 %vm508_vm1, %v12330_v34 }
 0x2aa   : > { %10228 = vmatpush3.bf16.msra.mxu1 %v3592_v3  ;;  %10199 = vmatprep.mubr.msk.bf16.mxu1 %vm508_vm1, %v12326_v6  ;;  %v13173_v3 = vpop.permute.xlu0 %4837 }
 0x2ab   : > { %11339 = vmatprep.subr.msk.bf16.mxu1 %vm557_vm0, %v12695_v39 }
 0x2ac   : > { %v13166_v40 = vpop.f32.mrb[56].mxu1 }
 0x2ad   : > { %15278 = vst [vmem:[#allocation68_spill] sm:$0xff] %v13166_v40  ;;  %v13169_v34 = vpop.f32.mrb[57].mxu1  ;;  %v15283_v40 = vld [vmem:[#allocation23_spill] sm:$0xff] }
 0x2ae   : > { %15279 = vst [vmem:[#allocation69_spill] sm:$0xff] %v13169_v34  ;;  %v13171_v11 = vpop.f32.mrb[58].mxu1  ;;  %v13186_v58 = vpop.permute.xlu0 %4841 }
 0x2af   : > { %15280 = vst [vmem:[#allocation70_spill] sm:$0xff] %v13171_v11  ;;  %v13175_v6 = vpop.f32.mrb[59].mxu1  ;;  %9690 = vmatmul.mubr.msk.bf16.gmra.mrb[8].mxu0 %vm508_vm1, %v12838_v22  ;;  %v11537_v11 = vld [vmem:[%s15181_s2 + $0x8] sm:$0xff]  }
 0x2b0   : > { %15281 = vst [vmem:[#allocation71_spill] sm:$0xff] %v13175_v6  ;;  %4334 = vmatprep.mubr.bf16.mxu0 %v15202_v10  ;;  %v13191_v6 = vpop.permute.xlu1 %4843  ;;  %5515 = vrot.lane.b32.xlu1 %v11537_v11, %s11655_s13 }
 0x2b1   : > { %10200 = vmatmul.mubr.msk.bf16.gmra.mrb[68].mxu1 %vm508_vm1, %v15282_v19 }
 0x2b2   : > { %10203 = vmatprep.mubr.msk.bf16.mxu1 %vm508_vm1, %v15283_v40  ;;  %v13200_v19 = vpop.permute.xlu0 %4845 }
 0x2b4   : > { %v13193_v34 = vpop.f32.mrb[60].mxu1  ;;  %v13206_v40 = vpop.permute.xlu1 %4847 }
 0x2b5   : > { %15284 = vst [vmem:[#allocation24_spill] sm:$0xff] %v13193_v34  ;;  %v13196_v60 = vpop.f32.mrb[61].mxu1  ;;  %v15289_v34 = vld [vmem:[#allocation25_spill] sm:$0xff] }
 0x2b6   : > { %15285 = vst [vmem:[#allocation23_spill] sm:$0xff] %v13196_v60  ;;  %v13198_v50 = vpop.f32.mrb[62].mxu1  ;;  %v13213_v11 = vpop.permute.xlu0 %4849 }
 0x2b7   : > { %15286 = vst [vmem:[#allocation72_spill] sm:$0xff] %v13198_v50  ;;  %v13202_v36 = vpop.f32.mrb[63].mxu1  ;;  %9691 = vmatmul.mubr.msk.bf16.gmra.mrb[12].mxu0 %vm508_vm1, %v12854_v59  ;;  %v11538_v50 = vld [vmem:[%s15181_s2 + $0x10] sm:$0xff]  }
 0x2b8   : > { %15287 = vst [vmem:[#allocation73_spill] sm:$0xff] %v13202_v36  ;;  %4344 = vmatprep.mubr.bf16.mxu0 %v15202_v10  ;;  %v11539_v36 = vld [vmem:[%s15181_s2 + $0x18] sm:$0xff]   ;;  %v13221_v60 = vpop.permute.xlu1 %4851  ;;  %5517 = vrot.lane.b32.xlu0 %v11538_v50, %s11655_s13  ;;  %v11541_v50 = vld [vmem:[%s15181_s2 + $0x28] sm:$0xff]  }
 0x2b9   : > { %10204 = vmatmul.mubr.msk.bf16.gmra.mrb[72].mxu1 %vm508_vm1, %v15288_v38  ;;  %5519 = vrot.lane.b32.xlu1 %v11539_v36, %s11655_s13  ;;  %v11540_v36 = vld [vmem:[%s15181_s2 + $0x20] sm:$0xff]  }
 0x2ba   : > { %10207 = vmatprep.mubr.msk.bf16.mxu1 %vm508_vm1, %v15289_v34  ;;  %v13225_v38 = vpop.permute.xlu0 %4853 }
 0x2bc   : > { %v13229_v34 = vpop.permute.xlu1 %4855  ;;  %5521 = vrot.lane.b32.xlu0 %v11540_v36, %s11655_s13  ;;  %v11542_v36 = vld [vmem:[%s15181_s2 + $0x30] sm:$0xff]  }
 0x2bd   : > { %5523 = vrot.lane.b32.xlu1 %v11541_v50, %s11655_s13  ;;  %v11543_v50 = vld [vmem:[%s15181_s2 + $0x38] sm:$0xff]  }
 0x2be   : > { %v13236_v32 = vpop.permute.xlu0 %4857 }
 0x2bf   : > { %9692 = vmatmul.mubr.msk.bf16.gmra.mrb[16].mxu0 %vm508_vm1, %v12849_v25 }
 0x2c0   : > { %4354 = vmatprep.mubr.bf16.mxu0 %v15202_v10  ;;  %v13244_v48 = vpop.permute.xlu1 %4859  ;;  %5525 = vrot.lane.b32.xlu0 %v11542_v36, %s11655_s13  ;;  %v11544_v36 = vld [vmem:[%s15181_s2 + $0x40] sm:$0xff]  }
 0x2c1   : > { %10208 = vmatmul.mubr.msk.bf16.gmra.mrb[76].mxu1 %vm508_vm1, %v12367_v0  ;;  %5527 = vrot.lane.b32.xlu1 %v11543_v50, %s11655_s13  ;;  %v11545_v50 = vld [vmem:[%s15181_s2 + $0x48] sm:$0xff]  }
 0x2c2   : > { %10211 = vmatprep.mubr.msk.bf16.mxu1 %vm508_vm1, %v12363_v4  ;;  %v13248_v0 = vpop.permute.xlu0 %4861 }
 0x2c4   : > { %v13252_v4 = vpop.permute.xlu1 %4863  ;;  %5529 = vrot.lane.b32.xlu0 %v11544_v36, %s11655_s13  ;;  %v15295_v36 = vld [vmem:[#allocation8_spill] sm:$0xff] }
 0x2c5   : > { %5531 = vrot.lane.b32.xlu1 %v11545_v50, %s11655_s13  ;;  %v335_v50 = vld [vmem:[%s15098_s3 + $0xf0] sm:$0xff] }
 0x2c6   : > { %v13259_v63 = vpop.permute.xlu0 %4865 }
 0x2c7   : > { %9693 = vmatmul.mubr.msk.bf16.gmra.mrb[20].mxu0 %vm508_vm1, %v12862_v26 }
 0x2c8   : > { %4364 = vmatprep.mubr.bf16.mxu0 %v15202_v10  ;;  %v13267_v21 = vpop.permute.xlu1 %5562 }
 0x2c9   : > { %10212 = vmatmul.mubr.msk.bf16.gmra.mrb[80].mxu1 %vm508_vm1, %v12378_v17 }
 0x2ca   : > { %10215 = vmatprep.mubr.msk.bf16.mxu1 %vm508_vm1, %v12374_v33  ;;  %v13271_v17 = vpop.permute.xlu0 %5564 }
 0x2cc   : > { %v13276_v33 = vpop.permute.xlu1 %5566 }
 0x2cd   : > { %v5570_v20 = vsel %vm5568_vm9, %v13271_v17, %v13276_v33 }
 0x2ce   : > { %9785 = vmatprep.subr.msk.bf16.mxu0 %vm557_vm0, %v5570_v20  ;;  %v11551_v20 = vld [vmem:[%s15181_s2 + $0x78] sm:$0xff]  }
 0x2cf   : > { %9694 = vmatmul.mubr.msk.bf16.gmra.mrb[24].mxu0 %vm508_vm1, %v12857_v18 }
 0x2d0   : > { %4374 = vmatprep.mubr.bf16.mxu0 %v15202_v10 }
 0x2d1   : > { %10216 = vmatmul.mubr.msk.bf16.gmra.mrb[84].mxu1 %vm508_vm1, %v12394_v9  ;;  %v11546_v9 = vld [vmem:[%s15181_s2 + $0x50] sm:$0xff]  }
 0x2d2   : > { %10219 = vmatprep.mubr.msk.bf16.mxu1 %vm508_vm1, %v12392_v44  ;;  %v11547_v44 = vld [vmem:[%s15181_s2 + $0x58] sm:$0xff]   ;;  %5533 = vrot.lane.b32.xlu0 %v11546_v9, %s11655_s13 }
 0x2d3   : > { %5535 = vrot.lane.b32.xlu1 %v11547_v44, %s11655_s13 }
 0x2d7   : > { %9695 = vmatmul.mubr.msk.bf16.gmra.mrb[28].mxu0 %vm508_vm1, %v12876_v12 }
 0x2d8   : > { %4384 = vmatprep.mubr.bf16.mxu0 %v15202_v10 }
 0x2d9   : > { %10220 = vmatmul.mubr.msk.bf16.gmra.mrb[88].mxu1 %vm508_vm1, %v12408_v2  ;;  %v11549_v2 = vld [vmem:[%s15181_s2 + $0x68] sm:$0xff]  }
 0x2da   : > { %10223 = vmatprep.mubr.msk.bf16.mxu1 %vm508_vm1, %v12404_v31  ;;  %v11548_v31 = vld [vmem:[%s15181_s2 + $0x60] sm:$0xff]   ;;  %5539 = vrot.lane.b32.xlu1 %v11549_v2, %s11655_s13 }
 0x2db   : > { %5537 = vrot.lane.b32.xlu0 %v11548_v31, %s11655_s13 }
 0x2de   : > { %5543 = vrot.lane.b32.xlu1 %v11551_v20, %s11655_s13 }
 0x2df   : > { %9696 = vmatmul.mubr.msk.bf16.gmra.mrb[32].mxu0 %vm508_vm1, %v12868_v27 }
 0x2e0   : > { %4394 = vmatprep.mubr.bf16.mxu0 %v15202_v10 }
 0x2e1   : > { %10224 = vmatmul.mubr.msk.bf16.gmra.mrb[92].mxu1 %vm508_vm1, %v12425_v16  ;;  %v4270_v16 = vsel %vm557_vm0, %v12695_v39, 0  ;;  %v15290_v39 = vld [vmem:[#allocation36_spill] sm:$0xff] }
 0x2e2   : > { %10229 = vmatprep.mubr.msk.bf16.mxu1 %vm508_vm1, %v12583_v45  ;;  %v11550_v45 = vld [vmem:[%s15181_s2 + $0x70] sm:$0xff]   ;;  %s15387_s2 = smov 38  }
 0x2e3   : > { %5541 = vrot.lane.b32.xlu0 %v11550_v45, %s11655_s13  ;;  %s15143_s13 = sand.u32 1, %s11629_s28  }
 0x2e4   : > { %s9391_s12 = sshll.u32 %s15143_s13, 7  ;;  %s15148_s13 = smov 40  }
 0x2e5   : > { %s14288_s22 = scalar_lea.vmem [#allocation3], %s9391_s12  ;;  %s15154_s12 = smov 58  }
 0x2e7   : > { %9697 = vmatmul.mubr.msk.bf16.gmra.mrb[36].mxu0 %vm508_vm1, %v12888_v56 }
 0x2e8   : > { %4404 = vmatprep.mubr.bf16.mxu0 %v15202_v10 }
 0x2e9   : > { %10230 = vmatmul.mubr.msk.bf16.vlgmr.msra.gmra.mrb[64].mxu1 %vm508_vm1, %v12588_v37  ;;  %v15291_v37 = vld [vmem:[#allocation37_spill] sm:$0xff] }
 0x2ea   : > { %10262 = vmatpush3.bf16.msra.mxu1 %v4270_v16  ;;  %10233 = vmatprep.mubr.msk.bf16.mxu1 %vm508_vm1, %v12591_v47  ;;  %v15292_v47 = vld [vmem:[#allocation7_spill] sm:$0xff] }
 0x2eb   : > { %11340 = vmatprep.subr.msk.bf16.mxu1 %vm557_vm0, %v12955_v55 }
 0x2ef   : > { %9698 = vmatmul.mubr.msk.bf16.gmra.mrb[40].mxu0 %vm508_vm1, %v12883_v30 }
 0x2f0   : > { %4414 = vmatprep.mubr.bf16.mxu0 %v15202_v10 }
 0x2f1   : > { %10234 = vmatmul.mubr.msk.bf16.gmra.mrb[68].mxu1 %vm508_vm1, %v12598_v49  ;;  %v15293_v49 = vld [vmem:[#allocation38_spill] sm:$0xff] }
 0x2f2   : > { %10237 = vmatprep.mubr.msk.bf16.mxu1 %vm508_vm1, %v12601_v1  ;;  %v15294_v1 = vld [vmem:[#allocation39_spill] sm:$0xff] }
 0x2f7   : > { %9699 = vmatmul.mubr.msk.bf16.gmra.mrb[44].mxu0 %vm508_vm1, %v12903_v62 }
 0x2f8   : > { %4424 = vmatprep.mubr.bf16.mxu0 %v15202_v10 }
 0x2f9   : > { %10238 = vmatmul.mubr.msk.bf16.gmra.mrb[72].mxu1 %vm508_vm1, %v15290_v39 }
 0x2fa   : > { %10241 = vmatprep.mubr.msk.bf16.mxu1 %vm508_vm1, %v15291_v37 }
 0x2ff   : > { %9700 = vmatmul.mubr.msk.bf16.gmra.mrb[48].mxu0 %vm508_vm1, %v15292_v47 }
 0x300   : > { %4434 = vmatprep.mubr.bf16.mxu0 %v15202_v10 }
 0x301   : > { %10242 = vmatmul.mubr.msk.bf16.gmra.mrb[76].mxu1 %vm508_vm1, %v15293_v49 }
 0x302   : > { %10245 = vmatprep.mubr.msk.bf16.mxu1 %vm508_vm1, %v12619_v54  ;;  %v15296_v54 = vld [vmem:[#allocation10_spill] sm:$0xff] }
 0x307   : > { %9701 = vmatmul.mubr.msk.bf16.gmra.mrb[52].mxu0 %vm508_vm1, %v15294_v1 }
 0x308   : > { %4444 = vmatprep.mubr.bf16.mxu0 %v15202_v10 }
 0x309   : > { %10246 = vmatmul.mubr.msk.bf16.gmra.mrb[80].mxu1 %vm508_vm1, %v12632_v46 }
 0x30a   : > { %10249 = vmatprep.mubr.msk.bf16.mxu1 %vm508_vm1, %v12634_v7  ;;  %v5569_v7 = vsel %vm5568_vm9, %v13267_v21, %v13271_v17  ;;  %v313_v21 = vld [vmem:[%s15098_s3 + $0x40] sm:$0xff]  ;;  %v334_v17 = vld [vmem:[%s15098_s3 + $0xe8] sm:$0xff] }
 0x30b   : > { %v5620_v46 = vsel %vm557_vm0, %v5569_v7, 0 }
 0x30f   : > { %9702 = vmatmul.mubr.msk.bf16.gmra.mrb[56].mxu0 %vm508_vm1, %v15295_v36 }
 0x310   : > { %4454 = vmatprep.mubr.bf16.mxu0 %v15202_v10 }
 0x311   : > { %10250 = vmatmul.mubr.msk.bf16.gmra.mrb[84].mxu1 %vm508_vm1, %v12642_v15  ;;  %v305_v15 = vld [vmem:[%s15098_s3] sm:$0xff] }
 0x312   : > { %10253 = vmatprep.mubr.msk.bf16.mxu1 %vm508_vm1, %v12645_v35  ;;  %v306_v35 = vld [vmem:[%s15098_s3 + $0x8] sm:$0xff]  ;;  %6080 = vperm.xlu0 %11414, %v305_v15  }
 0x313   : > { %6085 = vperm.xlu1 %11415, %v306_v35  }
 0x317   : > { %9703 = vmatmul.mubr.msk.bf16.gmra.mrb[60].mxu0 %vm508_vm1, %v15296_v54 }
 0x318   : > { %4982 = vmatprep.mubr.bf16.mxu0 %v15202_v10 }
 0x319   : > { %10254 = vmatmul.mubr.msk.bf16.gmra.mrb[88].mxu1 %vm508_vm1, %v12658_v53  ;;  %v321_v53 = vld [vmem:[%s15098_s3 + $0x80] sm:$0xff] }
 0x31a   : > { %10257 = vmatprep.mubr.msk.bf16.mxu1 %vm508_vm1, %v12663_v14  ;;  %v4948_v14 = vsel %vm557_vm0, %v12955_v55, 0  ;;  %6160 = vperm.xlu1 %11415, %v321_v53   ;;  %v328_v55 = vld [vmem:[%s15098_s3 + $0xb8] sm:$0xff] }
 0x31f   : > { %9737 = vmatmul.mubr.msk.bf16.vlgmr.msra.gmra.mrb[0].mxu0 %vm508_vm1, %v13164_v43 }
 0x320   : > { %4992 = vmatprep.mubr.bf16.mxu0 %v15202_v10  ;;  %5629 = vmatpush1.bf16.msra.mxu0 %v5620_v46 }
 0x321   : > { %10258 = vmatmul.mubr.msk.bf16.gmra.mrb[92].mxu1 %vm508_vm1, %v12672_v23  ;;  %v322_v23 = vld [vmem:[%s15098_s3 + $0x88] sm:$0xff] }
 0x322   : > { %10263 = vmatprep.mubr.msk.bf16.mxu1 %vm508_vm1, %v12830_v57  ;;  %6165 = vperm.xlu0 %11414, %v322_v23   ;;  %v307_v57 = vld [vmem:[%s15098_s3 + $0x10] sm:$0xff]  ;;  %v5516_v9 = vpop.permute.xlu1 %5515 }
 0x323   : > { %6090 = vperm.xlu1 %11415, %v307_v57  }
 0x327   : > { %9738 = vmatmul.mubr.msk.bf16.gmra.mrb[4].mxu0 %vm508_vm1, %v13173_v3 }
 0x328   : > { %5002 = vmatprep.mubr.bf16.mxu0 %v15202_v10 }
 0x329   : > { %10264 = vmatmul.mubr.msk.bf16.vlgmr.msra.gmra.mrb[64].mxu1 %vm508_vm1, %v12843_v24  ;;  %v5626_v24 = vsel %vm557_vm0, %v13276_v33, 0 }
 0x32a   : > { %10296 = vmatpush3.bf16.msra.mxu1 %v4948_v14  ;;  %10267 = vmatprep.mubr.msk.bf16.mxu1 %vm508_vm1, %v12838_v22  ;;  %v308_v22 = vld [vmem:[%s15098_s3 + $0x18] sm:$0xff] }
 0x32b   : > { %11341 = vmatprep.subr.msk.bf16.mxu1 %vm557_vm0, %v13276_v33  ;;  %6095 = vperm.xlu0 %11414, %v308_v22   ;;  %v320_v33 = vld [vmem:[%s15098_s3 + $0x78] sm:$0xff] }
 0x32f   : > { %9739 = vmatmul.mubr.msk.bf16.gmra.mrb[8].mxu0 %vm508_vm1, %v13179_v29 }
 0x330   : > { %5012 = vmatprep.mubr.bf16.mxu0 %v15202_v10 }
 0x331   : > { %10268 = vmatmul.mubr.msk.bf16.gmra.mrb[68].mxu1 %vm508_vm1, %v12854_v59  ;;  %v324_v59 = vld [vmem:[%s15098_s3 + $0x98] sm:$0xff] }
 0x332   : > { %10271 = vmatprep.mubr.msk.bf16.mxu1 %vm508_vm1, %v12849_v25  ;;  %v323_v25 = vld [vmem:[%s15098_s3 + $0x90] sm:$0xff]  ;;  %6175 = vperm.xlu0 %11414, %v324_v59  }
 0x333   : > { %6170 = vperm.xlu1 %11415, %v323_v25  }
 0x337   : > { %9740 = vmatmul.mubr.msk.bf16.gmra.mrb[12].mxu0 %vm508_vm1, %v13186_v58 }
 0x338   : > { %5022 = vmatprep.mubr.bf16.mxu0 %v15202_v10 }
 0x339   : > { %10272 = vmatmul.mubr.msk.bf16.gmra.mrb[72].mxu1 %vm508_vm1, %v12862_v26  ;;  %v310_v26 = vld [vmem:[%s15098_s3 + $0x28] sm:$0xff] }
 0x33a   : > { %10275 = vmatprep.mubr.msk.bf16.mxu1 %vm508_vm1, %v12857_v18  ;;  %v309_v18 = vld [vmem:[%s15098_s3 + $0x20] sm:$0xff]  ;;  %6105 = vperm.xlu0 %11414, %v310_v26  }
 0x33b   : > { %6100 = vperm.xlu1 %11415, %v309_v18  }
 0x33f   : > { %9741 = vmatmul.mubr.msk.bf16.gmra.mrb[16].mxu0 %vm508_vm1, %v13191_v6 }
 0x340   : > { %5032 = vmatprep.mubr.bf16.mxu0 %v15202_v10 }
 0x341   : > { %10276 = vmatmul.mubr.msk.bf16.gmra.mrb[76].mxu1 %vm508_vm1, %v12876_v12  ;;  %v326_v12 = vld [vmem:[%s15098_s3 + $0xa8] sm:$0xff] }
 0x342   : > { %10279 = vmatprep.mubr.msk.bf16.mxu1 %vm508_vm1, %v12868_v27  ;;  %v325_v27 = vld [vmem:[%s15098_s3 + $0xa0] sm:$0xff]  ;;  %6185 = vperm.xlu0 %11414, %v326_v12  }
 0x343   : > { %6180 = vperm.xlu1 %11415, %v325_v27   ;;  %v15297_v12 = vld [vmem:[#allocation6_spill] sm:$0xff] }
 0x347   : > { %9742 = vmatmul.mubr.msk.bf16.gmra.mrb[20].mxu0 %vm508_vm1, %v13200_v19 }
 0x348   : > { %5042 = vmatprep.mubr.bf16.mxu0 %v15202_v10 }
 0x349   : > { %10280 = vmatmul.mubr.msk.bf16.gmra.mrb[80].mxu1 %vm508_vm1, %v12888_v56  ;;  %v312_v56 = vld [vmem:[%s15098_s3 + $0x38] sm:$0xff] }
 0x34a   : > { %10283 = vmatprep.mubr.msk.bf16.mxu1 %vm508_vm1, %v12883_v30  ;;  %v311_v30 = vld [vmem:[%s15098_s3 + $0x30] sm:$0xff]  ;;  %6115 = vperm.xlu0 %11414, %v312_v56   ;;  %v6527_v56 = vld [vmem:[%s15299_s1] sm:$0x7]  ;;  %s15386_s1 = smov 56  }
 0x34b   : > { %6110 = vperm.xlu1 %11415, %v311_v30   ;;  %v13687_v30 = vsub.s32 0, %v15297_v12 }
 0x34d   : > { %15298 = vst [vmem:[#allocation26_spill] sm:$0xff] %v13687_v30 }
 0x34e   : > { %6195 = vperm.xlu0 %11414, %v328_v55  }
 0x34f   : > { %9743 = vmatmul.mubr.msk.bf16.gmra.mrb[24].mxu0 %vm508_vm1, %v13206_v40 }
 0x350   : > { %5052 = vmatprep.mubr.bf16.mxu0 %v15202_v10 }
 0x351   : > { %10284 = vmatmul.mubr.msk.bf16.gmra.mrb[84].mxu1 %vm508_vm1, %v12903_v62  ;;  %v327_v62 = vld [vmem:[%s15098_s3 + $0xb0] sm:$0xff] }
 0x352   : > { %10287 = vmatprep.mubr.msk.bf16.mxu1 %vm508_vm1, %v15292_v47  ;;  %6190 = vperm.xlu1 %11415, %v327_v62   ;;  %v13693_v62 = vsub.s32 1, %v15297_v12 }
 0x354   : > { %15300 = vst [vmem:[#allocation25_spill] sm:$0xff] %v13693_v62 }
 0x356   : > { %6120 = vperm.xlu1 %11415, %v313_v21   ;;  %v15301_v21 = vld [vmem:[#allocation28_spill] sm:$0xff] }
 0x357   : > { %9744 = vmatmul.mubr.msk.bf16.gmra.mrb[28].mxu0 %vm508_vm1, %v13213_v11 }
 0x358   : > { %5062 = vmatprep.mubr.bf16.mxu0 %v15202_v10 }
 0x359   : > { %10288 = vmatmul.mubr.msk.bf16.gmra.mrb[88].mxu1 %vm508_vm1, %v15294_v1 }
 0x35a   : > { %10291 = vmatprep.mubr.msk.bf16.mxu1 %vm508_vm1, %v15295_v36 }
 0x35f   : > { %9745 = vmatmul.mubr.msk.bf16.gmra.mrb[32].mxu0 %vm508_vm1, %v13221_v60 }
 0x360   : > { %5072 = vmatprep.mubr.bf16.mxu0 %v15202_v10 }
 0x361   : > { %10292 = vmatmul.mubr.msk.bf16.gmra.mrb[92].mxu1 %vm508_vm1, %v15296_v54 }
 0x362   : > { %10297 = vmatprep.mubr.msk.bf16.mxu1 %vm508_vm1, %v13164_v43  ;;  %v329_v43 = vld [vmem:[%s15098_s3 + $0xc0] sm:$0xff] }
 0x363   : > { %6200 = vperm.xlu1 %11415, %v329_v43  }
 0x367   : > { %9746 = vmatmul.mubr.msk.bf16.gmra.mrb[36].mxu0 %vm508_vm1, %v13225_v38 }
 0x368   : > { %5082 = vmatprep.mubr.bf16.mxu0 %v15202_v10 }
 0x369   : > { %10298 = vmatmul.mubr.msk.bf16.vlgmr.msra.gmra.mrb[64].mxu1 %vm508_vm1, %v13173_v3  ;;  %v330_v3 = vld [vmem:[%s15098_s3 + $0xc8] sm:$0xff] }
 0x36a   : > { %10330 = vmatpush3.bf16.msra.mxu1 %v5626_v24  ;;  %10301 = vmatprep.mubr.msk.bf16.mxu1 %vm508_vm1, %v13179_v29  ;;  %v314_v29 = vld [vmem:[%s15098_s3 + $0x48] sm:$0xff] }
 0x36b   : > { %6125 = vperm.xlu0 %11414, %v314_v29  }
 0x36f   : > { %9747 = vmatmul.mubr.msk.bf16.gmra.mrb[40].mxu0 %vm508_vm1, %v13229_v34  ;;  %6205 = vperm.xlu0 %11414, %v330_v3   ;;  %v15302_v3 = vld [vmem:[#allocation29_spill] sm:$0xff] }
 0x370   : > { %5092 = vmatprep.mubr.bf16.mxu0 %v15202_v10 }
 0x371   : > { %10302 = vmatmul.mubr.msk.bf16.gmra.mrb[68].mxu1 %vm508_vm1, %v13186_v58  ;;  %v316_v58 = vld [vmem:[%s15098_s3 + $0x58] sm:$0xff] }
 0x372   : > { %10305 = vmatprep.mubr.msk.bf16.mxu1 %vm508_vm1, %v13191_v6  ;;  %v315_v6 = vld [vmem:[%s15098_s3 + $0x50] sm:$0xff] }
 0x373   : > { %6130 = vperm.xlu1 %11415, %v315_v6   ;;  %6135 = vperm.xlu0 %11414, %v316_v58  }
 0x377   : > { %9748 = vmatmul.mubr.msk.bf16.gmra.mrb[44].mxu0 %vm508_vm1, %v13236_v32 }
 0x378   : > { %5102 = vmatprep.mubr.bf16.mxu0 %v15202_v10 }
 0x379   : > { %10306 = vmatmul.mubr.msk.bf16.gmra.mrb[72].mxu1 %vm508_vm1, %v13200_v19  ;;  %v331_v19 = vld [vmem:[%s15098_s3 + $0xd0] sm:$0xff] }
 0x37a   : > { %10309 = vmatprep.mubr.msk.bf16.mxu1 %vm508_vm1, %v13206_v40  ;;  %v332_v40 = vld [vmem:[%s15098_s3 + $0xd8] sm:$0xff]  ;;  %6210 = vperm.xlu1 %11415, %v331_v19  }
 0x37b   : > { %6215 = vperm.xlu0 %11414, %v332_v40  }
 0x37f   : > { %9749 = vmatmul.mubr.msk.bf16.gmra.mrb[48].mxu0 %vm508_vm1, %v13244_v48 }
 0x380   : > { %5112 = vmatprep.mubr.bf16.mxu0 %v15202_v10 }
 0x381   : > { %10310 = vmatmul.mubr.msk.bf16.gmra.mrb[76].mxu1 %vm508_vm1, %v13213_v11  ;;  %v318_v11 = vld [vmem:[%s15098_s3 + $0x68] sm:$0xff] }
 0x382   : > { %10313 = vmatprep.mubr.msk.bf16.mxu1 %vm508_vm1, %v13221_v60  ;;  %v317_v60 = vld [vmem:[%s15098_s3 + $0x60] sm:$0xff]  ;;  %6145 = vperm.xlu0 %11414, %v318_v11  }
 0x383   : > { %6140 = vperm.xlu1 %11415, %v317_v60   ;;  %v13701_v60 = vrot.slane %v6527_v56, %v13687_v30  ;;  %v15303_v11 = vld [vmem:[#allocation30_spill] sm:$0xff] }
 0x386   : > { %6225 = vperm.xlu0 %11414, %v334_v17  }
 0x387   : > { %9750 = vmatmul.mubr.msk.bf16.gmra.mrb[52].mxu0 %vm508_vm1, %v13248_v0 }
 0x388   : > { %5122 = vmatprep.mubr.bf16.mxu0 %v15202_v10 }
 0x389   : > { %10314 = vmatmul.mubr.msk.bf16.gmra.mrb[80].mxu1 %vm508_vm1, %v13225_v38  ;;  %v333_v38 = vld [vmem:[%s15098_s3 + $0xe0] sm:$0xff] }
 0x38a   : > { %10317 = vmatprep.mubr.msk.bf16.mxu1 %vm508_vm1, %v13229_v34  ;;  %6220 = vperm.xlu1 %11415, %v333_v38   ;;  %v319_v34 = vld [vmem:[%s15098_s3 + $0x70] sm:$0xff] }
 0x38b   : > { %6155 = vperm.xlu0 %11414, %v320_v33   ;;  %v13707_v33 = vrot.slane %v6527_v56, %v13693_v62 }
 0x38e   : > { %6150 = vperm.xlu1 %11415, %v319_v34  }
 0x38f   : > { %9751 = vmatmul.mubr.msk.bf16.gmra.mrb[56].mxu0 %vm508_vm1, %v13252_v4 }
 0x390   : > { %5132 = vmatprep.mubr.bf16.mxu0 %v15202_v10 }
 0x391   : > { %10318 = vmatmul.mubr.msk.bf16.gmra.mrb[84].mxu1 %vm508_vm1, %v13236_v32  ;;  %v336_v32 = vld [vmem:[%s15098_s3 + $0xf8] sm:$0xff] }
 0x392   : > { %10321 = vmatprep.mubr.msk.bf16.mxu1 %vm508_vm1, %v13244_v48  ;;  %6230 = vperm.xlu1 %11415, %v335_v50   ;;  %v5514_v48 = vpop.permute.xlu0 %5513  ;;  %v15304_v50 = vld [vmem:[#allocation31_spill] sm:$0xff] }
 0x393   : > { %6235 = vperm.xlu0 %11414, %v336_v32  }
 0x396   : > { %v5518_v44 = vpop.permute.xlu0 %5517 }
 0x397   : > { %9752 = vmatmul.mubr.msk.bf16.gmra.mrb[60].mxu0 %vm508_vm1, %v13259_v63 }
 0x398   : > { %5660 = vmatprep.mubr.bf16.mxu0 %v15202_v10 }
 0x399   : > { %10322 = vmatmul.mubr.msk.bf16.gmra.mrb[88].mxu1 %vm508_vm1, %v13248_v0  ;;  %v5520_v0 = vpop.permute.xlu1 %5519 }
 0x39a   : > { %10325 = vmatprep.mubr.msk.bf16.mxu1 %vm508_vm1, %v13252_v4  ;;  %v5522_v4 = vpop.permute.xlu0 %5521 }
 0x39e   : > { %v5526_v31 = vpop.permute.xlu0 %5525 }
 0x39f   : > { %9786 = vmatmul.mubr.msk.bf16.vlgmr.msra.gmra.mrb[0].mxu0 %vm508_vm1, %v5514_v48 }
 0x3a0   : > { %5670 = vmatprep.mubr.bf16.mxu0 %v15202_v10 }
 0x3a1   : > { %10326 = vmatmul.mubr.msk.bf16.gmra.mrb[92].mxu1 %vm508_vm1, %v13259_v63  ;;  %v5524_v63 = vpop.permute.xlu1 %5523 }
 0x3a2   : > { %10331 = vmatprep.mubr.msk.bf16.mxu1 %vm508_vm1, %v5514_v48  ;;  %v5530_v16 = vpop.permute.xlu0 %5529 }
 0x3a5   : > { %v5528_v2 = vpop.permute.xlu1 %5527 }
 0x3a6   : > { %v5534_v20 = vpop.permute.xlu0 %5533 }
 0x3a7   : > { %9787 = vmatmul.mubr.msk.bf16.gmra.mrb[4].mxu0 %vm508_vm1, %v5516_v9 }
 0x3a8   : > { %5680 = vmatprep.mubr.bf16.mxu0 %v15202_v10 }
 0x3a9   : > { %10332 = vmatmul.mubr.msk.bf16.vlgmr.msra.gmra.mrb[64].mxu1 %vm508_vm1, %v5516_v9  ;;  %v5532_v45 = vpop.permute.xlu1 %5531 }
 0x3aa   : > { %10335 = vmatprep.mubr.msk.bf16.mxu1 %vm508_vm1, %v5518_v44  ;;  %v5538_v37 = vpop.permute.xlu0 %5537 }
 0x3ad   : > { %v5536_v39 = vpop.permute.xlu1 %5535 }
 0x3ae   : > { %v5542_v49 = vpop.permute.xlu0 %5541 }
 0x3af   : > { %9788 = vmatmul.mubr.msk.bf16.gmra.mrb[8].mxu0 %vm508_vm1, %v5518_v44 }
 0x3b0   : > { %5690 = vmatprep.mubr.bf16.mxu0 %v15202_v10 }
 0x3b1   : > { %10336 = vmatmul.mubr.msk.bf16.gmra.mrb[68].mxu1 %vm508_vm1, %v5520_v0  ;;  %v5540_v47 = vpop.permute.xlu1 %5539 }
 0x3b2   : > { %10339 = vmatprep.mubr.msk.bf16.mxu1 %vm508_vm1, %v5522_v4  ;;  %v13654_v54 = vpop.permute.xlu0 %6080 }
 0x3b5   : > { %v5544_v1 = vpop.permute.xlu1 %5543 }
 0x3b6   : > { %v13658_v46 = vpop.permute.xlu0 %6165 }
 0x3b7   : > { %9789 = vmatmul.mubr.msk.bf16.gmra.mrb[12].mxu0 %vm508_vm1, %v5520_v0 }
 0x3b8   : > { %5700 = vmatprep.mubr.bf16.mxu0 %v15202_v10 }
 0x3b9   : > { %10340 = vmatmul.mubr.msk.bf16.gmra.mrb[72].mxu1 %vm508_vm1, %v5524_v63  ;;  %v13652_v36 = vpop.permute.xlu1 %6085 }
 0x3ba   : > { %10343 = vmatprep.mubr.msk.bf16.mxu1 %vm508_vm1, %v5526_v31  ;;  %v13660_v35 = vpop.permute.xlu0 %6095 }
 0x3bd   : > { %v13656_v7 = vpop.permute.xlu1 %6160 }
 0x3be   : > { %v13664_v53 = vpop.permute.xlu0 %6175 }
 0x3bf   : > { %9790 = vmatmul.mubr.msk.bf16.gmra.mrb[16].mxu0 %vm508_vm1, %v5522_v4 }
 0x3c0   : > { %5710 = vmatprep.mubr.bf16.mxu0 %v15202_v10 }
 0x3c1   : > { %10344 = vmatmul.mubr.msk.bf16.gmra.mrb[76].mxu1 %vm508_vm1, %v5528_v2  ;;  %v6091_v14 = vpop.permute.xlu1 %6090 }
 0x3c2   : > { %10347 = vmatprep.mubr.msk.bf16.mxu1 %vm508_vm1, %v5530_v16 }
 0x3c5   : > { %v13662_v15 = vpop.permute.xlu1 %6170 }
 0x3c7   : > { %9791 = vmatmul.mubr.msk.bf16.gmra.mrb[20].mxu0 %vm508_vm1, %v5524_v63  ;;  %v6539_v63 = vsub.s32 2, %v15297_v12 }
 0x3c8   : > { %5720 = vmatprep.mubr.bf16.mxu0 %v15202_v10 }
 0x3c9   : > { %10348 = vmatmul.mubr.msk.bf16.gmra.mrb[80].mxu1 %vm508_vm1, %v5532_v45  ;;  %v13666_v23 = vpop.permute.xlu1 %6100 }
 0x3ca   : > { %10351 = vmatprep.mubr.msk.bf16.mxu1 %vm508_vm1, %v5534_v20 }
 0x3cd   : > { %v13670_v57 = vpop.permute.xlu1 %6180 }
 0x3cf   : > { %9792 = vmatmul.mubr.msk.bf16.gmra.mrb[24].mxu0 %vm508_vm1, %v5526_v31 }
 0x3d0   : > { %5730 = vmatprep.mubr.bf16.mxu0 %v15202_v10 }
 0x3d1   : > { %10352 = vmatmul.mubr.msk.bf16.gmra.mrb[84].mxu1 %vm508_vm1, %v5536_v39  ;;  %v13674_v24 = vpop.permute.xlu1 %6110 }
 0x3d2   : > { %10355 = vmatprep.mubr.msk.bf16.mxu1 %vm508_vm1, %v5538_v37 }
 0x3d5   : > { %v13678_v59 = vpop.permute.xlu1 %6190 }
 0x3d7   : > { %9793 = vmatmul.mubr.msk.bf16.gmra.mrb[28].mxu0 %vm508_vm1, %v5528_v2 }
 0x3d8   : > { %5740 = vmatprep.mubr.bf16.mxu0 %v15202_v10 }
 0x3d9   : > { %10356 = vmatmul.mubr.msk.bf16.gmra.mrb[88].mxu1 %vm508_vm1, %v5540_v47  ;;  %v13682_v26 = vpop.permute.xlu1 %6120 }
 0x3da   : > { %10359 = vmatprep.mubr.msk.bf16.mxu1 %vm508_vm1, %v5542_v49 }
 0x3df   : > { %9794 = vmatmul.mubr.msk.bf16.gmra.mrb[32].mxu0 %vm508_vm1, %v5530_v16 }
 0x3e0   : > { %5750 = vmatprep.mubr.bf16.mxu0 %v15202_v10 }
 0x3e1   : > { %10360 = vmatmul.mubr.msk.bf16.gmra.mrb[92].mxu1 %vm508_vm1, %v5544_v1 }
 0x3e2   : > { %v13697_v19 = vpop.permute.xlu1 %6200 }
 0x3e7   : > { %9795 = vmatmul.mubr.msk.bf16.gmra.mrb[36].mxu0 %vm508_vm1, %v5532_v45 }
 0x3e8   : > { %5760 = vmatprep.mubr.bf16.mxu0 %v15202_v10 }
 0x3ef   : > { %9796 = vmatmul.mubr.msk.bf16.gmra.mrb[40].mxu0 %vm508_vm1, %v5534_v20 }
 0x3f0   : > { %5770 = vmatprep.mubr.bf16.mxu0 %v15202_v10 }
 0x3f7   : > { %9797 = vmatmul.mubr.msk.bf16.gmra.mrb[44].mxu0 %vm508_vm1, %v5536_v39  ;;  %v13716_v39 = vpop.permute.xlu1 %6130 }
 0x3f8   : > { %5780 = vmatprep.mubr.bf16.mxu0 %v15202_v10 }
 0x3ff   : > { %9798 = vmatmul.mubr.msk.bf16.gmra.mrb[48].mxu0 %vm508_vm1, %v5538_v37 }
 0x400   : > { %5790 = vmatprep.mubr.bf16.mxu0 %v15202_v10 }
 0x407   : > { %9799 = vmatmul.mubr.msk.bf16.gmra.mrb[52].mxu0 %vm508_vm1, %v5540_v47 }
 0x408   : > { %5800 = vmatprep.mubr.bf16.mxu0 %v15202_v10 }
 0x40f   : > { %9800 = vmatmul.mubr.msk.bf16.gmra.mrb[56].mxu0 %vm508_vm1, %v5542_v49  ;;  %v15305_v49 = vld [vmem:[#allocation32_spill] sm:$0xff] }
 0x410   : > { %5810 = vmatprep.mubr.bf16.mxu0 %v15202_v10  ;;  %v13668_v10 = vpop.permute.xlu0 %6105 }
 0x414   : > { %v13672_v22 = vpop.permute.xlu0 %6185 }
 0x417   : > { %9801 = vmatmul.mubr.msk.bf16.gmra.mrb[60].mxu0 %vm508_vm1, %v5544_v1 }
 0x418   : > { %v13676_v25 = vpop.permute.xlu0 %6115 }
 0x41c   : > { %v13680_v18 = vpop.permute.xlu0 %6195 }
 0x420   : > { %v13684_v27 = vpop.permute.xlu0 %6125 }
 0x424   : > { %v13704_v34 = vpop.permute.xlu0 %6205 }
 0x472   : > { %v5662_v55 = vpop.f32.mrb[0].mxu0 }
 0x473   : > { %v10565_v29 = vadd.f32 %v5662_v55, %v15301_v21  ;;  %v5664_v43 = vpop.f32.mrb[1].mxu0  ;;  %v13720_v21 = vpop.permute.xlu0 %6135 }
 0x474   : > { %v10566_v6 = vadd.f32 %v5664_v43, %v15302_v3  ;;  %v5666_v58 = vpop.f32.mrb[2].mxu0  ;;  %v15306_v3 = vld [vmem:[#allocation33_spill] sm:$0xff] }
 0x475   : > { %v6238_v40 = vadd.f32 %v10565_v29, %v13654_v54  ;;  %v10567_v38 = vadd.f32 %v5666_v58, %v15303_v11  ;;  %v5668_v17 = vpop.f32.mrb[3].mxu0 }
 0x476   : > { %v6239_v32 = vadd.f32 %v10566_v6, %v13654_v54  ;;  %v10568_v48 = vadd.f32 %v5668_v17, %v15304_v50 }
 0x477   : > { %v6334_v9 = vmax.f32 %v6238_v40, 0.0  ;;  %v6241_v44 = vadd.f32 %v10567_v38, %v13652_v36  ;;  %v13724_v38 = vrot.slane %v6527_v56, %v6539_v63 }
 0x478   : > { %v6335_v0 = vmax.f32 %v6239_v32, 0.0  ;;  %v6242_v4 = vadd.f32 %v10568_v48, %v13652_v36  ;;  %v15307_v32 = vld [vmem:[#allocation34_spill] sm:$0xff] }
 0x479   : > { %v6544_v31 = vmul.f32 %v13701_v60, %v6334_v9  ;;  %v6337_v2 = vmax.f32 %v6241_v44, 0.0 }
 0x47a   : > { %v6545_v16 = vmul.f32 %v13707_v33, %v6335_v0  ;;  %v6338_v45 = vmax.f32 %v6242_v4, 0.0  ;;  %v5672_v20 = vpop.f32.mrb[4].mxu0 }
 0x47b   : > { %v6430_v37 = vpack.c.bf16 %v6337_v2, %v6334_v9  ;;  %v6547_v47 = vmul.f32 %v13701_v60, %v6337_v2  ;;  %v10569_v1 = vadd.f32 %v5672_v20, %v15305_v49  ;;  %v5674_v55 = vpop.f32.mrb[5].mxu0 }
 0x47c   : > { %v6431_v29 = vpack.c.bf16 %v6338_v45, %v6335_v0  ;;  %v6548_v43 = vmul.f32 %v13707_v33, %v6338_v45  ;;  %v10570_v6 = vadd.f32 %v5674_v55, %v15306_v3  ;;  %v5676_v58 = vpop.f32.mrb[6].mxu0  ;;  %v10333_v40 = vpop.f32.mrb[64].mxu1  ;;  %v6640_v11 = vadd.f32 %v6545_v16, %v6544_v31  ;;  %v15308_v0 = vld [vmem:[#allocation35_spill] sm:$0xff] }
 0x47d   : > { %6478 = vst [vmem:[#allocation2] sm:$0xff] %v6430_v37  ;;  %v6244_v17 = vadd.f32 %v10569_v1, %v6091_v14  ;;  %v10571_v50 = vadd.f32 %v5676_v58, %v15307_v32  ;;  %v6246_v48 = vadd.f32 %v10333_v40, %v6091_v14  ;;  %v5678_v9 = vpop.f32.mrb[7].mxu0  ;;  %v5855_v44 = vpop.f32.mrb[65].mxu1 }
 0x47e   : > { %6479 = vst [vmem:[#allocation2 + $0x8] sm:$0xff] %v6431_v29  ;;  %v13727_v4 = vadd.f32 %v10570_v6, %v6091_v14  ;;  %v10572_v2 = vadd.f32 %v5678_v9, %v15308_v0  ;;  %v6240_v45 = vadd.f32 %v13654_v54, %v5855_v44  ;;  %v10334_v20 = vpop.f32.mrb[66].mxu1  ;;  %v13731_v49 = vadd.f32 %v6548_v43, %v6547_v47  ;;  %v13739_v40 = vpop.permute.xlu1 %6210 }
 0x47f   : > { %v6340_v31 = vmax.f32 %v6244_v17, 0.0  ;;  %v6247_v56 = vadd.f32 %v10571_v50, %v13660_v35  ;;  %v6249_v63 = vadd.f32 %v10334_v20, %v13660_v35  ;;  %v5858_v16 = vpop.f32.mrb[67].mxu1  ;;  %v6342_v37 = vmax.f32 %v6246_v48, 0.0  ;;  %v15311_v20 = vld [vmem:[#allocation41_spill] sm:$0xff] }
 0x480   : > { %v6248_v1 = vadd.f32 %v10572_v2, %v13660_v35  ;;  %v6336_v55 = vmax.f32 %v6240_v45, 0.0  ;;  %v6243_v14 = vadd.f32 %v13652_v36, %v5858_v16  ;;  %v6341_v6 = vmax.f32 %v13727_v4, 0.0  ;;  %v13744_v35 = vpop.permute.xlu0 %6215  ;;  %v15309_v4 = vld [vmem:[#allocation9_spill] sm:$0xff]  ;;  %v15310_v2 = vld [vmem:[#allocation40_spill] sm:$0xff] }
 0x481   : > { %v6343_v29 = vmax.f32 %v6247_v56, 0.0  ;;  %v6345_v3 = vmax.f32 %v6249_v63, 0.0  ;;  %v13742_v17 = vmul.f32 %v13701_v60, %v6340_v31  ;;  %v13747_v36 = vmul.f32 %v13724_v38, %v6342_v37  ;;  %v15312_v37 = vld [vmem:[#allocation42_spill] sm:$0xff] }
 0x482   : > { %v6344_v54 = vmax.f32 %v6248_v1, 0.0  ;;  %v6546_v47 = vmul.f32 %v13724_v38, %v6336_v55  ;;  %v6339_v43 = vmax.f32 %v6243_v14, 0.0  ;;  %v5682_v58 = vpop.f32.mrb[8].mxu0 }
 0x483   : > { %v5684_v32 = vpop.f32.mrb[9].mxu0  ;;  %v10573_v0 = vadd.f32 %v5682_v58, %v15309_v4  ;;  %v6553_v1 = vmul.f32 %v13701_v60, %v6343_v29 }
 0x484   : > { %v6432_v50 = vpack.c.bf16 %v6339_v43, %v6336_v55  ;;  %v6549_v48 = vmul.f32 %v13724_v38, %v6339_v43  ;;  %v5686_v9 = vpop.f32.mrb[10].mxu0  ;;  %v10337_v44 = vpop.f32.mrb[68].mxu1  ;;  %v10574_v45 = vadd.f32 %v5684_v32, %v15310_v2  ;;  %v6641_v62 = vsel %vm6480_vm10, %v6546_v47, 0.0 }
 0x485   : > { %v10575_v56 = vadd.f32 %v5686_v9, %v15311_v20  ;;  %v6258_v31 = vadd.f32 %v10337_v44, %v13674_v24  ;;  %v5688_v63 = vpop.f32.mrb[11].mxu0  ;;  %v5871_v16 = vpop.f32.mrb[69].mxu1  ;;  %v6250_v58 = vadd.f32 %v10573_v0, %v13666_v23  ;;  %v6642_v20 = vadd.f32 %v6641_v62, %v6640_v11 }
 0x486   : > { %6481 = vst.msk [vmem:[#allocation2 + $0x10] sm:$0xff] %vm6480_vm10, %v6432_v50  ;;  %v10576_v55 = vadd.f32 %v5688_v63, %v15312_v37  ;;  %v6252_v14 = vadd.f32 %v13666_v23, %v5871_v16  ;;  %v10338_v43 = vpop.f32.mrb[70].mxu1  ;;  %v6251_v32 = vadd.f32 %v10574_v45, %v13666_v23  ;;  %v6554_v63 = vmul.f32 %v13707_v33, %v6344_v54  ;;  %v13774_v54 = vpop.permute.xlu0 %6145 }
 0x487   : > { %v6253_v9 = vadd.f32 %v10575_v56, %v13668_v10  ;;  %v6354_v44 = vmax.f32 %v6258_v31, 0.0  ;;  %v5874_v4 = vpop.f32.mrb[71].mxu1  ;;  %v6261_v50 = vadd.f32 %v10338_v43, %v13676_v25  ;;  %v6346_v16 = vmax.f32 %v6250_v58, 0.0  ;;  %6643 = vadd.xlane.f32.xlu1 %v6642_v20  ;;  %v13767_v56 = vpop.permute.xlu1 %6140 }
 0x488   : > { %v6254_v2 = vadd.f32 %v10576_v55, %v13668_v10  ;;  %v6348_v29 = vmax.f32 %v6252_v14, 0.0  ;;  %v6646_v47 = vsel %vm6480_vm10, %v6549_v48, 0.0  ;;  %v6347_v30 = vmax.f32 %v6251_v32, 0.0 }
 0x489   : > { %v6349_v37 = vmax.f32 %v6253_v9, 0.0  ;;  %v6357_v12 = vmax.f32 %v6261_v50, 0.0  ;;  %v6255_v23 = vadd.f32 %v13668_v10, %v5874_v4  ;;  %v6551_v31 = vmul.f32 %v13707_v33, %v6341_v6  ;;  %v15313_v9 = vld [vmem:[#allocation11_spill] sm:$0xff]  ;;  %v15314_v6 = vld [vmem:[#allocation12_spill] sm:$0xff] }
 0x48a   : > { %v6350_v0 = vmax.f32 %v6254_v2, 0.0  ;;  %v5692_v45 = vpop.f32.mrb[12].mxu0  ;;  %v6555_v55 = vmul.f32 %v13724_v38, %v6345_v3  ;;  %v13772_v62 = vmul.f32 %v13724_v38, %v6354_v44  ;;  %v6556_v48 = vmul.f32 %v13701_v60, %v6346_v16 }
 0x48b   : > { %v5694_v11 = vpop.f32.mrb[13].mxu0  ;;  %v6558_v14 = vmul.f32 %v13724_v38, %v6348_v29  ;;  %v6351_v10 = vmax.f32 %v6255_v23, 0.0  ;;  %v6647_v32 = vadd.f32 %v6646_v47, %v13731_v49  ;;  %v10577_v4 = vadd.f32 %v5692_v45, %v15313_v9 }
 0x48c   : > { %v5696_v43 = vpop.f32.mrb[14].mxu0  ;;  %v10341_v58 = vpop.f32.mrb[72].mxu1  ;;  %v10578_v2 = vadd.f32 %v5694_v11, %v15314_v6  ;;  %v6557_v44 = vmul.f32 %v13707_v33, %v6347_v30  ;;  %v6655_v20 = vadd.f32 %v6554_v63, %v6553_v1  ;;  %v6656_v49 = vsel %vm6480_vm10, %v6555_v55, 0.0  ;;  %v15316_v6 = vld [vmem:[#allocation44_spill] sm:$0xff] }
 0x48d   : > { %v5698_v3 = vpop.f32.mrb[15].mxu0  ;;  %v5887_v50 = vpop.f32.mrb[73].mxu1  ;;  %v10579_v13 = vadd.f32 %v5696_v43, %v15315_v61  ;;  %v6270_v16 = vadd.f32 %v10341_v58, %v13716_v39  ;;  %6648 = vadd.xlane.f32.xlu0 %v6647_v32  ;;  %v6256_v29 = vadd.f32 %v10577_v4, %v13674_v24  ;;  %v6559_v61 = vmul.f32 %v13701_v60, %v6349_v37 }
 0x48e   : > { %v10342_v41 = vpop.f32.mrb[74].mxu1  ;;  %v6257_v23 = vadd.f32 %v10578_v2, %v13674_v24  ;;  %v6657_v45 = vadd.f32 %v6656_v49, %v6655_v20  ;;  %v10580_v30 = vadd.f32 %v5698_v3, %v15316_v6  ;;  %v13789_v1 = vpop.permute.xlu1 %6220  ;;  %v6560_v63 = vmul.f32 %v13707_v33, %v6350_v0 }
 0x48f   : > { %v5890_v47 = vpop.f32.mrb[75].mxu1  ;;  %v6259_v11 = vadd.f32 %v10579_v13, %v13676_v25  ;;  %v6366_v9 = vmax.f32 %v6270_v16, 0.0  ;;  %v6352_v43 = vmax.f32 %v6256_v29, 0.0  ;;  %v6650_v58 = vadd.f32 %v6551_v31, %v13742_v17  ;;  %v13802_v20 = vpop.permute.xlu0 %6225 }
 0x490   : > { %v6353_v32 = vmax.f32 %v6257_v23, 0.0  ;;  %6658 = vadd.xlane.f32.xlu1 %v6657_v45  ;;  %v6260_v55 = vadd.f32 %v10580_v30, %v13676_v25  ;;  %v6651_v13 = vsel %vm6480_vm10, %v13747_v36, 0.0  ;;  %v13798_v2 = vmul.f32 %v13724_v38, %v6357_v12  ;;  %15317 = vst [vmem:[#allocation36_spill] sm:$0xff] %v13802_v20 }
 0x491   : > { %v6355_v24 = vmax.f32 %v6259_v11, 0.0  ;;  %v6652_v3 = vadd.f32 %v6651_v13, %v6650_v58  ;;  %v6264_v37 = vadd.f32 %v13682_v26, %v5887_v50  ;;  %v6273_v0 = vadd.f32 %v10342_v41, %v13720_v21 }
 0x492   : > { %v5702_v4 = vpop.f32.mrb[16].mxu0  ;;  %v6561_v31 = vmul.f32 %v13724_v38, %v6351_v10  ;;  %v13806_v16 = vmul.f32 %v13724_v38, %v6366_v9  ;;  %v6356_v25 = vmax.f32 %v6260_v55, 0.0  ;;  %v6267_v12 = vadd.f32 %v13684_v27, %v5890_v47  ;;  %v13813_v9 = vpop.permute.xlu1 %6150 }
 0x493   : > { %v5704_v17 = vpop.f32.mrb[17].mxu0  ;;  %6653 = vadd.xlane.f32.xlu0 %v6652_v3  ;;  %v6369_v23 = vmax.f32 %v6273_v0, 0.0  ;;  %v6660_v49 = vadd.f32 %v6557_v44, %v6556_v48  ;;  %v6661_v50 = vsel %vm6480_vm10, %v6558_v14, 0.0  ;;  %v6562_v11 = vmul.f32 %v13701_v60, %v6352_v43 }
 0x494   : > { %v5706_v29 = vpop.f32.mrb[18].mxu0  ;;  %v10345_v36 = vpop.f32.mrb[76].mxu1  ;;  %v6563_v6 = vmul.f32 %v13707_v33, %v6353_v32  ;;  %v10581_v10 = vadd.f32 %v5702_v4, %v12998_v52  ;;  %v6360_v58 = vmax.f32 %v6264_v37, 0.0  ;;  %v6363_v55 = vmax.f32 %v6267_v12, 0.0 }
 0x495   : > { %v5708_v45 = vpop.f32.mrb[19].mxu0  ;;  %v5903_v41 = vpop.f32.mrb[77].mxu1  ;;  %v6662_v13 = vadd.f32 %v6661_v50, %v6660_v49  ;;  %v6665_v48 = vadd.f32 %v6560_v63, %v6559_v61  ;;  %v6666_v14 = vsel %vm6480_vm10, %v6561_v31, 0.0  ;;  %v10582_v44 = vadd.f32 %v5704_v17, %v13001_v51 }
 0x496   : > { %v10346_v30 = vpop.f32.mrb[78].mxu1  ;;  %v6262_v47 = vadd.f32 %v10581_v10, %v13682_v26  ;;  %v6565_v43 = vmul.f32 %v13701_v60, %v6355_v24  ;;  %v10583_v32 = vadd.f32 %v5706_v29, %v13003_v42  ;;  %v6282_v52 = vadd.f32 %v10345_v36, %v13813_v9  ;;  %v13824_v49 = vpop.permute.xlu0 %6155 }
 0x497   : > { %v5906_v3 = vpop.f32.mrb[79].mxu1  ;;  %6663 = vadd.xlane.f32.xlu0 %v6662_v13  ;;  %v6566_v4 = vmul.f32 %v13707_v33, %v6356_v25  ;;  %v6667_v37 = vadd.f32 %v6666_v14, %v6665_v48  ;;  %v6263_v0 = vadd.f32 %v10582_v44, %v13682_v26  ;;  %v10584_v12 = vadd.f32 %v5708_v45, %v13005_v28 }
 0x498   : > { %v6358_v63 = vmax.f32 %v6262_v47, 0.0  ;;  %v6265_v51 = vadd.f32 %v10583_v32, %v13684_v27  ;;  %v6276_v24 = vadd.f32 %v13767_v56, %v5903_v41  ;;  %v6285_v17 = vadd.f32 %v10346_v30, %v13824_v49 }
 0x499   : > { %6668 = vadd.xlane.f32.xlu1 %v6667_v37  ;;  %v6359_v31 = vmax.f32 %v6263_v0, 0.0  ;;  %v6378_v29 = vmax.f32 %v6282_v52, 0.0  ;;  %v6266_v25 = vadd.f32 %v10584_v12, %v13684_v27  ;;  %v6279_v26 = vadd.f32 %v13774_v54, %v5906_v3  ;;  %v15319_v12 = vld [vmem:[#allocation13_spill] sm:$0xff] }
 0x49a   : > { %v5712_v61 = vpop.f32.mrb[20].mxu0  ;;  %v6570_v50 = vmul.f32 %v13724_v38, %v6360_v58  ;;  %v13833_v45 = vmul.f32 %v13724_v38, %v6369_v23  ;;  %v6361_v10 = vmax.f32 %v6265_v51, 0.0  ;;  %v6381_v13 = vmax.f32 %v6285_v17, 0.0  ;;  %v15321_v17 = vld [vmem:[#allocation15_spill] sm:$0xff] }
 0x49b   : > { %v5714_v42 = vpop.f32.mrb[21].mxu0  ;;  %v6362_v30 = vmax.f32 %v6266_v25, 0.0  ;;  %v6372_v48 = vmax.f32 %v6276_v24, 0.0  ;;  %v6375_v14 = vmax.f32 %v6279_v26, 0.0  ;;  %v6670_v44 = vadd.f32 %v6563_v6, %v6562_v11 }
 0x49c   : > { %v5716_v36 = vpop.f32.mrb[22].mxu0  ;;  %v10349_v28 = vpop.f32.mrb[80].mxu1  ;;  %v6573_v27 = vmul.f32 %v13724_v38, %v6363_v55  ;;  %v6568_v3 = vmul.f32 %v13701_v60, %v6358_v63  ;;  %v6569_v37 = vmul.f32 %v13707_v33, %v6359_v31  ;;  %v13839_v58 = vmul.f32 %v13724_v38, %v6378_v29  ;;  %v15320_v55 = vld [vmem:[#allocation14_spill] sm:$0xff] }
 0x49d   : > { %v5718_v41 = vpop.f32.mrb[23].mxu0  ;;  %v5919_v47 = vpop.f32.mrb[81].mxu1  ;;  %v6571_v23 = vmul.f32 %v13701_v60, %v6361_v10  ;;  %v6671_v0 = vsel %vm6480_vm10, %v13772_v62, 0.0  ;;  %v10585_v51 = vadd.f32 %v5712_v61, %v15319_v12  ;;  %v6675_v24 = vadd.f32 %v6566_v4, %v6565_v43 }
 0x49e   : > { %v10350_v32 = vpop.f32.mrb[82].mxu1  ;;  %15318 = vst [vmem:[#allocation37_spill] sm:$0xff] %v13839_v58  ;;  %v6672_v11 = vadd.f32 %v6671_v0, %v6670_v44  ;;  %v6676_v6 = vsel %vm6480_vm10, %v13798_v2, 0.0  ;;  %v10586_v63 = vadd.f32 %v5714_v42, %v15320_v55  ;;  %v10587_v25 = vadd.f32 %v5716_v36, %v15321_v17  ;;  %v15322_v58 = vld [vmem:[#allocation16_spill] sm:$0xff] }
 0x49f   : > { %v5922_v52 = vpop.f32.mrb[83].mxu1  ;;  %v6268_v29 = vadd.f32 %v10585_v51, %v13716_v39  ;;  %v6677_v26 = vadd.f32 %v6676_v6, %v6675_v24  ;;  %v6294_v10 = vadd.f32 %v10349_v28, %v13662_v15  ;;  %v10588_v20 = vadd.f32 %v5718_v41, %v15322_v58 }
 0x4a0   : > { %6673 = vadd.xlane.f32.xlu0 %v6672_v11  ;;  %v6269_v43 = vadd.f32 %v10586_v63, %v13716_v39  ;;  %v6271_v4 = vadd.f32 %v10587_v25, %v13720_v21  ;;  %v13855_v2 = vadd.f32 %v13656_v7, %v5919_v47  ;;  %v13858_v61 = vadd.f32 %v10350_v32, %v13664_v53 }
 0x4a1   : > { %v6364_v44 = vmax.f32 %v6268_v29, 0.0  ;;  %6678 = vadd.xlane.f32.xlu1 %v6677_v26  ;;  %v6390_v0 = vmax.f32 %v6294_v10, 0.0  ;;  %v6272_v28 = vadd.f32 %v10588_v20, %v13720_v21  ;;  %v6291_v41 = vadd.f32 %v13658_v46, %v5922_v52 }
 0x4a2   : > { %v5722_v31 = vpop.f32.mrb[24].mxu0  ;;  %v13863_v39 = vmul.f32 %v13724_v38, %v6372_v48  ;;  %v6365_v51 = vmax.f32 %v6269_v43, 0.0  ;;  %v6367_v47 = vmax.f32 %v6271_v4, 0.0  ;;  %v6393_v24 = vmax.f32 %v13858_v61, 0.0  ;;  %v15324_v61 = vld [vmem:[#allocation17_spill] sm:$0xff] }
 0x4a3   : > { %v5724_v62 = vpop.f32.mrb[25].mxu0  ;;  %v6572_v11 = vmul.f32 %v13707_v33, %v6362_v30  ;;  %v13868_v6 = vmul.f32 %v13724_v38, %v6381_v13  ;;  %v6368_v55 = vmax.f32 %v6272_v28, 0.0  ;;  %v6387_v63 = vmax.f32 %v6291_v41, 0.0 }
 0x4a4   : > { %v5726_v42 = vpop.f32.mrb[26].mxu0  ;;  %v10353_v36 = vpop.f32.mrb[84].mxu1  ;;  %v13871_v20 = vmul.f32 %v13724_v38, %v6375_v14  ;;  %v6574_v52 = vmul.f32 %v13701_v60, %v6364_v44  ;;  %v6384_v48 = vmax.f32 %v13855_v2, 0.0  ;;  %v6575_v17 = vmul.f32 %v13707_v33, %v6365_v51 }
 0x4a5   : > { %v5728_v58 = vpop.f32.mrb[27].mxu0  ;;  %v5935_v12 = vpop.f32.mrb[85].mxu1  ;;  %v13877_v25 = vmul.f32 %v13724_v38, %v6390_v0  ;;  %v6577_v30 = vmul.f32 %v13701_v60, %v6367_v47  ;;  %v6680_v13 = vadd.f32 %v6569_v37, %v6568_v3  ;;  %v6681_v26 = vsel %vm6480_vm10, %v6570_v50, 0.0  ;;  %v15325_v0 = vld [vmem:[#allocation18_spill] sm:$0xff]  ;;  %v15326_v47 = vld [vmem:[#allocation27_spill] sm:$0xff] }
 0x4a6   : > { %v10354_v32 = vpop.f32.mrb[86].mxu1  ;;  %v6456_v29 = vpack.c.bf16 %v6387_v63, %v6384_v48  ;;  %v10589_v43 = vadd.f32 %v5722_v31, %v13033_v8  ;;  %v6685_v14 = vadd.f32 %v6572_v11, %v6571_v23  ;;  %v6686_v4 = vsel %vm6480_vm10, %v6573_v27, 0.0 }
 0x4a7   : > { %v5938_v21 = vpop.f32.mrb[87].mxu1  ;;  %15323 = vst [vmem:[#allocation7_spill] sm:$0xff] %v13877_v25  ;;  %v10590_v44 = vadd.f32 %v5724_v62, %v15324_v61  ;;  %v6682_v28 = vadd.f32 %v6681_v26, %v6680_v13  ;;  %v10591_v41 = vadd.f32 %v5726_v42, %v15325_v0  ;;  %v6306_v51 = vadd.f32 %v10353_v36, %v13678_v59 }
 0x4a8   : > { %6505 = vst.msk [vmem:[#allocation2 + $0xd0] sm:$0xff] %vm6480_vm10, %v6456_v29  ;;  %v10592_v3 = vadd.f32 %v5728_v58, %v15326_v47  ;;  %v6274_v25 = vadd.f32 %v10589_v43, %v13767_v56  ;;  %v6687_v8 = vadd.f32 %v6686_v4, %v6685_v14  ;;  %v6300_v27 = vadd.f32 %v13670_v57, %v5935_v12 }
 0x4a9   : > { %v6275_v23 = vadd.f32 %v10590_v44, %v13767_v56  ;;  %6683 = vadd.xlane.f32.xlu0 %v6682_v28  ;;  %v6277_v11 = vadd.f32 %v10591_v41, %v13774_v54  ;;  %v6402_v29 = vmax.f32 %v6306_v51, 0.0  ;;  %v6309_v36 = vadd.f32 %v10354_v32, %v13680_v18 }
 0x4aa   : > { %v5732_v10 = vpop.f32.mrb[28].mxu0  ;;  %v6278_v42 = vadd.f32 %v10592_v3, %v13774_v54  ;;  %v6370_v13 = vmax.f32 %v6274_v25, 0.0  ;;  %6688 = vadd.xlane.f32.xlu1 %v6687_v8  ;;  %v6396_v43 = vmax.f32 %v6300_v27, 0.0  ;;  %v6303_v14 = vadd.f32 %v13672_v22, %v5938_v21  ;;  %v15327_v3 = vld [vmem:[#allocation19_spill] sm:$0xff] }
 0x4ab   : > { %v5734_v2 = vpop.f32.mrb[29].mxu0  ;;  %v6371_v26 = vmax.f32 %v6275_v23, 0.0  ;;  %v6578_v12 = vmul.f32 %v13707_v33, %v6368_v55  ;;  %v6373_v4 = vmax.f32 %v6277_v11, 0.0  ;;  %v6405_v44 = vmax.f32 %v6309_v36, 0.0  ;;  %v15329_v36 = vld [vmem:[#allocation45_spill] sm:$0xff] }
 0x4ac   : > { %v5736_v37 = vpop.f32.mrb[30].mxu0  ;;  %v10357_v50 = vpop.f32.mrb[88].mxu1  ;;  %v6374_v61 = vmax.f32 %v6278_v42, 0.0  ;;  %v13897_v28 = vmul.f32 %v13724_v38, %v6384_v48  ;;  %v13900_v54 = vmul.f32 %v13724_v38, %v6393_v24  ;;  %v13903_v32 = vmul.f32 %v13724_v38, %v6387_v63 }
 0x4ad   : > { %v5738_v31 = vpop.f32.mrb[31].mxu0  ;;  %v5951_v62 = vpop.f32.mrb[89].mxu1  ;;  %v6399_v25 = vmax.f32 %v6303_v14, 0.0  ;;  %v6580_v0 = vmul.f32 %v13701_v60, %v6370_v13  ;;  %v13907_v21 = vmul.f32 %v13724_v38, %v6402_v29  ;;  %v6581_v55 = vmul.f32 %v13707_v33, %v6371_v26  ;;  %v15328_v29 = vld [vmem:[#allocation20_spill] sm:$0xff] }
 0x4ae   : > { %v10358_v58 = vpop.f32.mrb[90].mxu1  ;;  %v13911_v51 = vmul.f32 %v13724_v38, %v6396_v43  ;;  %v6690_v47 = vadd.f32 %v6575_v17, %v6574_v52  ;;  %v6691_v24 = vsel %vm6480_vm10, %v13806_v16, 0.0  ;;  %v10593_v63 = vadd.f32 %v5732_v10, %v15327_v3 }
 0x4af   : > { %v5954_v56 = vpop.f32.mrb[91].mxu1  ;;  %v6695_v8 = vadd.f32 %v6578_v12, %v6577_v30  ;;  %v6696_v11 = vsel %vm6480_vm10, %v13833_v45, 0.0  ;;  %v10594_v42 = vadd.f32 %v5734_v2, %v15328_v29  ;;  %v10595_v13 = vadd.f32 %v5736_v37, %v15329_v36 }
 0x4b0   : > { %v6318_v26 = vadd.f32 %v10357_v50, %v13739_v40  ;;  %v6692_v52 = vadd.f32 %v6691_v24, %v6690_v47  ;;  %v6280_v17 = vadd.f32 %v10593_v63, %v13813_v9  ;;  %v10596_v10 = vadd.f32 %v5738_v31, %v13054_v5 }
 0x4b1   : > { %v6697_v16 = vadd.f32 %v6696_v11, %v6695_v8  ;;  %v6281_v12 = vadd.f32 %v10594_v42, %v13813_v9  ;;  %v6283_v3 = vadd.f32 %v10595_v13, %v13824_v49  ;;  %v6312_v2 = vadd.f32 %v13697_v19, %v5951_v62 }
 0x4b2   : > { %v5742_v41 = vpop.f32.mrb[32].mxu0  ;;  %v6414_v45 = vmax.f32 %v6318_v26, 0.0  ;;  %6693 = vadd.xlane.f32.xlu0 %v6692_v52  ;;  %v6376_v37 = vmax.f32 %v6280_v17, 0.0  ;;  %v6284_v50 = vadd.f32 %v10596_v10, %v13824_v49  ;;  %v6321_v47 = vadd.f32 %v10358_v58, %v13744_v35  ;;  %v13945_v10 = vpop.permute.xlu1 %6230 }
 0x4b3   : > { %v5744_v48 = vpop.f32.mrb[33].mxu0  ;;  %6698 = vadd.xlane.f32.xlu1 %v6697_v16  ;;  %v6315_v24 = vadd.f32 %v13704_v34, %v5954_v56  ;;  %v6583_v5 = vmul.f32 %v13701_v60, %v6373_v4  ;;  %v6584_v31 = vmul.f32 %v13707_v33, %v6374_v61  ;;  %v6377_v9 = vmax.f32 %v6281_v12, 0.0 }
 0x4b4   : > { %v5746_v23 = vpop.f32.mrb[34].mxu0  ;;  %v10361_v27 = vpop.f32.mrb[92].mxu1  ;;  %v6379_v63 = vmax.f32 %v6283_v3, 0.0  ;;  %v13932_v8 = vmul.f32 %v13724_v38, %v6405_v44  ;;  %v6380_v62 = vmax.f32 %v6284_v50, 0.0  ;;  %v6417_v11 = vmax.f32 %v6321_v47, 0.0  ;;  %v15333_v47 = vld [vmem:[#allocation46_spill] sm:$0xff] }
 0x4b5   : > { %v5748_v43 = vpop.f32.mrb[35].mxu0  ;;  %v5967_v14 = vpop.f32.mrb[93].mxu1  ;;  %v6411_v42 = vmax.f32 %v6315_v24, 0.0  ;;  %v13935_v13 = vmul.f32 %v13724_v38, %v6399_v25  ;;  %v13938_v49 = vmul.f32 %v13724_v38, %v6414_v45  ;;  %v6408_v58 = vmax.f32 %v6312_v2, 0.0  ;;  %v15331_v25 = vld [vmem:[#allocation21_spill] sm:$0xff]  ;;  %v15332_v2 = vld [vmem:[#allocation22_spill] sm:$0xff] }
 0x4b6   : > { %v10362_v30 = vpop.f32.mrb[94].mxu1  ;;  %v6586_v4 = vmul.f32 %v13701_v60, %v6376_v37  ;;  %v6587_v61 = vmul.f32 %v13707_v33, %v6377_v9  ;;  %v6589_v44 = vmul.f32 %v13701_v60, %v6379_v63  ;;  %v6700_v52 = vadd.f32 %v6581_v55, %v6580_v0  ;;  %v15334_v0 = vld [vmem:[#allocation47_spill] sm:$0xff] }
 0x4b7   : > { %v5970_v29 = vpop.f32.mrb[95].mxu1  ;;  %15330 = vst [vmem:[#allocation38_spill] sm:$0xff] %v13938_v49  ;;  %v6701_v17 = vsel %vm6480_vm10, %v13863_v39, 0.0  ;;  %v10597_v12 = vadd.f32 %v5742_v41, %v15331_v25  ;;  %v6705_v3 = vadd.f32 %v6584_v31, %v6583_v5  ;;  %v6706_v45 = vsel %vm6480_vm10, %v13871_v20, 0.0  ;;  %v13956_v39 = vpop.permute.xlu0 %6235 }
 0x4b8   : > { %v10598_v37 = vadd.f32 %v5744_v48, %v15332_v2  ;;  %v6702_v50 = vadd.f32 %v6701_v17, %v6700_v52  ;;  %v10599_v24 = vadd.f32 %v5746_v23, %v15333_v47  ;;  %v13953_v9 = vadd.f32 %v10361_v27, %v13945_v10  ;;  %v15335_v17 = vld [vmem:[#allocation36_spill] sm:$0xff] }
 0x4b9   : > { %v10600_v55 = vadd.f32 %v5748_v43, %v15334_v0  ;;  %v6286_v63 = vadd.f32 %v10597_v12, %v13656_v7  ;;  %v6707_v49 = vadd.f32 %v6706_v45, %v6705_v3  ;;  %v6324_v5 = vadd.f32 %v13789_v1, %v5967_v14 }
 0x4ba   : > { %v5752_v36 = vpop.f32.mrb[36].mxu0  ;;  %v6287_v41 = vadd.f32 %v10598_v37, %v13656_v7  ;;  %v13962_v20 = vmul.f32 %v13724_v38, %v6408_v58  ;;  %6703 = vadd.xlane.f32.xlu0 %v6702_v50  ;;  %v6289_v48 = vadd.f32 %v10599_v24, %v13658_v46  ;;  %v13967_v27 = vadd.f32 %v10362_v30, %v13956_v39 }
 0x4bb   : > { %v5754_v56 = vpop.f32.mrb[37].mxu0  ;;  %v6290_v23 = vadd.f32 %v10600_v55, %v13658_v46  ;;  %v6382_v43 = vmax.f32 %v6286_v63, 0.0  ;;  %6708 = vadd.xlane.f32.xlu1 %v6707_v49  ;;  %v6420_v52 = vmax.f32 %v6324_v5, 0.0  ;;  %v13970_v25 = vadd.f32 %v15335_v17, %v5970_v29  ;;  %v15336_v63 = vld [vmem:[#allocation37_spill] sm:$0xff]  ;;  %v15337_v5 = vld [vmem:[#allocation48_spill] sm:$0xff] }
 0x4bc   : > { %v5756_v26 = vpop.f32.mrb[38].mxu0  ;;  %v6383_v31 = vmax.f32 %v6287_v41, 0.0  ;;  %v6590_v14 = vmul.f32 %v13707_v33, %v6380_v62  ;;  %v6385_v58 = vmax.f32 %v6289_v48, 0.0  ;;  %v13975_v46 = vmul.f32 %v13724_v38, %v6417_v11 }
 0x4bd   : > { %v5758_v16 = vpop.f32.mrb[39].mxu0  ;;  %v6386_v12 = vmax.f32 %v6290_v23, 0.0  ;;  %v13978_v30 = vmul.f32 %v13724_v38, %v6411_v42  ;;  %v6592_v37 = vmul.f32 %v13701_v60, %v6382_v43  ;;  %v13986_v11 = vmul.f32 %v13724_v38, %v6420_v52 }
 0x4be   : > { %v6593_v62 = vmul.f32 %v13707_v33, %v6383_v31  ;;  %v6454_v50 = vpack.c.bf16 %v6385_v58, %v6382_v43  ;;  %v6595_v0 = vmul.f32 %v13701_v60, %v6385_v58  ;;  %v6710_v55 = vadd.f32 %v6587_v61, %v6586_v4  ;;  %v15339_v58 = vld [vmem:[#allocation50_spill] sm:$0xff] }
 0x4bf   : > { %v6455_v47 = vpack.c.bf16 %v6386_v12, %v6383_v31  ;;  %v6596_v42 = vmul.f32 %v13707_v33, %v6386_v12  ;;  %v6711_v41 = vsel %vm6480_vm10, %v15336_v63, 0.0  ;;  %v10601_v48 = vadd.f32 %v5752_v36, %v15337_v5  ;;  %v15338_v31 = vld [vmem:[#allocation49_spill] sm:$0xff] }
 0x4c0   : > { %6503 = vst [vmem:[#allocation2 + $0xc0] sm:$0xff] %v6454_v50  ;;  %v6715_v23 = vadd.f32 %v6590_v14, %v6589_v44  ;;  %v6716_v43 = vsel %vm6480_vm10, %v13868_v6, 0.0  ;;  %v10602_v3 = vadd.f32 %v5754_v56, %v15338_v31  ;;  %v10603_v49 = vadd.f32 %v5756_v26, %v15339_v58  ;;  %v15341_v14 = vld [vmem:[#allocation52_spill] sm:$0xff] }
 0x4c1   : > { %6504 = vst [vmem:[#allocation2 + $0xc8] sm:$0xff] %v6455_v47  ;;  %v6712_v52 = vadd.f32 %v6711_v41, %v6710_v55  ;;  %v6292_v50 = vadd.f32 %v10601_v48, %v13662_v15  ;;  %v15340_v47 = vld [vmem:[#allocation51_spill] sm:$0xff]  ;;  %v6720_v12 = vadd.f32 %v6593_v62, %v6592_v37  ;;  %v6721_v36 = vsel %vm6480_vm10, %v13897_v28, 0.0  ;;  %v15342_v48 = vld [vmem:[#allocation53_spill] sm:$0xff] }
 0x4c2   : > { %v5762_v7 = vpop.f32.mrb[40].mxu0  ;;  %v10604_v2 = vadd.f32 %v5758_v16, %v15340_v47  ;;  %v6717_v4 = vadd.f32 %v6716_v43, %v6715_v23  ;;  %v6293_v61 = vadd.f32 %v10602_v3, %v13662_v15  ;;  %v6295_v63 = vadd.f32 %v10603_v49, %v13664_v53 }
 0x4c3   : > { %v5764_v45 = vpop.f32.mrb[41].mxu0  ;;  %6713 = vadd.xlane.f32.xlu0 %v6712_v52  ;;  %v6388_v6 = vmax.f32 %v6292_v50, 0.0  ;;  %v6722_v26 = vadd.f32 %v6721_v36, %v6720_v12  ;;  %v10605_v55 = vadd.f32 %v5762_v7, %v15341_v14  ;;  %v6725_v62 = vadd.f32 %v6596_v42, %v6595_v0  ;;  %v15343_v42 = vld [vmem:[#allocation54_spill] sm:$0xff]  ;;  %v15344_v52 = vld [vmem:[#allocation55_spill] sm:$0xff] }
 0x4c4   : > { %v5766_v29 = vpop.f32.mrb[42].mxu0  ;;  %v6296_v56 = vadd.f32 %v10604_v2, %v13664_v53  ;;  %6718 = vadd.xlane.f32.xlu1 %v6717_v4  ;;  %v6389_v16 = vmax.f32 %v6293_v61, 0.0  ;;  %v6391_v37 = vmax.f32 %v6295_v63, 0.0  ;;  %v6726_v15 = vsel %vm6480_vm10, %v13903_v32, 0.0  ;;  %v15345_v12 = vld [vmem:[#allocation7_spill] sm:$0xff]  ;;  %v15346_v63 = vld [vmem:[#allocation56_spill] sm:$0xff] }
 0x4c5   : > { %v5768_v24 = vpop.f32.mrb[43].mxu0  ;;  %v6598_v49 = vmul.f32 %v13701_v60, %v6388_v6  ;;  %v6298_v5 = vadd.f32 %v10605_v55, %v13670_v57  ;;  %v10606_v23 = vadd.f32 %v5764_v45, %v15342_v48  ;;  %v6727_v43 = vadd.f32 %v6726_v15, %v6725_v62  ;;  %v15349_v48 = vld [vmem:[#allocation59_spill] sm:$0xff] }
 0x4c6   : > { %v6392_v28 = vmax.f32 %v6296_v56, 0.0  ;;  %v6599_v2 = vmul.f32 %v13707_v33, %v6389_v16  ;;  %v6601_v7 = vmul.f32 %v13701_v60, %v6391_v37  ;;  %v10607_v58 = vadd.f32 %v5766_v29, %v15343_v42  ;;  %v15347_v37 = vld [vmem:[#allocation57_spill] sm:$0xff] }
 0x4c7   : > { %6723 = vadd.xlane.f32.xlu0 %v6722_v26  ;;  %v6394_v0 = vmax.f32 %v6298_v5, 0.0  ;;  %v6299_v32 = vadd.f32 %v10606_v23, %v13670_v57  ;;  %v10608_v50 = vadd.f32 %v5768_v24, %v15344_v52  ;;  %v6731_v45 = vsel %vm6480_vm10, %v15345_v12, 0.0  ;;  %v15350_v52 = vld [vmem:[#allocation60_spill] sm:$0xff] }
 0x4c8   : > { %v6602_v31 = vmul.f32 %v13707_v33, %v6392_v28  ;;  %6728 = vadd.xlane.f32.xlu1 %v6727_v43  ;;  %v6730_v47 = vadd.f32 %v6599_v2, %v6598_v49  ;;  %v6301_v56 = vadd.f32 %v10607_v58, %v13672_v22  ;;  %v6736_v29 = vsel %vm6480_vm10, %v13900_v54, 0.0  ;;  %v15348_v28 = vld [vmem:[#allocation58_spill] sm:$0xff] }
 0x4c9   : > { %v6604_v4 = vmul.f32 %v13701_v60, %v6394_v0  ;;  %v6395_v61 = vmax.f32 %v6299_v32, 0.0  ;;  %v6302_v26 = vadd.f32 %v10608_v50, %v13672_v22  ;;  %v6741_v43 = vsel %vm6480_vm10, %v13911_v51, 0.0 }
 0x4ca   : > { %v5772_v44 = vpop.f32.mrb[44].mxu0  ;;  %v6735_v6 = vadd.f32 %v6602_v31, %v6601_v7  ;;  %v6732_v57 = vadd.f32 %v6731_v45, %v6730_v47  ;;  %v6397_v49 = vmax.f32 %v6301_v56, 0.0  ;;  %v6746_v47 = vsel %vm6480_vm10, %v13935_v13, 0.0 }
 0x4cb   : > { %v5774_v41 = vpop.f32.mrb[45].mxu0  ;;  %v10609_v36 = vadd.f32 %v5772_v44, %v15346_v63  ;;  %v6605_v24 = vmul.f32 %v13707_v33, %v6395_v61  ;;  %v6398_v44 = vmax.f32 %v6302_v26, 0.0 }
 0x4cc   : > { %v5776_v3 = vpop.f32.mrb[46].mxu0  ;;  %v6737_v16 = vadd.f32 %v6736_v29, %v6735_v6  ;;  %v10610_v62 = vadd.f32 %v5774_v41, %v15347_v37  ;;  %6733 = vadd.xlane.f32.xlu0 %v6732_v57  ;;  %v6607_v41 = vmul.f32 %v13701_v60, %v6397_v49  ;;  %v15352_v6 = vld [vmem:[#allocation62_spill] sm:$0xff]  ;;  %v6751_v49 = vsel %vm6480_vm10, %v13907_v21, 0.0 }
 0x4cd   : > { %v5778_v53 = vpop.f32.mrb[47].mxu0  ;;  %v6304_v55 = vadd.f32 %v10609_v36, %v13678_v59  ;;  %v10611_v5 = vadd.f32 %v5776_v3, %v15348_v28  ;;  %v6740_v7 = vadd.f32 %v6605_v24, %v6604_v4  ;;  %v6608_v0 = vmul.f32 %v13707_v33, %v6398_v44  ;;  %v15351_v4 = vld [vmem:[#allocation61_spill] sm:$0xff]  ;;  %v15354_v44 = vld [vmem:[#allocation64_spill] sm:$0xff] }
 0x4ce   : > { %v10612_v22 = vadd.f32 %v5778_v53, %v15349_v48  ;;  %6738 = vadd.xlane.f32.xlu1 %v6737_v16  ;;  %v6305_v54 = vadd.f32 %v10610_v62, %v13678_v59 }
 0x4cf   : > { %v6400_v2 = vmax.f32 %v6304_v55, 0.0  ;;  %v6307_v3 = vadd.f32 %v10611_v5, %v13680_v18  ;;  %v6742_v58 = vadd.f32 %v6741_v43, %v6740_v7  ;;  %v6745_v59 = vadd.f32 %v6608_v0, %v6607_v41  ;;  %v15355_v43 = vld [vmem:[#allocation65_spill] sm:$0xff] }
 0x4d0   : > { %v6401_v42 = vmax.f32 %v6305_v54, 0.0  ;;  %v6308_v53 = vadd.f32 %v10612_v22, %v13680_v18  ;;  %v15353_v18 = vld [vmem:[#allocation63_spill] sm:$0xff] }
 0x4d1   : > { %v6610_v32 = vmul.f32 %v13701_v60, %v6400_v2  ;;  %v6403_v12 = vmax.f32 %v6307_v3, 0.0  ;;  %6743 = vadd.xlane.f32.xlu0 %v6742_v58  ;;  %v6747_v36 = vadd.f32 %v6746_v47, %v6745_v59 }
 0x4d2   : > { %v5782_v14 = vpop.f32.mrb[48].mxu0  ;;  %v6611_v51 = vmul.f32 %v13707_v33, %v6401_v42  ;;  %v6404_v45 = vmax.f32 %v6308_v53, 0.0  ;;  %v15356_v53 = vld [vmem:[#allocation66_spill] sm:$0xff] }
 0x4d3   : > { %v5784_v15 = vpop.f32.mrb[49].mxu0  ;;  %v10613_v50 = vadd.f32 %v5782_v14, %v15350_v52  ;;  %v6613_v29 = vmul.f32 %v13701_v60, %v6403_v12  ;;  %6748 = vadd.xlane.f32.xlu1 %v6747_v36  ;;  %v15357_v52 = vld [vmem:[#allocation67_spill] sm:$0xff] }
 0x4d4   : > { %v5786_v23 = vpop.f32.mrb[50].mxu0  ;;  %v10614_v61 = vadd.f32 %v5784_v15, %v15351_v4  ;;  %v6614_v14 = vmul.f32 %v13707_v33, %v6404_v45  ;;  %v6750_v15 = vadd.f32 %v6611_v51, %v6610_v32  ;;  %v15358_v45 = vld [vmem:[#allocation68_spill] sm:$0xff] }
 0x4d5   : > { %v5788_v31 = vpop.f32.mrb[51].mxu0  ;;  %v6310_v63 = vadd.f32 %v10613_v50, %v13697_v19  ;;  %v10615_v56 = vadd.f32 %v5786_v23, %v15352_v6 }
 0x4d6   : > { %v10616_v26 = vadd.f32 %v5788_v31, %v15353_v18  ;;  %v6311_v55 = vadd.f32 %v10614_v61, %v13697_v19  ;;  %v6755_v5 = vadd.f32 %v6614_v14, %v6613_v29  ;;  %v6752_v7 = vadd.f32 %v6751_v49, %v6750_v15  ;;  %v15359_v29 = vld [vmem:[#allocation69_spill] sm:$0xff] }
 0x4d7   : > { %v6406_v24 = vmax.f32 %v6310_v63, 0.0  ;;  %v6313_v16 = vadd.f32 %v10615_v56, %v13704_v34  ;;  %v6766_v56 = vsel %vm6480_vm10, %v13978_v30, 0.0  ;;  %v15362_v15 = vmax.f32 %v13970_v25, 0.0 }
 0x4d8   : > { %v6314_v37 = vadd.f32 %v10616_v26, %v13704_v34  ;;  %v6407_v23 = vmax.f32 %v6311_v55, 0.0  ;;  %v6756_v34 = vsel %vm6480_vm10, %v13932_v8, 0.0  ;;  %6753 = vadd.xlane.f32.xlu0 %v6752_v7  ;;  %v6761_v8 = vsel %vm6480_vm10, %v13962_v20, 0.0 }
 0x4d9   : > { %v6616_v22 = vmul.f32 %v13701_v60, %v6406_v24  ;;  %v6409_v2 = vmax.f32 %v6313_v16, 0.0  ;;  %v6757_v42 = vadd.f32 %v6756_v34, %v6755_v5  ;;  %v15360_v16 = vld [vmem:[#allocation70_spill] sm:$0xff]  ;;  %v6633_v30 = vmul.f32 %v13724_v38, %v15362_v15 }
 0x4da   : > { %v5792_v57 = vpop.f32.mrb[52].mxu0  ;;  %v6410_v54 = vmax.f32 %v6314_v37, 0.0  ;;  %v6617_v41 = vmul.f32 %v13707_v33, %v6407_v23 }
 0x4db   : > { %v5794_v13 = vpop.f32.mrb[53].mxu0  ;;  %v10617_v28 = vadd.f32 %v5792_v57, %v15354_v44  ;;  %v6619_v21 = vmul.f32 %v13701_v60, %v6409_v2  ;;  %6758 = vadd.xlane.f32.xlu1 %v6757_v42 }
 0x4dc   : > { %v5796_v62 = vpop.f32.mrb[54].mxu0  ;;  %v10618_v31 = vadd.f32 %v5794_v13, %v15355_v43  ;;  %v6620_v0 = vmul.f32 %v13707_v33, %v6410_v54  ;;  %v6760_v59 = vadd.f32 %v6617_v41, %v6616_v22  ;;  %v15363_v54 = vld [vmem:[#allocation38_spill] sm:$0xff] }
 0x4dd   : > { %v5798_v48 = vpop.f32.mrb[55].mxu0  ;;  %v6316_v19 = vadd.f32 %v10617_v28, %v13739_v40  ;;  %v10619_v58 = vadd.f32 %v5796_v62, %v15356_v53  ;;  %v15361_v62 = vld [vmem:[#allocation71_spill] sm:$0xff]  ;;  %v6771_v7 = vsel %vm6480_vm10, %v15363_v54, 0.0 }
 0x4de   : > { %v6317_v3 = vadd.f32 %v10618_v31, %v13739_v40  ;;  %v10620_v50 = vadd.f32 %v5798_v48, %v15357_v52  ;;  %v6765_v61 = vadd.f32 %v6620_v0, %v6619_v21  ;;  %v6762_v6 = vadd.f32 %v6761_v8, %v6760_v59  ;;  %v15364_v0 = vld [vmem:[#allocation24_spill] sm:$0xff] }
 0x4df   : > { %v6412_v32 = vmax.f32 %v6316_v19, 0.0  ;;  %v6319_v36 = vadd.f32 %v10619_v58, %v13744_v35 }
 0x4e0   : > { %v6413_v12 = vmax.f32 %v6317_v3, 0.0  ;;  %v6320_v40 = vadd.f32 %v10620_v50, %v13744_v35  ;;  %v6767_v57 = vadd.f32 %v6766_v56, %v6765_v61  ;;  %6763 = vadd.xlane.f32.xlu0 %v6762_v6  ;;  %v15365_v3 = vld [vmem:[#allocation23_spill] sm:$0xff]  ;;  %v6781_v61 = vsel %vm6480_vm10, %v13986_v11, 0.0 }
 0x4e1   : > { %v6622_v51 = vmul.f32 %v13701_v60, %v6412_v32  ;;  %v6415_v24 = vmax.f32 %v6319_v36, 0.0  ;;  %v6786_v36 = vsel %vm6480_vm10, %v6633_v30, 0.0 }
 0x4e2   : > { %v5802_v47 = vpop.f32.mrb[56].mxu0  ;;  %v6623_v20 = vmul.f32 %v13707_v33, %v6413_v12  ;;  %v6416_v55 = vmax.f32 %v6320_v40, 0.0  ;;  %6768 = vadd.xlane.f32.xlu1 %v6767_v57  ;;  %v15367_v12 = vld [vmem:[#allocation73_spill] sm:$0xff] }
 0x4e3   : > { %v10621_v4 = vadd.f32 %v5802_v47, %v15358_v45  ;;  %v5804_v63 = vpop.f32.mrb[57].mxu0  ;;  %v6625_v5 = vmul.f32 %v13701_v60, %v6415_v24  ;;  %v15366_v47 = vld [vmem:[#allocation72_spill] sm:$0xff]  ;;  %v15369_v24 = vmax.f32 %v13967_v27, 0.0 }
 0x4e4   : > { %v5806_v18 = vpop.f32.mrb[58].mxu0  ;;  %v10622_v14 = vadd.f32 %v5804_v63, %v15359_v29  ;;  %v6770_v28 = vadd.f32 %v6623_v20, %v6622_v51  ;;  %v6626_v48 = vmul.f32 %v13707_v33, %v6416_v55  ;;  %v15368_v20 = vmax.f32 %v13953_v9, 0.0 }
 0x4e5   : > { %v6322_v26 = vadd.f32 %v10621_v4, %v13789_v1  ;;  %v5808_v13 = vpop.f32.mrb[59].mxu0  ;;  %v10623_v37 = vadd.f32 %v5806_v18, %v15360_v16  ;;  %v6639_v55 = vmul.f32 %v13724_v38, %v15369_v24 }
 0x4e6   : > { %v10624_v35 = vadd.f32 %v5808_v13, %v15361_v62  ;;  %v6323_v44 = vadd.f32 %v10622_v14, %v13789_v1  ;;  %v6772_v19 = vadd.f32 %v6771_v7, %v6770_v28  ;;  %v6775_v43 = vadd.f32 %v6626_v48, %v6625_v5 }
 0x4e7   : > { %v6418_v49 = vmax.f32 %v6322_v26, 0.0  ;;  %v6325_v23 = vadd.f32 %v10623_v37, %v15335_v17  ;;  %v6776_v1 = vsel %vm6480_vm10, %v13975_v46, 0.0  ;;  %v6796_v15 = vsel %vm6480_vm10, %v6639_v55, 0.0 }
 0x4e8   : > { %v6419_v22 = vmax.f32 %v6323_v44, 0.0  ;;  %v6326_v2 = vadd.f32 %v10624_v35, %v15335_v17  ;;  %6773 = vadd.xlane.f32.xlu0 %v6772_v19  ;;  %v6777_v17 = vadd.f32 %v6776_v1, %v6775_v43 }
 0x4e9   : > { %v6628_v25 = vmul.f32 %v13701_v60, %v6418_v49  ;;  %v6421_v41 = vmax.f32 %v6325_v23, 0.0 }
 0x4ea   : > { %v5812_v34 = vpop.f32.mrb[60].mxu0  ;;  %v6629_v31 = vmul.f32 %v13707_v33, %v6419_v22  ;;  %v6422_v21 = vmax.f32 %v6326_v2, 0.0  ;;  %6778 = vadd.xlane.f32.xlu1 %v6777_v17 }
 0x4eb   : > { %v10625_v32 = vadd.f32 %v5812_v34, %v15364_v0  ;;  %v5814_v42 = vpop.f32.mrb[61].mxu0  ;;  %v6631_v52 = vmul.f32 %v13701_v60, %v6421_v41 }
 0x4ec   : > { %v10626_v53 = vadd.f32 %v5814_v42, %v15365_v3  ;;  %v5816_v58 = vpop.f32.mrb[62].mxu0  ;;  %v6632_v50 = vmul.f32 %v13707_v33, %v6422_v21  ;;  %v6780_v4 = vadd.f32 %v6629_v31, %v6628_v25 }
 0x4ed   : > { %v5818_v59 = vpop.f32.mrb[63].mxu0  ;;  %v6328_v8 = vadd.f32 %v10625_v32, %v13945_v10  ;;  %v10627_v51 = vadd.f32 %v5816_v58, %v15366_v47 }
 0x4ee   : > { %v6329_v46 = vadd.f32 %v10626_v53, %v13945_v10  ;;  %v10628_v45 = vadd.f32 %v5818_v59, %v15367_v12  ;;  %v6785_v63 = vadd.f32 %v6632_v50, %v6631_v52  ;;  %v6636_v10 = vmul.f32 %v13724_v38, %v15368_v20  ;;  %v6848_v38 = vld [vmem:[%s15099_s4] sm:$0xff] }
 0x4ef   : > { %v6424_v40 = vmax.f32 %v6328_v8, 0.0  ;;  %v6331_v56 = vadd.f32 %v10627_v51, %v13956_v39  ;;  %v6782_v26 = vadd.f32 %v6781_v61, %v6780_v4  ;;  %10395 = vmatprep.mubr.f32.mxu1 %v6848_v38  ;;  %v6856_v38 = vld [vmem:[%s15099_s4 + $0x40] sm:$0xff] }
 0x4f0   : > { %v6425_v6 = vmax.f32 %v6329_v46, 0.0  ;;  %v6332_v18 = vadd.f32 %v10628_v45, %v13956_v39  ;;  %v6787_v57 = vadd.f32 %v6786_v36, %v6785_v63  ;;  %v6791_v37 = vsel %vm6480_vm10, %v6636_v10, 0.0 }
 0x4f1   : > { %v6634_v29 = vmul.f32 %v13701_v60, %v6424_v40  ;;  %v6427_v11 = vmax.f32 %v6331_v56, 0.0  ;;  %6783 = vadd.xlane.f32.xlu0 %v6782_v26 }
 0x4f2   : > { %v6635_v14 = vmul.f32 %v13707_v33, %v6425_v6  ;;  %v6428_v13 = vmax.f32 %v6332_v18, 0.0  ;;  %6788 = vadd.xlane.f32.xlu1 %v6787_v57 }
 0x4f3   : > { %v6637_v39 = vmul.f32 %v13701_v60, %v6427_v11 }
 0x4f4   : > { %v6638_v9 = vmul.f32 %v13707_v33, %v6428_v13  ;;  %v6790_v16 = vadd.f32 %v6635_v14, %v6634_v29 }
 0x4f6   : > { %v6795_v62 = vadd.f32 %v6638_v9, %v6637_v39  ;;  %v6792_v35 = vadd.f32 %v6791_v37, %v6790_v16  ;;  %v6849_v9 = vld [vmem:[%s15099_s4 + $0x8] sm:$0xff]  ;;  %v6850_v16 = vld [vmem:[%s15099_s4 + $0x10] sm:$0xff]  ;;  %v6851_v37 = vld [vmem:[%s15099_s4 + $0x18] sm:$0xff] }
 0x4f8   : > { %v6797_v30 = vadd.f32 %v6796_v15, %v6795_v62  ;;  %6793 = vadd.xlane.f32.xlu0 %v6792_v35  ;;  %v6852_v62 = vld [vmem:[%s15099_s4 + $0x20] sm:$0xff]  ;;  %v6853_v35 = vld [vmem:[%s15099_s4 + $0x28] sm:$0xff]  ;;  %v6854_v15 = vld [vmem:[%s15099_s4 + $0x30] sm:$0xff] }
 0x4fa   : > { %6798 = vadd.xlane.f32.xlu1 %v6797_v30  ;;  %v6855_v30 = vld [vmem:[%s15099_s4 + $0x38] sm:$0xff] }
 0x514   : > { %v6644_v49 = vpop.xlane.xlu1 %6643 }
 0x51a   : > { %v6649_v27 = vpop.xlane.xlu0 %6648 }
 0x51d   : > { %v6659_v44 = vpop.xlane.xlu1 %6658 }
 0x520   : > { %v6654_v60 = vpop.xlane.xlu0 %6653 }
 0x524   : > { %v6664_v33 = vpop.xlane.xlu0 %6663 }
 0x526   : > { %v6669_v28 = vpop.xlane.xlu1 %6668 }
 0x52d   : > { %v6674_v5 = vpop.xlane.xlu0 %6673 }
 0x52e   : > { %v6679_v48 = vpop.xlane.xlu1 %6678 }
 0x536   : > { %v6684_v22 = vpop.xlane.xlu0 %6683 }
 0x537   : > { %v6689_v23 = vpop.xlane.xlu1 %6688 }
 0x53f   : > { %v6694_v2 = vpop.xlane.xlu0 %6693 }
 0x540   : > { %v6699_v54 = vpop.xlane.xlu1 %6698 }
 0x547   : > { %v6704_v7 = vpop.xlane.xlu0 %6703 }
 0x548   : > { %v6709_v25 = vpop.xlane.xlu1 %6708 }
 0x550   : > { %v6714_v19 = vpop.xlane.xlu0 %6713 }
 0x551   : > { %v6719_v34 = vpop.xlane.xlu1 %6718 }
 0x554   : > { %v6724_v43 = vpop.xlane.xlu0 %6723 }
 0x555   : > { %v6729_v1 = vpop.xlane.xlu1 %6728  ;;  %v6832_v31 = vadd.f32 %v6724_v43, %v6644_v49  ;;  %v6858_v49 = vld [vmem:[%s15099_s4 + $0x50] sm:$0xff] }
 0x556   : > { %v6833_v41 = vadd.f32 %v6729_v1, %v6649_v27  ;;  %v6857_v27 = vld [vmem:[%s15099_s4 + $0x48] sm:$0xff]  ;;  %v6866_v43 = vld [vmem:[%s15100_s5 + $0x10] sm:$0xff] }
 0x558   : > { %v10499_v21 = vpack.c.bf16 %v6833_v41, %v6832_v31 }
 0x559   : > { %v6734_v0 = vpop.xlane.xlu0 %6733 }
 0x55a   : > { %10500 = vmatprep.subr.bf16.mxu1 %v10499_v21  ;;  %v6834_v42 = vadd.f32 %v6734_v0, %v6654_v60  ;;  %v6859_v60 = vld [vmem:[%s15099_s4 + $0x58] sm:$0xff] }
 0x55b   : > { %v6739_v32 = vpop.xlane.xlu1 %6738  ;;  %10502 = vmatpush3.bf16.msra.mxu1 %v10499_v21 }
 0x55c   : > { %v6835_v17 = vadd.f32 %v6739_v32, %v6659_v44  ;;  %v6860_v44 = vld [vmem:[%s15099_s4 + $0x60] sm:$0xff] }
 0x55e   : > { %v10503_v3 = vpack.c.bf16 %v6835_v17, %v6834_v42  ;;  %v6744_v53 = vpop.xlane.xlu0 %6743  ;;  %v6869_v42 = vld [vmem:[%s15100_s5 + $0x28] sm:$0xff] }
 0x55f   : > { %v6836_v52 = vadd.f32 %v6744_v53, %v6664_v33  ;;  %v6861_v33 = vld [vmem:[%s15099_s4 + $0x68] sm:$0xff] }
 0x560   : > { %10504 = vmatprep.subr.bf16.mxu1 %v10503_v3  ;;  %v6749_v58 = vpop.xlane.xlu1 %6748 }
 0x561   : > { %10506 = vmatpush3.bf16.msra.mxu1 %v10503_v3  ;;  %v6837_v50 = vadd.f32 %v6749_v58, %v6669_v28  ;;  %v6862_v28 = vld [vmem:[%s15099_s4 + $0x70] sm:$0xff]  ;;  %v6868_v3 = vld [vmem:[%s15100_s5 + $0x20] sm:$0xff] }
 0x563   : > { %v10507_v59 = vpack.c.bf16 %v6837_v50, %v6836_v52 }
 0x565   : > { %10508 = vmatprep.subr.bf16.mxu1 %v10507_v59  ;;  %v6754_v8 = vpop.xlane.xlu0 %6753 }
 0x566   : > { %10510 = vmatpush3.bf16.msra.mxu1 %v10507_v59  ;;  %v6838_v47 = vadd.f32 %v6754_v8, %v6674_v5  ;;  %v6863_v5 = vld [vmem:[%s15099_s4 + $0x78] sm:$0xff] }
 0x568   : > { %v6759_v46 = vpop.xlane.xlu1 %6758 }
 0x569   : > { %v6839_v51 = vadd.f32 %v6759_v46, %v6679_v48  ;;  %v7041_v48 = vld [vmem:[%s15101_s6] sm:$0xff]  ;;  %v6871_v46 = vld [vmem:[%s15100_s5 + $0x38] sm:$0xff] }
 0x56b   : > { %v10511_v12 = vpack.c.bf16 %v6839_v51, %v6838_v47  ;;  %v6870_v51 = vld [vmem:[%s15100_s5 + $0x30] sm:$0xff] }
 0x56d   : > { %v6764_v45 = vpop.xlane.xlu0 %6763  ;;  %10512 = vmatprep.subr.bf16.mxu1 %v10511_v12 }
 0x56e   : > { %v6840_v61 = vadd.f32 %v6764_v45, %v6684_v22  ;;  %10514 = vmatpush3.bf16.msra.mxu1 %v10511_v12  ;;  %v6865_v22 = vld [vmem:[%s15100_s5 + $0x8] sm:$0xff] }
 0x56f   : > { %v6769_v4 = vpop.xlane.xlu1 %6768 }
 0x570   : > { %v6841_v63 = vadd.f32 %v6769_v4, %v6689_v23  ;;  %v6864_v23 = vld [vmem:[%s15100_s5] sm:$0xff] }
 0x572   : > { %v10515_v36 = vpack.c.bf16 %v6841_v63, %v6840_v61 }
 0x574   : > { %10516 = vmatprep.subr.bf16.mxu1 %v10515_v36 }
 0x575   : > { %v6774_v40 = vpop.xlane.xlu0 %6773  ;;  %10518 = vmatpush3.bf16.msra.mxu1 %v10515_v36 }
 0x576   : > { %v6842_v56 = vadd.f32 %v6774_v40, %v6694_v2  ;;  %v6873_v40 = vld [vmem:[%s15100_s5 + $0x48] sm:$0xff] }
 0x577   : > { %v6779_v6 = vpop.xlane.xlu1 %6778 }
 0x578   : > { %v6843_v18 = vadd.f32 %v6779_v6, %v6699_v54 }
 0x57a   : > { %v10519_v20 = vpack.c.bf16 %v6843_v18, %v6842_v56  ;;  %v6872_v56 = vld [vmem:[%s15100_s5 + $0x40] sm:$0xff] }
 0x57c   : > { %10520 = vmatprep.subr.bf16.mxu1 %v10519_v20 }
 0x57d   : > { %10522 = vmatpush3.bf16.msra.mxu1 %v10519_v20 }
 0x57e   : > { %v6784_v10 = vpop.xlane.xlu0 %6783 }
 0x57f   : > { %v6789_v26 = vpop.xlane.xlu1 %6788  ;;  %v6844_v57 = vadd.f32 %v6784_v10, %v6704_v7 }
 0x580   : > { %v6845_v29 = vadd.f32 %v6789_v26, %v6709_v25 }
 0x582   : > { %v10523_v14 = vpack.c.bf16 %v6845_v29, %v6844_v57 }
 0x584   : > { %10524 = vmatprep.subr.bf16.mxu1 %v10523_v14 }
 0x585   : > { %v6794_v11 = vpop.xlane.xlu0 %6793  ;;  %10526 = vmatpush3.bf16.msra.mxu1 %v10523_v14  ;;  %v6875_v14 = vld [vmem:[%s15100_s5 + $0x58] sm:$0xff] }
 0x586   : > { %v6846_v24 = vadd.f32 %v6794_v11, %v6714_v19  ;;  %v6867_v19 = vld [vmem:[%s15100_s5 + $0x18] sm:$0xff] }
 0x587   : > { %v6799_v13 = vpop.xlane.xlu1 %6798 }
 0x588   : > { %v6847_v55 = vadd.f32 %v6799_v13, %v6719_v34  ;;  %v6874_v13 = vld [vmem:[%s15100_s5 + $0x50] sm:$0xff] }
 0x58a   : > { %v10527_v39 = vpack.c.bf16 %v6847_v55, %v6846_v24 }
 0x58c   : > { %10528 = vmatprep.subr.bf16.mxu1 %v10527_v39 }
 0x58d   : > { %10530 = vmatpush3.bf16.msra.mxu1 %v10527_v39 }
 0x590   : > { %10396 = vmatmul.mubr.f32.vlgmr.msra.gmra.mrb[96].mxu1 %v6849_v9 }
 0x591   : > { %10398 = vmatprep.mubr.f32.mxu1 %v6850_v16 }
 0x594   : > { %10399 = vmatmul.mubr.f32.gmra.mrb[98].mxu1 %v6851_v37 }
 0x595   : > { %10401 = vmatprep.mubr.f32.mxu1 %v6852_v62  ;;  %v6877_v62 = vld [vmem:[%s15100_s5 + $0x68] sm:$0xff] }
 0x598   : > { %10402 = vmatmul.mubr.f32.gmra.mrb[100].mxu1 %v6853_v35 }
 0x599   : > { %10404 = vmatprep.mubr.f32.mxu1 %v6854_v15  ;;  %v6876_v15 = vld [vmem:[%s15100_s5 + $0x60] sm:$0xff] }
 0x59c   : > { %10405 = vmatmul.mubr.f32.gmra.mrb[102].mxu1 %v6855_v30 }
 0x59d   : > { %10407 = vmatprep.mubr.f32.mxu1 %v6856_v38 }
 0x5a0   : > { %10408 = vmatmul.mubr.f32.gmra.mrb[104].mxu1 %v6857_v27 }
 0x5a1   : > { %10410 = vmatprep.mubr.f32.mxu1 %v6858_v49 }
 0x5a4   : > { %10411 = vmatmul.mubr.f32.gmra.mrb[106].mxu1 %v6859_v60 }
 0x5a5   : > { %10413 = vmatprep.mubr.f32.mxu1 %v6860_v44 }
 0x5a8   : > { %10414 = vmatmul.mubr.f32.gmra.mrb[108].mxu1 %v6861_v33  ;;  %v6879_v33 = vld [vmem:[%s15100_s5 + $0x78] sm:$0xff] }
 0x5a9   : > { %10416 = vmatprep.mubr.f32.mxu1 %v6862_v28 }
 0x5ac   : > { %10417 = vmatmul.mubr.f32.gmra.mrb[110].mxu1 %v6863_v5  ;;  %v6878_v5 = vld [vmem:[%s15100_s5 + $0x70] sm:$0xff] }
 0x5ad   : > { %10451 = vmatprep.mubr.f32.mxu1 %v7041_v48 }
 0x663   : > { %v10397_v2 = vpop.f32.mrb[96].mxu1 }
 0x664   : > { %v6952_v54 = vadd.f32 %v10397_v2, %v6865_v22  ;;  %v6946_v7 = vpop.f32.mrb[97].mxu1 }
 0x665   : > { %v6947_v25 = vadd.f32 %v6946_v7, %v6864_v23 }
 0x666   : > { %v7026_v34 = vmax.f32 %v6952_v54, 0.0 }
 0x667   : > { %v7025_v1 = vmax.f32 %v6947_v25, 0.0  ;;  %v10400_v31 = vpop.f32.mrb[98].mxu1 }
 0x668   : > { %v6962_v41 = vadd.f32 %v10400_v31, %v6867_v19  ;;  %v6956_v21 = vpop.f32.mrb[99].mxu1  ;;  %v7044_v31 = vld [vmem:[%s15101_s6 + $0x18] sm:$0xff] }
 0x669   : > { %v10531_v0 = vpack.c.bf16 %v7026_v34, %v7025_v1  ;;  %v6957_v32 = vadd.f32 %v6956_v21, %v6866_v43  ;;  %v7042_v43 = vld [vmem:[%s15101_s6 + $0x8] sm:$0xff]  ;;  %v7043_v1 = vld [vmem:[%s15101_s6 + $0x10] sm:$0xff] }
 0x66a   : > { %v7028_v17 = vmax.f32 %v6962_v41, 0.0  ;;  %v7045_v41 = vld [vmem:[%s15101_s6 + $0x20] sm:$0xff]  ;;  %v7046_v21 = vld [vmem:[%s15101_s6 + $0x28] sm:$0xff] }
 0x66b   : > { %v7027_v53 = vmax.f32 %v6957_v32, 0.0  ;;  %v10403_v58 = vpop.f32.mrb[100].mxu1  ;;  %10532 = vmatprep.subr.bf16.mxu1 %v10531_v0  ;;  %v7048_v32 = vld [vmem:[%s15101_s6 + $0x38] sm:$0xff] }
 0x66c   : > { %v6972_v52 = vadd.f32 %v10403_v58, %v6869_v42  ;;  %v6966_v50 = vpop.f32.mrb[101].mxu1  ;;  %10534 = vmatpush3.bf16.msra.mxu1 %v10531_v0  ;;  %v7047_v0 = vld [vmem:[%s15101_s6 + $0x30] sm:$0xff]  ;;  %v7049_v42 = vld [vmem:[%s15101_s6 + $0x40] sm:$0xff] }
 0x66d   : > { %v10535_v59 = vpack.c.bf16 %v7028_v17, %v7027_v53  ;;  %v6967_v8 = vadd.f32 %v6966_v50, %v6868_v3  ;;  %v7050_v17 = vld [vmem:[%s15101_s6 + $0x48] sm:$0xff]  ;;  %v7051_v3 = vld [vmem:[%s15101_s6 + $0x50] sm:$0xff]  ;;  %v7052_v53 = vld [vmem:[%s15101_s6 + $0x58] sm:$0xff] }
 0x66e   : > { %v7030_v47 = vmax.f32 %v6972_v52, 0.0  ;;  %v7053_v58 = vld [vmem:[%s15101_s6 + $0x60] sm:$0xff]  ;;  %v7054_v52 = vld [vmem:[%s15101_s6 + $0x68] sm:$0xff]  ;;  %v7055_v50 = vld [vmem:[%s15101_s6 + $0x70] sm:$0xff] }
 0x66f   : > { %v7029_v12 = vmax.f32 %v6967_v8, 0.0  ;;  %v10406_v45 = vpop.f32.mrb[102].mxu1  ;;  %10536 = vmatprep.subr.bf16.mxu1 %v10535_v59  ;;  %v7057_v8 = vld [vmem:[%s15101_s6 + $0x80] sm:$0xff] }
 0x670   : > { %v6982_v4 = vadd.f32 %v10406_v45, %v6871_v46  ;;  %v6976_v61 = vpop.f32.mrb[103].mxu1  ;;  %10538 = vmatpush3.bf16.msra.mxu1 %v10535_v59  ;;  %v7056_v59 = vld [vmem:[%s15101_s6 + $0x78] sm:$0xff]  ;;  %v7058_v46 = vld [vmem:[%s15101_s6 + $0x88] sm:$0xff] }
 0x671   : > { %v10539_v63 = vpack.c.bf16 %v7030_v47, %v7029_v12  ;;  %v6977_v36 = vadd.f32 %v6976_v61, %v6870_v51 }
 0x672   : > { %v7032_v6 = vmax.f32 %v6982_v4, 0.0 }
 0x673   : > { %v7031_v18 = vmax.f32 %v6977_v36, 0.0  ;;  %v10409_v20 = vpop.f32.mrb[104].mxu1  ;;  %10540 = vmatprep.subr.bf16.mxu1 %v10539_v63 }
 0x674   : > { %v6992_v10 = vadd.f32 %v10409_v20, %v6873_v40  ;;  %v6986_v26 = vpop.f32.mrb[105].mxu1  ;;  %10542 = vmatpush3.bf16.msra.mxu1 %v10539_v63 }
 0x675   : > { %v10543_v57 = vpack.c.bf16 %v7032_v6, %v7031_v18  ;;  %v6987_v29 = vadd.f32 %v6986_v26, %v6872_v56 }
 0x676   : > { %v7034_v11 = vmax.f32 %v6992_v10, 0.0 }
 0x677   : > { %v7033_v24 = vmax.f32 %v6987_v29, 0.0  ;;  %v10412_v55 = vpop.f32.mrb[106].mxu1  ;;  %10544 = vmatprep.subr.bf16.mxu1 %v10543_v57  ;;  %v7073_v29 = vld [vmem:[%s15102_s7] sm:$0xff] }
 0x678   : > { %v7002_v39 = vadd.f32 %v10412_v55, %v6875_v14  ;;  %v6996_v9 = vpop.f32.mrb[107].mxu1  ;;  %10546 = vmatpush3.bf16.msra.mxu1 %v10543_v57  ;;  %v7074_v14 = vld [vmem:[%s15102_s7 + $0x80] sm:$0xff] }
 0x679   : > { %v10547_v16 = vpack.c.bf16 %v7034_v11, %v7033_v24  ;;  %v6997_v37 = vadd.f32 %v6996_v9, %v6874_v13 }
 0x67a   : > { %v7036_v35 = vmax.f32 %v7002_v39, 0.0 }
 0x67b   : > { %v7035_v30 = vmax.f32 %v6997_v37, 0.0  ;;  %v10415_v38 = vpop.f32.mrb[108].mxu1  ;;  %10548 = vmatprep.subr.bf16.mxu1 %v10547_v16 }
 0x67c   : > { %v7012_v27 = vadd.f32 %v10415_v38, %v6877_v62  ;;  %v7006_v49 = vpop.f32.mrb[109].mxu1  ;;  %10550 = vmatpush3.bf16.msra.mxu1 %v10547_v16 }
 0x67d   : > { %v10551_v60 = vpack.c.bf16 %v7036_v35, %v7035_v30  ;;  %v7007_v44 = vadd.f32 %v7006_v49, %v6876_v15 }
 0x67e   : > { %v7038_v28 = vmax.f32 %v7012_v27, 0.0 }
 0x67f   : > { %v7037_v48 = vmax.f32 %v7007_v44, 0.0  ;;  %v10418_v22 = vpop.f32.mrb[110].mxu1  ;;  %10552 = vmatprep.subr.bf16.mxu1 %v10551_v60 }
 0x680   : > { %v7022_v23 = vadd.f32 %v10418_v22, %v6879_v33  ;;  %v7016_v2 = vpop.f32.mrb[111].mxu1  ;;  %10554 = vmatpush3.bf16.msra.mxu1 %v10551_v60  ;;  %v11656_v60 = vmov 1966171168   ;;  %v9193_v22 = vld [vmem:[#allocation2 + $0xd0] sm:$0xf] }
 0x681   : > { %v10555_v54 = vpack.c.bf16 %v7038_v28, %v7037_v48  ;;  %v7017_v7 = vadd.f32 %v7016_v2, %v6878_v5  ;;  %v7301_v44 = vunpack.c.l.s4 %v11656_v60  ;;  %v7365_v28 = vld [vmem:[#allocation2] ss:$8 sps:$4 sm:$0xff]   ;;  %v9190_v48 = vld [vmem:[#allocation2 + $0x10] sm:$0xf] }
 0x682   : > { %v7040_v25 = vmax.f32 %v7022_v23, 0.0  ;;  %v7368_v5 = vld [vmem:[#allocation2 + $0xc0] ss:$8 sps:$4 sm:$0xff]  }
 0x683   : > { %v7039_v19 = vmax.f32 %v7017_v7, 0.0  ;;  %10556 = vmatprep.subr.bf16.mxu1 %v10555_v54  ;;  %v7302_v33 = vunpack.c.0.s8 %v7301_v44  ;;  %v15370_v23 = vld [vmem:[#allocation6_spill] sm:$0xff] }
 0x684   : > { %10558 = vmatpush3.bf16.msra.mxu1 %v10555_v54  ;;  %v11573_v54 = vld [vmem:[#allocation2] sm:$0xff] }
 0x685   : > { %v10559_v34 = vpack.c.bf16 %v7040_v25, %v7039_v19  ;;  %v14272_v2 = vsub.s32 %v7302_v33, %v15370_v23  ;;  %v7282_v7 = vunpack.c.l.bf16 %v11573_v54  ;;  %v11574_v25 = vld [vmem:[#allocation2 + $0xc0] sm:$0xff] }
 0x686   : > { %v7290_v19 = vunpack.c.l.bf16 %v11574_v25 }
 0x687   : > { %10560 = vmatprep.subr.bf16.mxu1 %v10559_v34 }
 0x688   : > { %10562 = vmatpush3.bf16.msra.mxu1 %v10559_v34  ;;  %v7366_v34 = vunpack.c.l.bf16 %v7365_v28 }
 0x68b   : > { %10452 = vmatmul.mubr.f32.vlgmr.msra.gmra.mrb[112].mxu1 %v7042_v43  ;;  %v7369_v43 = vunpack.c.l.bf16 %v7368_v5 }
 0x68c   : > { %10454 = vmatprep.mubr.f32.mxu1 %v7043_v1 }
 0x68f   : > { %10455 = vmatmul.mubr.f32.gmra.mrb[114].mxu1 %v7044_v31 }
 0x690   : > { %10457 = vmatprep.mubr.f32.mxu1 %v7045_v41  ;;  %v8279_v41 = vunpack.c.h.bf16 %v7365_v28 }
 0x693   : > { %10458 = vmatmul.mubr.f32.gmra.mrb[116].mxu1 %v7046_v21  ;;  %v8282_v21 = vunpack.c.h.bf16 %v7368_v5 }
 0x694   : > { %10460 = vmatprep.mubr.f32.mxu1 %v7047_v0  ;;  %v9191_v0 = vunpack.c.l.bf16 %v9190_v48 }
 0x697   : > { %10461 = vmatmul.mubr.f32.gmra.mrb[118].mxu1 %v7048_v32  ;;  %v9194_v32 = vunpack.c.l.bf16 %v9193_v22 }
 0x698   : > { %10463 = vmatprep.mubr.f32.mxu1 %v7049_v42 }
 0x69b   : > { %10464 = vmatmul.mubr.f32.gmra.mrb[120].mxu1 %v7050_v17 }
 0x69c   : > { %10466 = vmatprep.mubr.f32.mxu1 %v7051_v3 }
 0x69f   : > { %10467 = vmatmul.mubr.f32.gmra.mrb[122].mxu1 %v7052_v53 }
 0x6a0   : > { %10469 = vmatprep.mubr.f32.mxu1 %v7053_v58 }
 0x6a3   : > { %10470 = vmatmul.mubr.f32.gmra.mrb[124].mxu1 %v7054_v52 }
 0x6a4   : > { %10472 = vmatprep.mubr.f32.mxu1 %v7055_v50 }
 0x6a7   : > { %10473 = vmatmul.mubr.f32.gmra.mrb[126].mxu1 %v7056_v59 }
 0x6a8   : > { %10475 = vmatprep.mubr.f32.mxu1 %v7057_v8 }
 0x6ab   : > { %10476 = vmatmul.mubr.f32.gmra.mrb[128].mxu1 %v7058_v46 }
 0x75e   : > { %v10453_v47 = vpop.f32.mrb[112].mxu1 }
 0x75f   : > { %v7141_v51 = vpop.f32.mrb[113].mxu1 }
 0x760   : > { %v7142_v24 = vadd.f32 %v7141_v51, %v7073_v29 }
 0x762   : > { %v10456_v12 = vpop.f32.mrb[114].mxu1 }
 0x763   : > { %v7150_v45 = vpop.f32.mrb[115].mxu1 }
 0x766   : > { %v10459_v4 = vpop.f32.mrb[116].mxu1 }
 0x767   : > { %v7158_v61 = vpop.f32.mrb[117].mxu1 }
 0x76a   : > { %v10462_v63 = vpop.f32.mrb[118].mxu1 }
 0x76b   : > { %v7166_v36 = vpop.f32.mrb[119].mxu1 }
 0x76e   : > { %v10465_v40 = vpop.f32.mrb[120].mxu1 }
 0x76f   : > { %v7174_v6 = vpop.f32.mrb[121].mxu1 }
 0x772   : > { %v10468_v56 = vpop.f32.mrb[122].mxu1 }
 0x773   : > { %v7182_v18 = vpop.f32.mrb[123].mxu1 }
 0x776   : > { %v10471_v20 = vpop.f32.mrb[124].mxu1 }
 0x777   : > { %v7190_v10 = vpop.f32.mrb[125].mxu1 }
 0x77a   : > { %v10474_v26 = vpop.f32.mrb[126].mxu1 }
 0x77b   : > { %v7198_v57 = vpop.f32.mrb[127].mxu1 }
 0x77c   : > { %v15371_v57 = vld [vmem:[#allocation26_spill] sm:$0xff] }
 0x77e   : > { %v10477_v11 = vpop.f32.mrb[128].mxu1 }
 0x77f   : > { %v7206_v13 = vpop.f32.mrb[129].mxu1 }
 0x780   : > { %v7207_v55 = vadd.f32 %v7206_v13, %v7074_v14 }
 0x782   : > { %v7270_v39 = vmax.f32 %v7142_v24, %v7207_v55 }
 0x784   : > { %v7271_v9 = vsub.f32 %v7142_v24, %v7270_v39  ;;  %v7274_v16 = vsub.f32 %v7207_v55, %v7270_v39 }
 0x786   : > { %v7272_v37 = vmul.f32 1.442695, %v7271_v9  ;;  %v7275_v62 = vmul.f32 1.442695, %v7274_v16 }
 0x788   : > { %11552 = vpow2.f32 %v7272_v37 }
 0x789   : > { %11554 = vpow2.f32 %v7275_v62 }
 0x792   : > { %v11553_v35 = vpop.eup %11552 }
 0x793   : > { %v11555_v15 = vpop.eup %11554 }
 0x794   : > { %v7277_v30 = vadd.f32 %v11555_v15, %v11553_v35 }
 0x796   : > { %11556 = vrcp.f32 %v7277_v30 }
 0x7a0   : > { %v11557_v38 = vpop.eup %11556 }
 0x7a1   : > { %v7280_v27 = vmul.f32 %v11557_v38, %v11555_v15  ;;  %v7279_v49 = vmul.f32 %v11557_v38, %v11553_v35 }
 0x7a3   : > { %7293 = vperm.xlu1 %11415, %v7280_v27   ;;  %7285 = vperm.xlu0 %11414, %v7279_v49  }
 0x822   : > { %v7294_v1 = vpop.permute.xlu1 %7293  ;;  %v7286_v31 = vpop.permute.xlu0 %7285 }
 0x823   : > { %v7296_v42 = vmul.f32 %v7294_v1, %v7290_v19  ;;  %v7288_v17 = vmul.f32 %v7286_v31, %v7282_v7  ;;  %v7367_v3 = vmul.f32 %v7366_v34, %v7286_v31  ;;  %v7370_v53 = vmul.f32 %v7369_v43, %v7294_v1 }
 0x824   : > { %v8280_v58 = vmul.f32 %v8279_v41, %v7286_v31  ;;  %v8283_v52 = vmul.f32 %v8282_v21, %v7294_v1  ;;  %v9192_v50 = vmul.f32 %v9191_v0, %v7286_v31  ;;  %v9195_v59 = vmul.f32 %v9194_v32, %v7294_v1 }
 0x825   : > { %v7297_v8 = vadd.f32 %v7296_v42, %v7288_v17  ;;  %v7371_v46 = vadd.f32 %v7370_v53, %v7367_v3 }
 0x826   : > { %v8284_v45 = vadd.f32 %v8283_v52, %v8280_v58  ;;  %v14279_v4 = vadd.f32 %v9195_v59, %v9192_v50  ;;  %v15372_v50 = vld [vmem:[#allocation25_spill] sm:$0xff] }
 0x827   : > { %v7299_v47 = vcombine.high %v7297_v8, %v7297_v8  ;;  %v7306_v51 = vrot.slane %v7297_v8, %v14272_v2  ;;  %v7380_v12 = vrot.slane %v7371_v46, %v14272_v2  ;;  %v7373_v56 = vcombine.high %v7371_v46, %v7371_v46 }
 0x828   : > { %v8107_v11 = vcombine.low %v7371_v46, %v8284_v45  ;;  %v14306_v39 = vrot.slane %v14279_v4, %v14272_v2  ;;  %v8108_v37 = vcombine.high %v7371_v46, %v8284_v45  ;;  %v9020_v49 = vcombine.low %v8284_v45, %v14279_v4 }
 0x829   : > { %v7313_v61 = vrot.slane %v7299_v47, %v14272_v2  ;;  %v7314_v63 = vcombine.high %v7306_v51, %v7306_v51  ;;  %v7322_v36 = vrot.slane %v7306_v51, %v14272_v2  ;;  %v14284_v40 = vrot.slane %v7380_v12, %v14272_v2 }
 0x82a   : > { %v7388_v6 = vcombine.high %v7380_v12, %v7380_v12  ;;  %v14318_v62 = vrot.slane %v7373_v56, %v14272_v2  ;;  %v8115_v35 = vrot.slane %v8107_v11, %v14272_v2  ;;  %v9213_v15 = vcombine.high %v14306_v39, %v14306_v39  ;;  %v7059_v11 = vld [vmem:[%s15101_s6 + $0x90] sm:$0xff] }
 0x82b   : > { %v7315_v18 = vcombine.high %v7313_v61, %v7313_v61  ;;  %v7329_v20 = vrot.slane %v7313_v61, %v14272_v2  ;;  %v7336_v10 = vrot.slane %v7314_v63, %v14272_v2  ;;  %v7344_v26 = vcombine.high %v7322_v36, %v7322_v36  ;;  %7357 = vst.msk [vmem:[%s14288_s22] sm:$0x1] %vm7356_vm11, %v7322_v36 }
 0x82c   : > { %v7425_v29 = vrot.slane %v14284_v40, %v15371_v57  ;;  %v14295_v14 = vrot.slane %v7388_v6, %v14272_v2  ;;  %v7389_v30 = vcombine.high %v14318_v62, %v14318_v62  ;;  %v8122_v38 = vrot.slane %v8108_v37, %v14272_v2  ;;  %10478 = vmatprep.mubr.f32.mxu1 %v7059_v11  ;;  %v7067_v37 = vld [vmem:[%s15101_s6 + $0xd0] sm:$0xff] }
 0x82d   : > { %v7343_v13 = vrot.slane %v7315_v18, %v14272_v2  ;;  %v7345_v24 = vcombine.high %v7329_v20, %v7329_v20  ;;  %v7346_v55 = vcombine.high %v7336_v10, %v7336_v10  ;;  %7358 = vst.msk [vmem:[%s14288_s22 + $0x10] sm:$0x1] %vm7356_vm11, %v7336_v10  ;;  %7359 = vst.msk [vmem:[%s14288_s22 + $0x20] sm:$0x1] %vm7356_vm11, %v7344_v26 }
 0x82e   : > { %7361 = vst.msk [vmem:[%s14288_s22 + $0x40] sm:$0x1] %vm7356_vm11, %v7329_v20  ;;  %7454 = vrot.lane.b32.xlu1 %v7425_v29, %s15168_s26  ;;  %v7429_v9 = vrot.slane %v14295_v14, %v15371_v57  ;;  %v14331_v27 = vrot.slane %v9213_v15, %v14272_v2  ;;  %v14336_v60 = vrot.slane %v7389_v30, %v14272_v2  ;;  %v7070_v15 = vld [vmem:[%s15101_s6 + $0xe8] sm:$0xff]  ;;  %v7071_v30 = vld [vmem:[%s15101_s6 + $0xf0] sm:$0xff] }
 0x82f   : > { %v7347_v16 = vcombine.high %v7343_v13, %v7343_v13  ;;  %7360 = vst.msk [vmem:[%s14288_s22 + $0x30] sm:$0x1] %vm7356_vm11, %v7346_v55  ;;  %7362 = vst.msk [vmem:[%s14288_s22 + $0x50] sm:$0x1] %vm7356_vm11, %v7343_v13  ;;  %v9021_v44 = vcombine.high %v8284_v45, %v14279_v4  ;;  %v8286_v33 = vcombine.high %v8284_v45, %v8284_v45  ;;  %v7061_v13 = vld [vmem:[%s15101_s6 + $0xa0] sm:$0xff]  ;;  %v7063_v55 = vld [vmem:[%s15101_s6 + $0xb0] sm:$0xff] }
 0x830   : > { %7363 = vst.msk [vmem:[%s14288_s22 + $0x60] sm:$0x1] %vm7356_vm11, %v7345_v24  ;;  %7456 = vrot.lane.b32.xlu0 %v7429_v9, %s15168_s26  ;;  %v8123_v28 = vcombine.high %v8115_v35, %v8115_v35  ;;  %v8124_v22 = vcombine.high %v8122_v38, %v8122_v38  ;;  %v9028_v23 = vrot.slane %v9020_v49, %v14272_v2  ;;  %v7062_v24 = vld [vmem:[%s15101_s6 + $0xa8] sm:$0xff] }
 0x831   : > { %7364 = vst.msk [vmem:[%s14288_s22 + $0x70] sm:$0x1] %vm7356_vm11, %v7347_v16  ;;  %v8300_v5 = vrot.slane %v8286_v33, %v14272_v2  ;;  %v14347_v54 = vrot.slane %v9021_v44, %v14272_v2  ;;  %v9198_v43 = vcombine.high %v14279_v4, %v14279_v4  ;;  %v8293_v1 = vrot.slane %v8284_v45, %v14272_v2  ;;  %v7066_v16 = vld [vmem:[%s15101_s6 + $0xc8] sm:$0xff] }
 0x832   : > { %7575 = vrot.lane.b32.xlu1 %v7425_v29, %s15166_s20  ;;  %v14342_v48 = vrot.slane %v8123_v28, %v14272_v2  ;;  %v14353_v25 = vrot.slane %v8124_v22, %v14272_v2  ;;  %v9036_v31 = vcombine.high %v9028_v23, %v9028_v23  ;;  %v14382_v53 = vrot.slane %v8115_v35, %v14272_v2  ;;  %v7069_v35 = vld [vmem:[%s15101_s6 + $0xe0] sm:$0xff] }
 0x833   : > { %v14350_v7 = vrot.slane %v8300_v5, %v14272_v2  ;;  %v8302_v19 = vcombine.high %v8300_v5, %v8300_v5  ;;  %v9212_v41 = vrot.slane %v9198_v43, %v14272_v2  ;;  %v9037_v21 = vcombine.high %v14347_v54, %v14347_v54 }
 0x834   : > { %7577 = vrot.lane.b32.xlu0 %v7429_v9, %s15166_s20  ;;  %v14368_v0 = vrot.slane %v9036_v31, %v14272_v2  ;;  %v14378_v17 = vrot.slane %v8293_v1, %v14272_v2  ;;  %v8164_v59 = vrot.slane %v14382_v53, %v15372_v50  ;;  %v14394_v8 = vrot.slane %v8122_v38, %v14272_v2  ;;  %v7072_v38 = vld [vmem:[%s15101_s6 + $0xf8] sm:$0xff] }
 0x835   : > { %v14357_v34 = vrot.slane %v8302_v19, %v14272_v2  ;;  %v14371_v32 = vrot.slane %v9212_v41, %v14272_v2  ;;  %v14374_v42 = vrot.slane %v9037_v21, %v14272_v2  ;;  %v9214_v3 = vcombine.high %v9212_v41, %v9212_v41 }
 0x836   : > { %7696 = vrot.lane.b32.xlu1 %v7425_v29, %s15164_s23  ;;  %v8338_v52 = vrot.slane %v14378_v17, %v15371_v57  ;;  %v8301_v46 = vcombine.high %v8293_v1, %v8293_v1  ;;  %v8196_v47 = vrot.slane %v14394_v8, %v15372_v50  ;;  %v14414_v45 = vrot.slane %v14306_v39, %v14272_v2  ;;  %v7064_v39 = vld [vmem:[%s15101_s6 + $0xb8] sm:$0xff] }
 0x837   : > { %v14385_v58 = vrot.slane %v9214_v3, %v14272_v2  ;;  %v7418_v61 = vcombine.high %v14284_v40, %v14284_v40  ;;  %v14427_v36 = vrot.slane %v14318_v62, %v14272_v2  ;;  %v14431_v6 = vrot.slane %v9028_v23, %v14272_v2  ;;  %v7068_v62 = vld [vmem:[%s15101_s6 + $0xd8] sm:$0xff] }
 0x838   : > { %7698 = vrot.lane.b32.xlu0 %v7429_v9, %s15164_s23  ;;  %v14401_v51 = vrot.slane %v8301_v46, %v14272_v2  ;;  %v9250_v4 = vrot.slane %v14414_v45, %v15371_v57  ;;  %v14441_v18 = vrot.slane %v14347_v54, %v14272_v2  ;;  %v9254_v10 = vrot.slane %v14331_v27, %v15371_v57 }
 0x839   : > { %v7433_v63 = vrot.slane %v7418_v61, %v15371_v57  ;;  %v7441_v40 = vrot.slane %v14427_v36, %v15371_v57  ;;  %v9077_v56 = vrot.slane %v14431_v6, %v15372_v50  ;;  %v7420_v26 = vcombine.high %v14295_v14, %v14295_v14  ;;  %v7060_v14 = vld [vmem:[%s15101_s6 + $0x98] sm:$0xff] }
 0x83a   : > { %7817 = vrot.lane.b32.xlu1 %v7425_v29, %s15172_s21  ;;  %v8342_v12 = vrot.slane %v14401_v51, %v15371_v57  ;;  %v9109_v20 = vrot.slane %v14441_v18, %v15372_v50  ;;  %10479 = vmatmul.mubr.f32.gmra.mrb[130].mxu1 %v7060_v14  ;;  %v8160_v49 = vrot.slane %v14382_v53, %v15371_v57 }
 0x83b   : > { %v7437_v2 = vrot.slane %v7420_v26, %v15371_v57  ;;  %10481 = vmatprep.mubr.f32.mxu1 %v7061_v13  ;;  %v8192_v44 = vrot.slane %v14394_v8, %v15371_v57  ;;  %v8331_v33 = vcombine.high %v14378_v17, %v14378_v17  ;;  %v14533_v5 = vrot.slane %v14350_v7, %v15371_v57 }
 0x83c   : > { %7819 = vrot.lane.b32.xlu0 %v7429_v9, %s15172_s21  ;;  %v8172_v54 = vrot.slane %v14342_v48, %v15372_v50  ;;  %v14546_v19 = vcombine.high %v14382_v53, %v14382_v53  ;;  %v8204_v17 = vrot.slane %v14353_v25, %v15372_v50  ;;  %v14568_v3 = vcombine.high %v14394_v8, %v14394_v8 }
 0x83d   : > { %v14526_v28 = vrot.slane %v8331_v33, %v15371_v57  ;;  %v8333_v8 = vcombine.high %v14401_v51, %v14401_v51  ;;  %v14601_v61 = vrot.slane %v14357_v34, %v15371_v57  ;;  %v9073_v26 = vrot.slane %v14431_v6, %v15371_v57 }
 0x83e   : > { %7938 = vrot.lane.b32.xlu1 %v7425_v29, %s15170_s18  ;;  %10482 = vmatmul.mubr.f32.gmra.mrb[132].mxu1 %v7062_v24  ;;  %v8180_v31 = vrot.slane %v14546_v19, %v15372_v50  ;;  %v9105_v11 = vrot.slane %v14441_v18, %v15371_v57  ;;  %v14688_v33 = vcombine.high %v14431_v6, %v14431_v6 }
 0x83f   : > { %10484 = vmatprep.mubr.f32.mxu1 %v7063_v55 }
 0x840   : > { %7940 = vrot.lane.b32.xlu0 %v7429_v9, %s15170_s18 }
 0x842   : > { %8059 = vrot.lane.b32.xlu1 %v7425_v29, %s15162_s17  ;;  %v7445_v29 = vrot.slane %v14336_v60, %v15371_v57  ;;  %10485 = vmatmul.mubr.f32.gmra.mrb[134].mxu1 %v7064_v39  ;;  %v9243_v39 = vcombine.high %v14414_v45, %v14414_v45 }
 0x844   : > { %8061 = vrot.lane.b32.xlu0 %v7429_v9, %s15162_s17  ;;  %v7065_v9 = vld [vmem:[%s15101_s6 + $0xc0] sm:$0xff]  ;;  %s15377_s17 = smov 94  }
 0x845   : > { %10487 = vmatprep.mubr.f32.mxu1 %v7065_v9 }
 0x846   : > { %8367 = vrot.lane.b32.xlu1 %v8338_v52, %s15160_s24  ;;  %10488 = vmatmul.mubr.f32.gmra.mrb[136].mxu1 %v7066_v16 }
 0x847   : > { %10490 = vmatprep.mubr.f32.mxu1 %v7067_v37  ;;  %v9258_v37 = vrot.slane %v9243_v39, %v15371_v57 }
 0x848   : > { %8223 = vrot.lane.b32.xlu0 %v8164_v59, %s15144_s19  ;;  %v8212_v59 = vrot.slane %v14568_v3, %v15372_v50 }
 0x84a   : > { %8488 = vrot.lane.b32.xlu1 %v8338_v52, %s15146_s10  ;;  %10491 = vmatmul.mubr.f32.gmra.mrb[138].mxu1 %v7068_v62 }
 0x84b   : > { %10493 = vmatprep.mubr.f32.mxu1 %v7069_v35  ;;  %v9266_v35 = vrot.slane %v14371_v32, %v15371_v57 }
 0x84c   : > { %8239 = vrot.lane.b32.xlu0 %v8196_v47, %s15144_s19  ;;  %s15150_s19 = smov 22  }
 0x84e   : > { %8609 = vrot.lane.b32.xlu1 %v8338_v52, %s15156_s25  ;;  %10494 = vmatmul.mubr.f32.gmra.mrb[140].mxu1 %v7070_v15  ;;  %v7419_v15 = vcombine.high %v14427_v36, %v14427_v36  ;;  %v9085_v36 = vrot.slane %v14368_v0, %v15372_v50 }
 0x84f   : > { %10496 = vmatprep.mubr.f32.mxu1 %v7071_v30 }
 0x850   : > { %8369 = vrot.lane.b32.xlu0 %v8342_v12, %s15160_s24  ;;  %s15374_s24 = smov 20  }
 0x852   : > { %8730 = vrot.lane.b32.xlu1 %v8338_v52, %s15154_s12  ;;  %10497 = vmatmul.mubr.f32.gmra.mrb[142].mxu1 %v7072_v38 }
 0x854   : > { %8490 = vrot.lane.b32.xlu0 %v8342_v12, %s15146_s10  ;;  %s15158_s10 = smov 114  }
 0x856   : > { %8851 = vrot.lane.b32.xlu1 %v8338_v52, %s15148_s13 }
 0x858   : > { %8611 = vrot.lane.b32.xlu0 %v8342_v12, %s15156_s25  ;;  %s15381_s25 = smov 4  }
 0x85a   : > { %8972 = vrot.lane.b32.xlu1 %v8338_v52, %s15150_s19 }
 0x85c   : > { %8732 = vrot.lane.b32.xlu0 %v8342_v12, %s15154_s12  ;;  %s15382_s12 = smov 22  }
 0x85e   : > { %9279 = vrot.lane.b32.xlu1 %v9250_v4, %s15158_s10 }
 0x860   : > { %8853 = vrot.lane.b32.xlu0 %v8342_v12, %s15148_s13  ;;  %s15152_s13 = smov 4  }
 0x862   : > { %7458 = vrot.lane.b32.xlu1 %v7433_v63, %s15168_s26 }
 0x864   : > { %8974 = vrot.lane.b32.xlu0 %v8342_v12, %s15150_s19  ;;  %v14589_v12 = vrot.slane %v8333_v8, %v15371_v57  ;;  %s15380_s19 = smov 40   ;;  %v8168_v8 = vrot.slane %v14342_v48, %v15371_v57 }
 0x866   : > { %7462 = vrot.lane.b32.xlu1 %v7441_v40, %s15168_s26 }
 0x868   : > { %9136 = vrot.lane.b32.xlu0 %v9077_v56, %s15152_s13 }
 0x86a   : > { %7579 = vrot.lane.b32.xlu1 %v7433_v63, %s15166_s20 }
 0x86c   : > { %9152 = vrot.lane.b32.xlu0 %v9109_v20, %s15152_s13  ;;  %s15373_s13 = smov 74  }
 0x86e   : > { %7583 = vrot.lane.b32.xlu1 %v7441_v40, %s15166_s20 }
 0x870   : > { %9281 = vrot.lane.b32.xlu0 %v9254_v10, %s15158_s10  ;;  %s15378_s10 = smov 76  }
 0x872   : > { %7700 = vrot.lane.b32.xlu1 %v7433_v63, %s15164_s23 }
 0x874   : > { %7460 = vrot.lane.b32.xlu0 %v7437_v2, %s15168_s26 }
 0x876   : > { %7704 = vrot.lane.b32.xlu1 %v7441_v40, %s15164_s23  ;;  %s15376_s23 = smov 112  }
 0x878   : > { %7464 = vrot.lane.b32.xlu0 %v7445_v29, %s15168_s26  ;;  %s15375_s26 = smov 2  }
 0x87a   : > { %7821 = vrot.lane.b32.xlu1 %v7433_v63, %s15172_s21 }
 0x87c   : > { %7581 = vrot.lane.b32.xlu0 %v7437_v2, %s15166_s20 }
 0x87e   : > { %7825 = vrot.lane.b32.xlu1 %v7441_v40, %s15172_s21 }
 0x880   : > { %7585 = vrot.lane.b32.xlu0 %v7445_v29, %s15166_s20  ;;  %s15379_s20 = smov 58  }
 0x882   : > { %7942 = vrot.lane.b32.xlu1 %v7433_v63, %s15170_s18 }
 0x884   : > { %7702 = vrot.lane.b32.xlu0 %v7437_v2, %s15373_s13 }
 0x886   : > { %7946 = vrot.lane.b32.xlu1 %v7441_v40, %s15170_s18 }
 0x888   : > { %7706 = vrot.lane.b32.xlu0 %v7445_v29, %s15373_s13 }
 0x88a   : > { %8063 = vrot.lane.b32.xlu1 %v7433_v63, %s15374_s24 }
 0x88c   : > { %7823 = vrot.lane.b32.xlu0 %v7437_v2, %s15172_s21 }
 0x88e   : > { %8067 = vrot.lane.b32.xlu1 %v7441_v40, %s15374_s24 }
 0x890   : > { %7827 = vrot.lane.b32.xlu0 %v7445_v29, %s15172_s21  ;;  %s15384_s21 = smov 110  }
 0x892   : > { %8221 = vrot.lane.b32.xlu1 %v8160_v49, %s15375_s26  ;;  %v7449_v49 = vrot.slane %v7419_v15, %v15371_v57  ;;  %v9081_v15 = vrot.slane %v14368_v0, %v15371_v57 }
 0x894   : > { %7944 = vrot.lane.b32.xlu0 %v7437_v2, %s15170_s18 }
 0x896   : > { %8237 = vrot.lane.b32.xlu1 %v8192_v44, %s15375_s26 }
 0x898   : > { %7948 = vrot.lane.b32.xlu0 %v7445_v29, %s15170_s18  ;;  %s15383_s18 = smov 114  }
 0x89a   : > { %8371 = vrot.lane.b32.xlu1 %v14526_v28, %s15376_s23 }
 0x89c   : > { %8065 = vrot.lane.b32.xlu0 %v7437_v2, %s15374_s24 }
 0x89e   : > { %8375 = vrot.lane.b32.xlu1 %v14533_v5, %s15376_s23 }
 0x8a0   : > { %v7455_v22 = vpop.permute.xlu1 %7454  ;;  %8069 = vrot.lane.b32.xlu0 %v7445_v29, %s15374_s24 }
 0x8a1   : > { %7478 = vst.msk [vmem:[%s14288_s22 + $0x1] sm:$0x1] %vm7356_vm11, %v7455_v22  ;;  %v9093_v22 = vrot.slane %v14688_v33, %v15372_v50 }
 0x8a2   : > { %v7457_v23 = vpop.permute.xlu0 %7456  ;;  %8492 = vrot.lane.b32.xlu1 %v14526_v28, %s15377_s17 }
 0x8a3   : > { %7479 = vst.msk [vmem:[%s14288_s22 + $0x11] sm:$0x1] %vm7356_vm11, %v7457_v23 }
 0x8a4   : > { %v7576_v43 = vpop.permute.xlu1 %7575  ;;  %8227 = vrot.lane.b32.xlu0 %v8172_v54, %s15375_s26  ;;  %v9117_v54 = vrot.slane %v14374_v42, %v15372_v50 }
 0x8a5   : > { %7599 = vst.msk [vmem:[%s14288_s22 + $0x2] sm:$0x1] %vm7356_vm11, %v7576_v43  ;;  %v14706_v43 = vcombine.high %v14441_v18, %v14441_v18 }
 0x8a6   : > { %v7578_v1 = vpop.permute.xlu0 %7577  ;;  %8496 = vrot.lane.b32.xlu1 %v14533_v5, %s15377_s17 }
 0x8a7   : > { %7600 = vst.msk [vmem:[%s14288_s22 + $0x12] sm:$0x1] %vm7356_vm11, %v7578_v1 }
 0x8a8   : > { %v7697_v41 = vpop.permute.xlu1 %7696  ;;  %8231 = vrot.lane.b32.xlu0 %v8180_v31, %s15375_s26 }
 0x8a9   : > { %7720 = vst.msk [vmem:[%s14288_s22 + $0x3] sm:$0x1] %vm7356_vm11, %v7697_v41  ;;  %v9125_v41 = vrot.slane %v14706_v43, %v15372_v50 }
 0x8aa   : > { %v7699_v21 = vpop.permute.xlu0 %7698  ;;  %8613 = vrot.lane.b32.xlu1 %v14526_v28, %s15378_s10 }
 0x8ab   : > { %7721 = vst.msk [vmem:[%s14288_s22 + $0x13] sm:$0x1] %vm7356_vm11, %v7699_v21 }
 0x8ac   : > { %v7818_v53 = vpop.permute.xlu1 %7817  ;;  %8243 = vrot.lane.b32.xlu0 %v8204_v17, %s15375_s26 }
 0x8ad   : > { %7841 = vst.msk [vmem:[%s14288_s22 + $0x4] sm:$0x1] %vm7356_vm11, %v7818_v53 }
 0x8ae   : > { %v7820_v52 = vpop.permute.xlu0 %7819  ;;  %8617 = vrot.lane.b32.xlu1 %v14533_v5, %s15378_s10 }
 0x8af   : > { %7842 = vst.msk [vmem:[%s14288_s22 + $0x14] sm:$0x1] %vm7356_vm11, %v7820_v52  ;;  %v9245_v52 = vcombine.high %v14331_v27, %v14331_v27 }
 0x8b0   : > { %v7939_v46 = vpop.permute.xlu1 %7938  ;;  %8247 = vrot.lane.b32.xlu0 %v8212_v59, %s15375_s26 }
 0x8b1   : > { %7962 = vst.msk [vmem:[%s14288_s22 + $0x5] sm:$0x1] %vm7356_vm11, %v7939_v46 }
 0x8b2   : > { %v7941_v47 = vpop.permute.xlu0 %7940  ;;  %8734 = vrot.lane.b32.xlu1 %v14526_v28, %s15379_s20 }
 0x8b3   : > { %7963 = vst.msk [vmem:[%s14288_s22 + $0x15] sm:$0x1] %vm7356_vm11, %v7941_v47  ;;  %v9262_v47 = vrot.slane %v9245_v52, %v15371_v57 }
 0x8b4   : > { %v8060_v4 = vpop.permute.xlu1 %8059  ;;  %8373 = vrot.lane.b32.xlu0 %v14589_v12, %s15376_s23 }
 0x8b5   : > { %8083 = vst.msk [vmem:[%s14288_s22 + $0x6] sm:$0x1] %vm7356_vm11, %v8060_v4 }
 0x8b6   : > { %v8062_v51 = vpop.permute.xlu0 %8061  ;;  %8738 = vrot.lane.b32.xlu1 %v14533_v5, %s15379_s20 }
 0x8b7   : > { %8084 = vst.msk [vmem:[%s14288_s22 + $0x16] sm:$0x1] %vm7356_vm11, %v8062_v51  ;;  %v9270_v51 = vrot.slane %v14385_v58, %v15371_v57 }
 0x8b8   : > { %v8368_v63 = vpop.permute.xlu1 %8367  ;;  %8377 = vrot.lane.b32.xlu0 %v14601_v61, %s15376_s23 }
 0x8b9   : > { %8391 = vst.msk [vmem:[%s14288_s22 + $0x8] sm:$0x1] %vm7356_vm11, %v8368_v63 }
 0x8ba   : > { %v14609_v40 = vpop.permute.xlu0 %8223  ;;  %8855 = vrot.lane.b32.xlu1 %v14526_v28, %s15380_s19 }
 0x8bc   : > { %v8489_v56 = vpop.permute.xlu1 %8488  ;;  %8494 = vrot.lane.b32.xlu0 %v14589_v12, %s15377_s17 }
 0x8bd   : > { %8512 = vst.msk [vmem:[%s14288_s22 + $0x9] sm:$0x1] %vm7356_vm11, %v8489_v56 }
 0x8be   : > { %v14617_v20 = vpop.permute.xlu0 %8239  ;;  %8859 = vrot.lane.b32.xlu1 %v14533_v5, %s15380_s19 }
 0x8c0   : > { %v8610_v10 = vpop.permute.xlu1 %8609  ;;  %8498 = vrot.lane.b32.xlu0 %v14601_v61, %s15377_s17 }
 0x8c1   : > { %8633 = vst.msk [vmem:[%s14288_s22 + $0xa] sm:$0x1] %vm7356_vm11, %v8610_v10 }
 0x8c2   : > { %v8370_v2 = vpop.permute.xlu0 %8369  ;;  %9134 = vrot.lane.b32.xlu1 %v9073_v26, %s15381_s25  ;;  %v8208_v26 = vrot.slane %v14568_v3, %v15371_v57 }
 0x8c3   : > { %8392 = vst.msk [vmem:[%s14288_s22 + $0x18] sm:$0x1] %vm7356_vm11, %v8370_v2  ;;  %v8332_v2 = vcombine.high %v14350_v7, %v14350_v7 }
 0x8c4   : > { %v8731_v29 = vpop.permute.xlu1 %8730  ;;  %8615 = vrot.lane.b32.xlu0 %v14589_v12, %s15378_s10 }
 0x8c5   : > { %8754 = vst.msk [vmem:[%s14288_s22 + $0xb] sm:$0x1] %vm7356_vm11, %v8731_v29 }
 0x8c6   : > { %v8491_v14 = vpop.permute.xlu0 %8490  ;;  %9150 = vrot.lane.b32.xlu1 %v9105_v11, %s15381_s25 }
 0x8c7   : > { %8513 = vst.msk [vmem:[%s14288_s22 + $0x19] sm:$0x1] %vm7356_vm11, %v8491_v14  ;;  %v14776_v14 = vrot.slane %v8332_v2, %v15371_v57 }
 0x8c8   : > { %v8852_v13 = vpop.permute.xlu1 %8851  ;;  %8619 = vrot.lane.b32.xlu0 %v14601_v61, %s15378_s10 }
 0x8c9   : > { %8875 = vst.msk [vmem:[%s14288_s22 + $0xc] sm:$0x1] %vm7356_vm11, %v8852_v13 }
 0x8ca   : > { %v8612_v24 = vpop.permute.xlu0 %8611  ;;  %8976 = vrot.lane.b32.xlu1 %v14526_v28, %s15382_s12 }
 0x8cb   : > { %8634 = vst.msk [vmem:[%s14288_s22 + $0x1a] sm:$0x1] %vm7356_vm11, %v8612_v24 }
 0x8cc   : > { %v8973_v55 = vpop.permute.xlu1 %8972  ;;  %8736 = vrot.lane.b32.xlu0 %v14589_v12, %s15379_s20 }
 0x8cd   : > { %8996 = vst.msk [vmem:[%s14288_s22 + $0xd] sm:$0x1] %vm7356_vm11, %v8973_v55 }
 0x8ce   : > { %v8733_v9 = vpop.permute.xlu0 %8732  ;;  %8980 = vrot.lane.b32.xlu1 %v14533_v5, %s15382_s12 }
 0x8cf   : > { %8755 = vst.msk [vmem:[%s14288_s22 + $0x1b] sm:$0x1] %vm7356_vm11, %v8733_v9 }
 0x8d0   : > { %v9280_v16 = vpop.permute.xlu1 %9279  ;;  %8740 = vrot.lane.b32.xlu0 %v14601_v61, %s15379_s20 }
 0x8d1   : > { %9303 = vst.msk [vmem:[%s14288_s22 + $0xf] sm:$0x1] %vm7356_vm11, %v9280_v16 }
 0x8d2   : > { %v8854_v45 = vpop.permute.xlu0 %8853  ;;  %9283 = vrot.lane.b32.xlu1 %v9258_v37, %s15383_s18 }
 0x8d3   : > { %8876 = vst.msk [vmem:[%s14288_s22 + $0x1c] sm:$0x1] %vm7356_vm11, %v8854_v45 }
 0x8d4   : > { %v7459_v62 = vpop.permute.xlu1 %7458  ;;  %8857 = vrot.lane.b32.xlu0 %v14589_v12, %s15380_s19 }
 0x8d5   : > { %7480 = vst.msk [vmem:[%s14288_s22 + $0x21] sm:$0x1] %vm7356_vm11, %v7459_v62 }
 0x8d6   : > { %v8975_v30 = vpop.permute.xlu0 %8974  ;;  %9287 = vrot.lane.b32.xlu1 %v9266_v35, %s15383_s18  ;;  %v8156_v35 = vcombine.high %v14353_v25, %v14353_v25 }
 0x8d7   : > { %8997 = vst.msk [vmem:[%s14288_s22 + $0x1d] sm:$0x1] %vm7356_vm11, %v8975_v30 }
 0x8d8   : > { %v7463_v38 = vpop.permute.xlu1 %7462  ;;  %8861 = vrot.lane.b32.xlu0 %v14601_v61, %s15380_s19  ;;  %v8216_v52 = vrot.slane %v8156_v35, %v15371_v57 }
 0x8d9   : > { %7482 = vst.msk [vmem:[%s14288_s22 + $0x41] sm:$0x1] %vm7356_vm11, %v7463_v38  ;;  %v8220_v38 = vrot.slane %v8156_v35, %v15372_v50 }
 0x8da   : > { %v14681_v44 = vpop.permute.xlu0 %9136  ;;  %7466 = vrot.lane.b32.xlu1 %v7449_v49, %s15384_s21 }
 0x8dc   : > { %v7580_v28 = vpop.permute.xlu1 %7579  ;;  %9140 = vrot.lane.b32.xlu0 %v9085_v36, %s15381_s25  ;;  %v9089_v36 = vrot.slane %v14688_v33, %v15371_v57 }
 0x8dd   : > { %7601 = vst.msk [vmem:[%s14288_s22 + $0x22] sm:$0x1] %vm7356_vm11, %v7580_v28 }
 0x8de   : > { %v14693_v5 = vpop.permute.xlu0 %9152  ;;  %7587 = vrot.lane.b32.xlu1 %v7449_v49, %s15385_s0 }
 0x8e0   : > { %v7584_v23 = vpop.permute.xlu1 %7583  ;;  %9144 = vrot.lane.b32.xlu0 %v9093_v22, %s15381_s25 }
 0x8e1   : > { %7603 = vst.msk [vmem:[%s14288_s22 + $0x42] sm:$0x1] %vm7356_vm11, %v7584_v23 }
 0x8e2   : > { %v9282_v6 = vpop.permute.xlu0 %9281  ;;  %7708 = vrot.lane.b32.xlu1 %v7449_v49, %s15373_s13 }
 0x8e3   : > { %9304 = vst.msk [vmem:[%s14288_s22 + $0x1f] sm:$0x1] %vm7356_vm11, %v9282_v6 }
 0x8e4   : > { %v7701_v1 = vpop.permute.xlu1 %7700  ;;  %9156 = vrot.lane.b32.xlu0 %v9117_v54, %s15381_s25  ;;  %v9121_v54 = vrot.slane %v14706_v43, %v15371_v57 }
 0x8e5   : > { %7722 = vst.msk [vmem:[%s14288_s22 + $0x23] sm:$0x1] %vm7356_vm11, %v7701_v1 }
 0x8e6   : > { %v7461_v31 = vpop.permute.xlu0 %7460  ;;  %7829 = vrot.lane.b32.xlu1 %v7449_v49, %s15386_s1 }
 0x8e7   : > { %7481 = vst.msk [vmem:[%s14288_s22 + $0x31] sm:$0x1] %vm7356_vm11, %v7461_v31 }
 0x8e8   : > { %v7705_v21 = vpop.permute.xlu1 %7704  ;;  %9160 = vrot.lane.b32.xlu0 %v9125_v41, %s15381_s25 }
 0x8e9   : > { %7724 = vst.msk [vmem:[%s14288_s22 + $0x43] sm:$0x1] %vm7356_vm11, %v7705_v21 }
 0x8ea   : > { %7950 = vrot.lane.b32.xlu1 %v7449_v49, %s15387_s2  ;;  %v7465_v18 = vpop.permute.xlu0 %7464 }
 0x8eb   : > { %7483 = vst.msk [vmem:[%s14288_s22 + $0x51] sm:$0x1] %vm7356_vm11, %v7465_v18 }
 0x8ec   : > { %v7822_v17 = vpop.permute.xlu1 %7821  ;;  %8978 = vrot.lane.b32.xlu0 %v14589_v12, %s15382_s12  ;;  %v8176_v12 = vrot.slane %v14546_v19, %v15371_v57  ;;  %v8200_v19 = vrot.slane %v14353_v25, %v15371_v57  ;;  %v8334_v25 = vcombine.high %v14357_v34, %v14357_v34  ;;  %v9113_v34 = vrot.slane %v14374_v42, %v15371_v57 }
 0x8ed   : > { %7843 = vst.msk [vmem:[%s14288_s22 + $0x24] sm:$0x1] %vm7356_vm11, %v7822_v17  ;;  %v9068_v17 = vcombine.high %v14368_v0, %v14368_v0 }
 0x8ee   : > { %8071 = vrot.lane.b32.xlu1 %v7449_v49, %s15374_s24  ;;  %v7582_v53 = vpop.permute.xlu0 %7581  ;;  %v8366_v22 = vrot.slane %v8334_v25, %v15371_v57 }
 0x8ef   : > { %7602 = vst.msk [vmem:[%s14288_s22 + $0x32] sm:$0x1] %vm7356_vm11, %v7582_v53 }
 0x8f0   : > { %v7826_v59 = vpop.permute.xlu1 %7825  ;;  %8982 = vrot.lane.b32.xlu0 %v14601_v61, %s15382_s12  ;;  %v7421_v61 = vcombine.high %v14336_v60, %v14336_v60 }
 0x8f1   : > { %7845 = vst.msk [vmem:[%s14288_s22 + $0x44] sm:$0x1] %vm7356_vm11, %v7826_v59 }
 0x8f2   : > { %8225 = vrot.lane.b32.xlu1 %v8168_v8, %s15375_s26  ;;  %v7586_v46 = vpop.permute.xlu0 %7585  ;;  %v7453_v10 = vrot.slane %v7421_v61, %v15371_v57  ;;  %v9101_v8 = vrot.slane %v9068_v17, %v15372_v50 }
 0x8f3   : > { %7604 = vst.msk [vmem:[%s14288_s22 + $0x52] sm:$0x1] %vm7356_vm11, %v7586_v46  ;;  %v9069_v46 = vcombine.high %v14374_v42, %v14374_v42 }
 0x8f4   : > { %v7943_v27 = vpop.permute.xlu1 %7942  ;;  %9285 = vrot.lane.b32.xlu0 %v9262_v47, %s15383_s18  ;;  %v9097_v47 = vrot.slane %v9068_v17, %v15371_v57 }
 0x8f5   : > { %7964 = vst.msk [vmem:[%s14288_s22 + $0x25] sm:$0x1] %vm7356_vm11, %v7943_v27  ;;  %v9129_v42 = vrot.slane %v9069_v46, %v15371_v57 }
 0x8f6   : > { %8229 = vrot.lane.b32.xlu1 %v8176_v12, %s15375_s26  ;;  %v7703_v4 = vpop.permute.xlu0 %7702  ;;  %v9133_v12 = vrot.slane %v9069_v46, %v15372_v50 }
 0x8f7   : > { %7723 = vst.msk [vmem:[%s14288_s22 + $0x33] sm:$0x1] %vm7356_vm11, %v7703_v4 }
 0x8f8   : > { %v7947_v63 = vpop.permute.xlu1 %7946  ;;  %9289 = vrot.lane.b32.xlu0 %v9270_v51, %s15383_s18  ;;  %v9244_v51 = vcombine.high %v14371_v32, %v14371_v32 }
 0x8f9   : > { %7966 = vst.msk [vmem:[%s14288_s22 + $0x45] sm:$0x1] %vm7356_vm11, %v7947_v63  ;;  %v9246_v63 = vcombine.high %v14385_v58, %v14385_v58 }
 0x8fa   : > { %8241 = vrot.lane.b32.xlu1 %v8200_v19, %s15375_s26  ;;  %v7707_v56 = vpop.permute.xlu0 %7706  ;;  %v9274_v32 = vrot.slane %v9244_v51, %v15371_v57 }
 0x8fb   : > { %7725 = vst.msk [vmem:[%s14288_s22 + $0x53] sm:$0x1] %vm7356_vm11, %v7707_v56  ;;  %v9278_v58 = vrot.slane %v9246_v63, %v15371_v57 }
 0x8fc   : > { %v8064_v60 = vpop.permute.xlu1 %8063  ;;  %7468 = vrot.lane.b32.xlu0 %v7453_v10, %s15384_s21 }
 0x8fd   : > { %8085 = vst.msk [vmem:[%s14288_s22 + $0x26] sm:$0x1] %vm7356_vm11, %v8064_v60 }
 0x8fe   : > { %8245 = vrot.lane.b32.xlu1 %v8208_v26, %s15375_s26  ;;  %v7824_v29 = vpop.permute.xlu0 %7823 }
 0x8ff   : > { %7844 = vst.msk [vmem:[%s14288_s22 + $0x34] sm:$0x1] %vm7356_vm11, %v7824_v29 }
 0x900   : > { %v8068_v11 = vpop.permute.xlu1 %8067  ;;  %7589 = vrot.lane.b32.xlu0 %v7453_v10, %s15385_s0  ;;  %s9823_s0 = sshll.u32 %s11738_s9, 11  ;;  %s15388_s9 = sand.u32 1, %s11629_s28  }
 0x901   : > { %8087 = vst.msk [vmem:[%s14288_s22 + $0x46] sm:$0x1] %vm7356_vm11, %v8068_v11 }
 0x902   : > { %8379 = vrot.lane.b32.xlu1 %v14776_v14, %s15376_s23  ;;  %v7828_v7 = vpop.permute.xlu0 %7827 }
 0x903   : > { %7846 = vst.msk [vmem:[%s14288_s22 + $0x54] sm:$0x1] %vm7356_vm11, %v7828_v7 }
 0x904   : > { %v8222_v3 = vpop.permute.xlu1 %8221  ;;  %7710 = vrot.lane.b32.xlu0 %v7453_v10, %s15373_s13  ;;  %s15054_s13 = scalar_lea.sflag [#allocation4], %s15388_s9 }
 0x905   : > { %v8254_v13 = vsel %vm8253_vm12, %v8222_v3, %v14609_v40 }
 0x906   : > { %8270 = vst.msk [vmem:[%s14288_s22 + $0x7] sm:$0x1] %vm7356_vm11, %v8254_v13  ;;  %8500 = vrot.lane.b32.xlu1 %v14776_v14, %s15377_s17  ;;  %v7945_v24 = vpop.permute.xlu0 %7944 }
 0x907   : > { %7965 = vst.msk [vmem:[%s14288_s22 + $0x35] sm:$0x1] %vm7356_vm11, %v7945_v24 }
 0x908   : > { %v8238_v55 = vpop.permute.xlu1 %8237  ;;  %7831 = vrot.lane.b32.xlu0 %v7453_v10, %s15386_s1  ;;  %s9325_s1 = sshll.u32 %s14288_s22, 4  ;;  %s15046_s1 = int_to_ptr.vmem [resolvable:$true] %s9325_s1 }
 0x909   : > { %v8258_v39 = vsel %vm8253_vm12, %v8238_v55, %v14617_v20  ;;  %v8155_v20 = vcombine.high %v14342_v48, %v14342_v48 }
 0x90a   : > { %8274 = vst.msk [vmem:[%s14288_s22 + $0x47] sm:$0x1] %vm7356_vm11, %v8258_v39  ;;  %8621 = vrot.lane.b32.xlu1 %v14776_v14, %s15378_s10  ;;  %v7949_v40 = vpop.permute.xlu0 %7948 }
 0x90b   : > { %7967 = vst.msk [vmem:[%s14288_s22 + $0x55] sm:$0x1] %vm7356_vm11, %v7949_v40  ;;  %v8188_v62 = vrot.slane %v8155_v20, %v15372_v50  ;;  %v8184_v21 = vrot.slane %v8155_v20, %v15371_v57 }
 0x90c   : > { %v8372_v9 = vpop.permute.xlu1 %8371  ;;  %7952 = vrot.lane.b32.xlu0 %v7453_v10, %s15387_s2 }
 0x90d   : > { %8393 = vst.msk [vmem:[%s14288_s22 + $0x28] sm:$0x1] %vm7356_vm11, %v8372_v9  ;;  %v10480_v7 = vpop.f32.mrb[130].mxu1 }
 0x90e   : > { %8742 = vrot.lane.b32.xlu1 %v14776_v14, %s15379_s20  ;;  %v8066_v16 = vpop.permute.xlu0 %8065  ;;  %v7215_v3 = vpop.f32.mrb[131].mxu1 }
 0x90f   : > { %8086 = vst.msk [vmem:[%s14288_s22 + $0x36] sm:$0x1] %vm7356_vm11, %v8066_v16 }
 0x910   : > { %v8376_v37 = vpop.permute.xlu1 %8375  ;;  %8073 = vrot.lane.b32.xlu0 %v7453_v10, %s15374_s24  ;;  %s11575_s24 = scalar_lea.vmem %s15046_s1, 2048 }
 0x911   : > { %8395 = vst.msk [vmem:[%s14288_s22 + $0x48] sm:$0x1] %vm7356_vm11, %v8376_v37  ;;  %v10483_v55 = vpop.f32.mrb[132].mxu1  ;;  %p11576_p11 = scmp.ne.s32.totalorder %s15046_s1, %s11575_s24 }
 0x912   : > { %8863 = vrot.lane.b32.xlu1 %v14776_v14, %s15380_s19  ;;  %v8070_v45 = vpop.permute.xlu0 %8069  ;;  %v7223_v39 = vpop.f32.mrb[133].mxu1 }
 0x913   : > { %8088 = vst.msk [vmem:[%s14288_s22 + $0x56] sm:$0x1] %vm7356_vm11, %v8070_v45  ;;  %p11577_p12 = pnand %p11576_p11, %p11755_p5 }
 0x914   : > { %v8493_v48 = vpop.permute.xlu1 %8492  ;;  %8235 = vrot.lane.b32.xlu0 %v8188_v62, %s15375_s26 }
 0x915   : > { %8514 = vst.msk [vmem:[%s14288_s22 + $0x29] sm:$0x1] %vm7356_vm11, %v8493_v48  ;;  %v10486_v16 = vpop.f32.mrb[134].mxu1  ;;  %p11578_p13 = pneg %p11577_p12 }
 0x916   : > { %9138 = vrot.lane.b32.xlu1 %v9081_v15, %s15381_s25  ;;  %v14827_v30 = vpop.permute.xlu0 %8227  ;;  %v7231_v20 = vpop.f32.mrb[135].mxu1 }
 0x918   : > { %v8497_v49 = vpop.permute.xlu1 %8496  ;;  %8251 = vrot.lane.b32.xlu0 %v8220_v38, %s15375_s26 }
 0x919   : > { %8516 = vst.msk [vmem:[%s14288_s22 + $0x49] sm:$0x1] %vm7356_vm11, %v8497_v49  ;;  %v10489_v62 = vpop.f32.mrb[136].mxu1 }
 0x91a   : > { %9142 = vrot.lane.b32.xlu1 %v9089_v36, %s15381_s25  ;;  %v14838_v28 = vpop.permute.xlu0 %8231  ;;  %v7239_v35 = vpop.f32.mrb[137].mxu1 }
 0x91c   : > { %v8614_v23 = vpop.permute.xlu1 %8613  ;;  %8381 = vrot.lane.b32.xlu0 %v8366_v22, %s15376_s23 }
 0x91d   : > { %8635 = vst.msk [vmem:[%s14288_s22 + $0x2a] sm:$0x1] %vm7356_vm11, %v8614_v23  ;;  %v10492_v38 = vpop.f32.mrb[138].mxu1 }
 0x91e   : > { %9154 = vrot.lane.b32.xlu1 %v9113_v34, %s15381_s25  ;;  %v14847_v33 = vpop.permute.xlu0 %8243  ;;  %v7247_v25 = vpop.f32.mrb[139].mxu1 }
 0x920   : > { %v8618_v6 = vpop.permute.xlu1 %8617  ;;  %8502 = vrot.lane.b32.xlu0 %v8366_v22, %s15377_s17 }
 0x921   : > { %8637 = vst.msk [vmem:[%s14288_s22 + $0x4a] sm:$0x1] %vm7356_vm11, %v8618_v6 }
 0x922   : > { %9158 = vrot.lane.b32.xlu1 %v9121_v54, %s15381_s25  ;;  %v14855_v1 = vpop.permute.xlu0 %8247 }
 0x924   : > { %v8735_v31 = vpop.permute.xlu1 %8734  ;;  %8623 = vrot.lane.b32.xlu0 %v8366_v22, %s15378_s10 }
 0x925   : > { %8756 = vst.msk [vmem:[%s14288_s22 + $0x2b] sm:$0x1] %vm7356_vm11, %v8735_v31 }
 0x926   : > { %8984 = vrot.lane.b32.xlu1 %v14776_v14, %s15382_s12  ;;  %v8374_v41 = vpop.permute.xlu0 %8373 }
 0x927   : > { %8394 = vst.msk [vmem:[%s14288_s22 + $0x38] sm:$0x1] %vm7356_vm11, %v8374_v41 }
 0x928   : > { %v8739_v43 = vpop.permute.xlu1 %8738  ;;  %8744 = vrot.lane.b32.xlu0 %v8366_v22, %s15379_s20 }
 0x929   : > { %8758 = vst.msk [vmem:[%s14288_s22 + $0x4b] sm:$0x1] %vm7356_vm11, %v8739_v43 }
 0x92a   : > { %8233 = vrot.lane.b32.xlu1 %v8184_v21, %s15375_s26  ;;  %v8378_v18 = vpop.permute.xlu0 %8377 }
 0x92b   : > { %8396 = vst.msk [vmem:[%s14288_s22 + $0x58] sm:$0x1] %vm7356_vm11, %v8378_v18 }
 0x92c   : > { %v8856_v53 = vpop.permute.xlu1 %8855  ;;  %8865 = vrot.lane.b32.xlu0 %v8366_v22, %s15380_s19 }
 0x92d   : > { %8877 = vst.msk [vmem:[%s14288_s22 + $0x2c] sm:$0x1] %vm7356_vm11, %v8856_v53 }
 0x92e   : > { %8249 = vrot.lane.b32.xlu1 %v8216_v52, %s15375_s26  ;;  %v8495_v59 = vpop.permute.xlu0 %8494  ;;  %s11669_s26 = smov [#allocation3]  }
 0x92f   : > { %8515 = vst.msk [vmem:[%s14288_s22 + $0x39] sm:$0x1] %vm7356_vm11, %v8495_v59  ;;  %s11579_s23 = sshll.u32 %s11669_s26, 4  ;;  %s11580_s23 = int_to_ptr.vmem [resolvable:$false] %s11579_s23 }
 0x930   : > { %v8860_v0 = vpop.permute.xlu1 %8859  ;;  %9148 = vrot.lane.b32.xlu0 %v9101_v8, %s15381_s25  ;;  %s11581_s17 = scalar_lea.vmem %s11580_s23, 4096  ;;  %p11582_p0 = scmp.lt.s32.totalorder %s15046_s1, %s11580_s23 }
 0x931   : > { %8879 = vst.msk [vmem:[%s14288_s22 + $0x4c] sm:$0x1] %vm7356_vm11, %v8860_v0  ;;  %p11583_p1 = scmp.lt.s32.totalorder %s11581_s17, %s11575_s24 }
 0x932   : > { %9146 = vrot.lane.b32.xlu1 %v9097_v47, %s15381_s25  ;;  %v8499_v27 = vpop.permute.xlu0 %8498 }
 0x933   : > { %8517 = vst.msk [vmem:[%s14288_s22 + $0x59] sm:$0x1] %vm7356_vm11, %v8499_v27  ;;  %p11584_p2 = por %p11583_p1, %p11582_p0 }
 0x934   : > { %v9135_v4 = vpop.permute.xlu1 %9134  ;;  %9164 = vrot.lane.b32.xlu0 %v9133_v12, %s15381_s25 }
 0x935   : > { %v9166_v61 = vsel %vm508_vm1, %v9135_v4, %v14681_v44  ;;  %p11585_p3 = pnand %p11584_p2, %p11578_p13 }
 0x936   : > { %9182 = vst.msk [vmem:[%s14288_s22 + $0xe] sm:$0x1] %vm7356_vm11, %v9166_v61  ;;  %9162 = vrot.lane.b32.xlu1 %v9129_v42, %s15381_s25  ;;  %v8616_v50 = vpop.permute.xlu0 %8615 }
 0x937   : > { %8636 = vst.msk [vmem:[%s14288_s22 + $0x3a] sm:$0x1] %vm7356_vm11, %v8616_v50 }
 0x938   : > { %v9151_v19 = vpop.permute.xlu1 %9150  ;;  %8986 = vrot.lane.b32.xlu0 %v8366_v22, %s15382_s12  ;;  %v10495_v22 = vpop.f32.mrb[140].mxu1 }
 0x939   : > { %v9170_v44 = vsel %vm508_vm1, %v9151_v19, %v14693_v5  ;;  %v7255_v23 = vpop.f32.mrb[141].mxu1 }
 0x93a   : > { %9186 = vst.msk [vmem:[%s14288_s22 + $0x4e] sm:$0x1] %vm7356_vm11, %v9170_v44  ;;  %9291 = vrot.lane.b32.xlu1 %v9274_v32, %s15383_s18  ;;  %v8620_v56 = vpop.permute.xlu0 %8619  ;;  %v10498_v54 = vpop.f32.mrb[142].mxu1 }
 0x93b   : > { %8638 = vst.msk [vmem:[%s14288_s22 + $0x5a] sm:$0x1] %vm7356_vm11, %v8620_v56  ;;  %v7263_v41 = vpop.f32.mrb[143].mxu1 }
 0x93c   : > { %v8977_v10 = vpop.permute.xlu1 %8976  ;;  %9293 = vrot.lane.b32.xlu0 %v9278_v58, %s15383_s18  ;;  %s15044_s18 = scalar_lea.hbm %s15103_s8, %s9823_s0 }
 0x93d   : > { %8998 = vst.msk [vmem:[%s14288_s22 + $0x2d] sm:$0x1] %vm7356_vm11, %v8977_v10 }
 0x93e   : > { %v8737_v60 = vpop.permute.xlu0 %8736 }
 0x93f   : > { %8757 = vst.msk [vmem:[%s14288_s22 + $0x3b] sm:$0x1] %vm7356_vm11, %v8737_v60 }
 0x940   : > { %v8981_v5 = vpop.permute.xlu1 %8980 }
 0x941   : > { %9000 = vst.msk [vmem:[%s14288_s22 + $0x4d] sm:$0x1] %vm7356_vm11, %v8981_v5 }
 0x942   : > { %v8741_v26 = vpop.permute.xlu0 %8740 }
 0x943   : > { %8759 = vst.msk [vmem:[%s14288_s22 + $0x5b] sm:$0x1] %vm7356_vm11, %v8741_v26 }
 0x944   : > { %v9284_v57 = vpop.permute.xlu1 %9283 }
 0x945   : > { %9305 = vst.msk [vmem:[%s14288_s22 + $0x2f] sm:$0x1] %vm7356_vm11, %v9284_v57 }
 0x946   : > { %v8858_v2 = vpop.permute.xlu0 %8857 }
 0x947   : > { %8878 = vst.msk [vmem:[%s14288_s22 + $0x3c] sm:$0x1] %vm7356_vm11, %v8858_v2 }
 0x948   : > { %v9288_v29 = vpop.permute.xlu1 %9287 }
 0x949   : > { %9307 = vst.msk [vmem:[%s14288_s22 + $0x4f] sm:$0x1] %vm7356_vm11, %v9288_v29 }
 0x94a   : > { %v8862_v11 = vpop.permute.xlu0 %8861 }
 0x94b   : > { %8880 = vst.msk [vmem:[%s14288_s22 + $0x5c] sm:$0x1] %vm7356_vm11, %v8862_v11 }
 0x94c   : > { %v7467_v14 = vpop.permute.xlu1 %7466 }
 0x94d   : > { %7484 = vst.msk [vmem:[%s14288_s22 + $0x61] sm:$0x1] %vm7356_vm11, %v7467_v14 }
 0x94e   : > { %v14933_v13 = vpop.permute.xlu0 %9140 }
 0x950   : > { %v7588_v24 = vpop.permute.xlu1 %7587 }
 0x951   : > { %7605 = vst.msk [vmem:[%s14288_s22 + $0x62] sm:$0x1] %vm7356_vm11, %v7588_v24 }
 0x952   : > { %v14937_v40 = vpop.permute.xlu0 %9144 }
 0x954   : > { %v7709_v9 = vpop.permute.xlu1 %7708 }
 0x955   : > { %7726 = vst.msk [vmem:[%s14288_s22 + $0x63] sm:$0x1] %vm7356_vm11, %v7709_v9 }
 0x956   : > { %v14941_v37 = vpop.permute.xlu0 %9156 }
 0x958   : > { %v7830_v45 = vpop.permute.xlu1 %7829 }
 0x959   : > { %7847 = vst.msk [vmem:[%s14288_s22 + $0x64] sm:$0x1] %vm7356_vm11, %v7830_v45 }
 0x95a   : > { %v14945_v48 = vpop.permute.xlu0 %9160 }
 0x95c   : > { %v7951_v15 = vpop.permute.xlu1 %7950 }
 0x95d   : > { %7968 = vst.msk [vmem:[%s14288_s22 + $0x65] sm:$0x1] %vm7356_vm11, %v7951_v15 }
 0x95e   : > { %v8979_v49 = vpop.permute.xlu0 %8978 }
 0x95f   : > { %8999 = vst.msk [vmem:[%s14288_s22 + $0x3d] sm:$0x1] %vm7356_vm11, %v8979_v49 }
 0x960   : > { %v8072_v36 = vpop.permute.xlu1 %8071 }
 0x961   : > { %8089 = vst.msk [vmem:[%s14288_s22 + $0x66] sm:$0x1] %vm7356_vm11, %v8072_v36 }
 0x962   : > { %v8983_v34 = vpop.permute.xlu0 %8982 }
 0x963   : > { %9001 = vst.msk [vmem:[%s14288_s22 + $0x5d] sm:$0x1] %vm7356_vm11, %v8983_v34 }
 0x964   : > { %v8226_v6 = vpop.permute.xlu1 %8225 }
 0x965   : > { %v8255_v31 = vsel %vm8253_vm12, %v8226_v6, %v14827_v30 }
 0x966   : > { %8271 = vst.msk [vmem:[%s14288_s22 + $0x17] sm:$0x1] %vm7356_vm11, %v8255_v31  ;;  %v9286_v43 = vpop.permute.xlu0 %9285 }
 0x967   : > { %9306 = vst.msk [vmem:[%s14288_s22 + $0x3f] sm:$0x1] %vm7356_vm11, %v9286_v43 }
 0x968   : > { %v8230_v21 = vpop.permute.xlu1 %8229 }
 0x969   : > { %v8256_v18 = vsel %vm8253_vm12, %v8230_v21, %v14838_v28 }
 0x96a   : > { %8272 = vst.msk [vmem:[%s14288_s22 + $0x27] sm:$0x1] %vm7356_vm11, %v8256_v18  ;;  %v9290_v17 = vpop.permute.xlu0 %9289 }
 0x96b   : > { %9308 = vst.msk [vmem:[%s14288_s22 + $0x5f] sm:$0x1] %vm7356_vm11, %v9290_v17 }
 0x96c   : > { %v8242_v30 = vpop.permute.xlu1 %8241 }
 0x96d   : > { %v8259_v53 = vsel %vm8253_vm12, %v8242_v30, %v14847_v33 }
 0x96e   : > { %8275 = vst.msk [vmem:[%s14288_s22 + $0x57] sm:$0x1] %vm7356_vm11, %v8259_v53  ;;  %v7469_v52 = vpop.permute.xlu0 %7468 }
 0x96f   : > { %7485 = vst.msk [vmem:[%s14288_s22 + $0x71] sm:$0x1] %vm7356_vm11, %v7469_v52 }
 0x970   : > { %v8246_v59 = vpop.permute.xlu1 %8245 }
 0x971   : > { %v8260_v28 = vsel %vm8253_vm12, %v8246_v59, %v14855_v1 }
 0x972   : > { %8276 = vst.msk [vmem:[%s14288_s22 + $0x67] sm:$0x1] %vm7356_vm11, %v8260_v28  ;;  %v7590_v8 = vpop.permute.xlu0 %7589 }
 0x973   : > { %7606 = vst.msk [vmem:[%s14288_s22 + $0x72] sm:$0x1] %vm7356_vm11, %v7590_v8 }
 0x974   : > { %v8380_v33 = vpop.permute.xlu1 %8379 }
 0x975   : > { %8397 = vst.msk [vmem:[%s14288_s22 + $0x68] sm:$0x1] %vm7356_vm11, %v8380_v33 }
 0x976   : > { %v7711_v46 = vpop.permute.xlu0 %7710 }
 0x977   : > { %7727 = vst.msk [vmem:[%s14288_s22 + $0x73] sm:$0x1] %vm7356_vm11, %v7711_v46 }
 0x978   : > { %v8501_v0 = vpop.permute.xlu1 %8500 }
 0x979   : > { %8518 = vst.msk [vmem:[%s14288_s22 + $0x69] sm:$0x1] %vm7356_vm11, %v8501_v0 }
 0x97a   : > { %v7832_v47 = vpop.permute.xlu0 %7831 }
 0x97b   : > { %7848 = vst.msk [vmem:[%s14288_s22 + $0x74] sm:$0x1] %vm7356_vm11, %v7832_v47 }
 0x97c   : > { %v8622_v1 = vpop.permute.xlu1 %8621 }
 0x97d   : > { %8639 = vst.msk [vmem:[%s14288_s22 + $0x6a] sm:$0x1] %vm7356_vm11, %v8622_v1 }
 0x97e   : > { %v7953_v27 = vpop.permute.xlu0 %7952 }
 0x97f   : > { %7969 = vst.msk [vmem:[%s14288_s22 + $0x75] sm:$0x1] %vm7356_vm11, %v7953_v27 }
 0x980   : > { %v8743_v12 = vpop.permute.xlu1 %8742 }
 0x981   : > { %8760 = vst.msk [vmem:[%s14288_s22 + $0x6b] sm:$0x1] %vm7356_vm11, %v8743_v12 }
 0x982   : > { %v8074_v4 = vpop.permute.xlu0 %8073 }
 0x983   : > { %8090 = vst.msk [vmem:[%s14288_s22 + $0x76] sm:$0x1] %vm7356_vm11, %v8074_v4 }
 0x984   : > { %v8864_v42 = vpop.permute.xlu1 %8863 }
 0x985   : > { %8881 = vst.msk [vmem:[%s14288_s22 + $0x6c] sm:$0x1] %vm7356_vm11, %v8864_v42 }
 0x986   : > { %v8236_v51 = vpop.permute.xlu0 %8235 }
 0x988   : > { %v9139_v61 = vpop.permute.xlu1 %9138 }
 0x989   : > { %v9167_v50 = vsel %vm508_vm1, %v9139_v61, %v14933_v13 }
 0x98a   : > { %9183 = vst.msk [vmem:[%s14288_s22 + $0x1e] sm:$0x1] %vm7356_vm11, %v9167_v50  ;;  %v8252_v63 = vpop.permute.xlu0 %8251 }
 0x98c   : > { %v9143_v19 = vpop.permute.xlu1 %9142 }
 0x98d   : > { %v9168_v32 = vsel %vm508_vm1, %v9143_v19, %v14937_v40 }
 0x98e   : > { %9184 = vst.msk [vmem:[%s14288_s22 + $0x2e] sm:$0x1] %vm7356_vm11, %v9168_v32  ;;  %v8382_v44 = vpop.permute.xlu0 %8381 }
 0x98f   : > { %8398 = vst.msk [vmem:[%s14288_s22 + $0x78] sm:$0x1] %vm7356_vm11, %v8382_v44 }
 0x990   : > { %v9155_v56 = vpop.permute.xlu1 %9154 }
 0x991   : > { %v9171_v58 = vsel %vm508_vm1, %v9155_v56, %v14941_v37 }
 0x992   : > { %9187 = vst.msk [vmem:[%s14288_s22 + $0x5e] sm:$0x1] %vm7356_vm11, %v9171_v58  ;;  %v8503_v10 = vpop.permute.xlu0 %8502 }
 0x993   : > { %8519 = vst.msk [vmem:[%s14288_s22 + $0x79] sm:$0x1] %vm7356_vm11, %v8503_v10 }
 0x994   : > { %v9159_v60 = vpop.permute.xlu1 %9158 }
 0x995   : > { %v9172_v5 = vsel %vm508_vm1, %v9159_v60, %v14945_v48 }
 0x996   : > { %9188 = vst.msk [vmem:[%s14288_s22 + $0x6e] sm:$0x1] %vm7356_vm11, %v9172_v5  ;;  %v8624_v26 = vpop.permute.xlu0 %8623 }
 0x997   : > { %8640 = vst.msk [vmem:[%s14288_s22 + $0x7a] sm:$0x1] %vm7356_vm11, %v8624_v26 }
 0x998   : > { %v8985_v57 = vpop.permute.xlu1 %8984 }
 0x999   : > { %9002 = vst.msk [vmem:[%s14288_s22 + $0x6d] sm:$0x1] %vm7356_vm11, %v8985_v57 }
 0x99a   : > { %v8745_v2 = vpop.permute.xlu0 %8744 }
 0x99b   : > { %8761 = vst.msk [vmem:[%s14288_s22 + $0x7b] sm:$0x1] %vm7356_vm11, %v8745_v2 }
 0x99c   : > { %v8234_v29 = vpop.permute.xlu1 %8233 }
 0x99d   : > { %v8257_v11 = vsel %vm8253_vm12, %v8234_v29, %v8236_v51 }
 0x99e   : > { %8273 = vst.msk [vmem:[%s14288_s22 + $0x37] sm:$0x1] %vm7356_vm11, %v8257_v11  ;;  %v8866_v14 = vpop.permute.xlu0 %8865 }
 0x99f   : > { %8882 = vst.msk [vmem:[%s14288_s22 + $0x7c] sm:$0x1] %vm7356_vm11, %v8866_v14 }
 0x9a0   : > { %v8250_v7 = vpop.permute.xlu1 %8249 }
 0x9a1   : > { %v8261_v3 = vsel %vm8253_vm12, %v8250_v7, %v8252_v63 }
 0x9a2   : > { %8277 = vst.msk [vmem:[%s14288_s22 + $0x77] sm:$0x1] %vm7356_vm11, %v8261_v3  ;;  %v9149_v13 = vpop.permute.xlu0 %9148 }
 0x9a4   : > { %v9147_v24 = vpop.permute.xlu1 %9146 }
 0x9a5   : > { %v9169_v55 = vsel %vm508_vm1, %v9147_v24, %v9149_v13 }
 0x9a6   : > { %9185 = vst.msk [vmem:[%s14288_s22 + $0x3e] sm:$0x1] %vm7356_vm11, %v9169_v55  ;;  %v9165_v39 = vpop.permute.xlu0 %9164 }
 0x9a8   : > { %v9163_v40 = vpop.permute.xlu1 %9162 }
 0x9a9   : > { %v9173_v9 = vsel %vm508_vm1, %v9163_v40, %v9165_v39 }
 0x9aa   : > { %9189 = vst.msk [vmem:[%s14288_s22 + $0x7e] sm:$0x1] %vm7356_vm11, %v9173_v9  ;;  %v8987_v16 = vpop.permute.xlu0 %8986 }
 0x9ab   : > { %9003 = vst.msk [vmem:[%s14288_s22 + $0x7d] sm:$0x1] %vm7356_vm11, %v8987_v16 }
 0x9ac   : > { %v9292_v20 = vpop.permute.xlu1 %9291 }
 0x9ad   : > { %9309 = vst.msk [vmem:[%s14288_s22 + $0x6f] sm:$0x1] %vm7356_vm11, %v9292_v20 }
 0x9ae   : > { %v9294_v37 = vpop.permute.xlu0 %9293 }
 0x9af   : > { %9310 = vst.msk [vmem:[%s14288_s22 + $0x7f] sm:$0x1] %vm7356_vm11, %v9294_v37 }
 0x9b0   : > { %11588 = shalt.err (!%p11585_p3)
}
 0x9b1   : > { %s11589_s22 = scalar_lea.hbm %s15044_s18, 2048  ;;  %s11593_s19 = scalar_lea.hbm %s15103_s8, 4096 }
 0x9b2   : > { %p11590_p4 = scmp.ne.s32.totalorder %s15044_s18, %s11589_s22  ;;  %p11594_p9 = scmp.lt.u32.totalorder %s15044_s18, %s15103_s8 }
 0x9b3   : > { %p11595_p10 = scmp.lt.u32.totalorder %s11593_s19, %s11589_s22  ;;  %p11597_p12 = scmp.lt.u32.totalorder %s11589_s22, %s15044_s18 }
 0x9b4   : > { %p11591_p7 = pnand %p11590_p4, %p11755_p5 }
 0x9b5   : > { %p11596_p11 = por %p11595_p10, %p11594_p9 }
 0x9b6   : > { %p11592_p8 = pneg %p11591_p7 }
 0x9b7   : > { %p11598_p13 = por %p11597_p12, %p11596_p11 }
 0x9b9   : > { %p11599_p0 = pnand %p11598_p13, %p11592_p8 }
 0x9bb   : > { %11602 = shalt.err (!%p11599_p0)
}
 0x9bc   : > { %s11670_s0 = smov 128   ;;  %s11671_s2 = smov 8  }
 0x9bd   : > { %11343 = dma.vmem_to_hbm [thread:$0]  (%p11755_p5), %s15046_s1, 2048, %s15044_s18, %s15054_s13, %s11670_s0, %s11670_s0, %s11671_s2  }
 0x9be PF: > { %p11349_p1 = scmp.ge.s32.totalorder %s11637_s30, 2  ;;  %s9340_s21 = sand.u32 1, %s11625_s27  }
 0x9bf   : > { %s9341_s9 = scalar_lea.sflag [#allocation4], %s9340_s21 }
 0x9c0   : > { %p11346_p2 = pnand %p11349_p1, %p11759_p6 }
 0x9c2   : > { %11620 = dma.done.wait (!%p11346_p2), %s9341_s9, 2048  }
 0x9c3   : > { %11622 = vsyncadd (!%p11346_p2), %s9341_s9, 4294965248  ;;  %p18_p3 = scmp.ge.s32.totalorder %s11742_s11, 4   ;;  %s15389_s27 = smov %s11629_s28 }
 0x9c4   : > { %s15390_s28 = smov %s11633_s29  ;;  %s15391_s29 = smov %s11753_s14 }
 0x9c5   : > { %s15392_s30 = smov %s11742_s11  ;;  %20 = sbr.rel (!%p18_p3) target bundleno = 7 (0x7), region = 87 }
 0x9cc   :  { %9346 = vsyncpa [#allocation4], 1 }
 0x9cd   :  { %9348 = vsyncpa [#allocation4 + $0x1], 1 }

</bundles_post_ra>
